<compile_context>
chip_gen: v7x
topology: tpu7x:2x2x1
jax: 0.10.0
libtpu: 0.0.40
codegen_flags: <defaults>
</compile_context>

<pallas_src>
import functools
import math

import jax
import jax.numpy as jnp
from jax import lax
from jax.experimental import pallas as pl
from jax.experimental.pallas import tpu as pltpu

_SQRT2 = math.sqrt(2.0)
_SQRT_2_OVER_PI = math.sqrt(2.0 / math.pi)


def _gelu_exact(x):
    # Exact (erf-based) GELU, matching torch.nn.functional.gelu default.
    return 0.5 * x * (1.0 + lax.erf(x / _SQRT2))


def _gelu_approx(x):
    # tanh-approx GELU: transcendental lands on the EUP slot instead of VALU.
    return 0.5 * x * (1.0 + jnp.tanh(_SQRT_2_OVER_PI * (x + 0.044715 * x * x * x)))


def _round_up(x, m):
    return (x + m - 1) // m * m


# ----------------------------------------------------------------------------
# Fully fused kernel: ffn1 -> depthwise convs -> pw -> ffn2, one image block.
# ----------------------------------------------------------------------------
def _fused_block_kernel(*refs, ks, H, W, cin, has_dw, cw_off, approx):
    gelu = _gelu_approx if approx else _gelu_exact
    nconv = len(ks)

    x_ref = refs[0]
    f1w1, f1b1, f1w2, f1b2 = refs[1:5]
    conv_refs = refs[5:5 + 2 * nconv]
    pw_w, pw_b, f2w1, f2b1, f2w2, f2b2 = refs[5 + 2 * nconv:11 + 2 * nconv]
    o_ref = refs[11 + 2 * nconv]
    zp_ref = refs[12 + 2 * nconv] if has_dw else None

    # Stage 1: y = gelu(x + ffn1(x)).  Hidden width zero-padded to 128*n so
    # the MXU result dim and the hidden activation stay lane-dense.
    x = x_ref[0].astype(jnp.float32)                                   # (HW, Cin)
    h = gelu(jnp.dot(x, f1w1[...], preferred_element_type=jnp.float32) + f1b1[0, :])
    y = gelu(x + jnp.dot(h, f1w2[...], preferred_element_type=jnp.float32)
             + f1b2[0, :])

    # Stage 2: depthwise convs, each y = gelu(y + conv_k(y) + b).  The residual
    # is folded into the center tap (k>1) / the scale (k=1) on the host.
    for i, k in enumerate(ks):
        w_ref = conv_refs[2 * i]
        b_ref = conv_refs[2 * i + 1]
        if k == 1:
            y = gelu(y * w_ref[0, :] + b_ref[0, :])
        else:
            p = k // 2
            Hp = H + 2 * p
            # Zero the halo scratch, then place the image interior at
            # (row=p, col=cw_off); cw_off is 8-aligned => aligned store.
            zp_ref[...] = jnp.zeros_like(zp_ref)
            # TODO(synk): W % 8 != 0 turns this reshape into a real relayout;
            # fall back to per-row stores in that case.
            zp_ref[p:p + H, cw_off:cw_off + W, :] = y.reshape(H, W, cin)
            acc = jnp.zeros((H, W, cin), jnp.float32)
            # One unaligned W(sublane)-axis slice per column offset, hoisted
            # out of the row-offset loop; row shifts are cheap leading-dim
            # slices.  TODO(synk): lax.fori_loop over taps for large k.
            for dwo in range(k):
                c0 = cw_off - p + dwo
                xw = zp_ref[0:Hp, c0:c0 + W, :]                        # (Hp, W, Cin)
                for dh in range(k):
                    acc = acc + xw[dh:dh + H] * w_ref[dh, dwo, :]
            y = gelu(acc + b_ref[0, :]).reshape(H * W, cin)

    # Stage 3: y = gelu(y + pw(y)); out = ffn2(y)  (no final activation).
    y = gelu(y + jnp.dot(y, pw_w[...], preferred_element_type=jnp.float32)
             + pw_b[0, :])
    h2 = gelu(jnp.dot(y, f2w1[...], preferred_element_type=jnp.float32) + f2b1[0, :])
    out = jnp.dot(h2, f2w2[...], preferred_element_type=jnp.float32) + f2b2[0, :]
    o_ref[0] = out.astype(o_ref.dtype)


# ----------------------------------------------------------------------------
# PCBlock4_Deep_nopool_res forward (NHWC)
# ----------------------------------------------------------------------------
def pcblock_forward(x, p, k_conv, c_out, approx_gelu=True):
    Nb, H, W, Cin = x.shape
    HW = H * W
    ks = tuple(k_conv)

    x2 = x.reshape(Nb, HW, Cin)          # free relayout in XLA (HBM view)
    Chp = p["ffn1_w1"].shape[1]
    Coutp = p["ffn2_w2"].shape[1]

    args = [x2, p["ffn1_w1"], p["ffn1_b1"], p["ffn1_w2"], p["ffn1_b2"]]
    for cw, cb in zip(p["conv_w"], p["conv_b"]):
        args += [cw, cb]
    args += [p["pw_w"], p["pw_b"],
             p["ffn2_w1"], p["ffn2_b1"], p["ffn2_w2"], p["ffn2_b2"]]

    in_specs = [pl.BlockSpec((1, HW, Cin), lambda n: (n, 0, 0))]
    for a in args[1:]:
        in_specs.append(pl.BlockSpec(a.shape, lambda n, nd=a.ndim: (0,) * nd))

    has_dw = any(k > 1 for k in ks)
    scratch_shapes = []
    cw_off = 0
    if has_dw:
        pmax = max(k // 2 for k in ks if k > 1)
        cw_off = _round_up(max(pmax, 1), 8)          # 8-aligned interior store
        scratch_w = _round_up(cw_off + W + pmax, 8)
        scratch_shapes.append(
            pltpu.VMEM((H + 2 * pmax, scratch_w, Cin), jnp.float32))

    kernel = functools.partial(_fused_block_kernel, ks=ks, H=H, W=W, cin=Cin,
                               has_dw=has_dw, cw_off=cw_off, approx=approx_gelu)

    # Advisory cost estimate so XLA schedules the surrounding reshapes well.
    wbytes = sum(int(a.size) * a.dtype.itemsize for a in args[1:])
    flops_mm = 2 * HW * (Cin * Chp + Chp * Cin + Cin * Cin + Cin * Chp + Chp * Coutp)
    flops_dw = sum(2 * HW * k * k * Cin for k in ks if k > 1)
    n_gelu = HW * (2 * Chp + Cin * (2 + len(ks)))
    cost = pl.CostEstimate(
        flops=int(Nb * (flops_mm + flops_dw + 4 * n_gelu)),
        transcendentals=int(Nb * n_gelu),
        bytes_accessed=int(Nb * HW * (Cin + Coutp) * x.dtype.itemsize + wbytes))

    out = pl.pallas_call(
        kernel,
        out_shape=jax.ShapeDtypeStruct((Nb, HW, Coutp), x.dtype),
        grid=(Nb,),
        in_specs=in_specs,
        out_specs=pl.BlockSpec((1, HW, Coutp), lambda n: (n, 0, 0)),
        scratch_shapes=scratch_shapes,
        compiler_params=pltpu.CompilerParams(dimension_semantics=("parallel",)),
        cost_estimate=cost,
    )(*args)

    if Coutp != c_out:
        out = out[:, :, :c_out]
    return out.reshape(Nb, H, W, c_out)


# ----------------------------------------------------------------------------
# Parameters: synthetic raw init + host-side preparation (folding / padding)
# ----------------------------------------------------------------------------
def init_pcblock_raw(key, C_in, C_out, k_conv):
    Ch = int(1.5 * C_in)
    keys = jax.random.split(key, 10 + 2 * len(k_conv))

    def w(kk, shape):
        return jax.random.normal(kk, shape, jnp.float32) * 0.02

    def b(kk, n):
        return jax.random.normal(kk, (n,), jnp.float32) * 0.01

    return {
        "ffn1_w1": w(keys[0], (C_in, Ch)), "ffn1_b1": b(keys[1], Ch),
        "ffn1_w2": w(keys[2], (Ch, C_in)), "ffn1_b2": b(keys[3], C_in),
        "pw_w": w(keys[4], (C_in, C_in)), "pw_b": b(keys[5], C_in),
        "ffn2_w1": w(keys[6], (C_in, Ch)), "ffn2_b1": b(keys[7], Ch),
        "ffn2_w2": w(keys[8], (Ch, C_out)), "ffn2_b2": b(keys[9], C_out),
        "dw_w": [w(keys[10 + 2 * i], (k, k, C_in)) for i, k in enumerate(k_conv)],
        "dw_b": [b(keys[11 + 2 * i], C_in) for i, _ in enumerate(k_conv)],
    }


def prepare_params(raw, C_in, C_out, k_conv, lane=128):
    """Host-side re-layout / folding:
       - zero-pad the hidden width 1.5*C_in and the output channels to a
         multiple of 128 (lane-dense MXU results / unmasked stores),
       - reshape biases to (1, C) for lane broadcast,
       - fold k=1 depthwise convs into a per-channel scale (1+w) + bias,
       - fold the residual of k>1 depthwise convs into the center tap."""
    Ch = raw["ffn1_w1"].shape[1]
    hpad = _round_up(Ch, lane) - Ch
    cpad = _round_up(C_out, lane) - C_out

    def padc(w, n):
        return jnp.pad(w, ((0, 0), (0, n))) if n else w

    def padr(w, n):
        return jnp.pad(w, ((0, n), (0, 0))) if n else w

    def padv(b, n):
        return jnp.pad(b, ((0, n),)) if n else b

    p = {
        "ffn1_w1": padc(raw["ffn1_w1"], hpad),
        "ffn1_b1": padv(raw["ffn1_b1"], hpad).reshape(1, -1),
        "ffn1_w2": padr(raw["ffn1_w2"], hpad),
        "ffn1_b2": raw["ffn1_b2"].reshape(1, -1),
        "pw_w": raw["pw_w"],
        "pw_b": raw["pw_b"].reshape(1, -1),
        "ffn2_w1": padc(raw["ffn2_w1"], hpad),
        "ffn2_b1": padv(raw["ffn2_b1"], hpad).reshape(1, -1),
        "ffn2_w2": padc(padr(raw["ffn2_w2"], hpad), cpad),
        "ffn2_b2": padv(raw["ffn2_b2"], cpad).reshape(1, -1),
    }
    conv_w, conv_b = [], []
    for i, k in enumerate(k_conv):
        wk, bk = raw["dw_w"][i], raw["dw_b"][i]
        if k == 1:
            conv_w.append(1.0 + wk.reshape(1, C_in))       # gelu(y*(1+w)+b)
        else:
            conv_w.append(wk.at[k // 2, k // 2, :].add(1.0))  # fold residual
        conv_b.append(bk.reshape(1, C_in))
    p["conv_w"], p["conv_b"] = conv_w, conv_b
    return p


# ----------------------------------------------------------------------------
# Pure-JAX NHWC references (mirror the PyTorch forward) for correctness check
# ----------------------------------------------------------------------------
def pcblock_reference(x, raw, k_conv, approx=False):
    gelu = _gelu_approx if approx else _gelu_exact

    def pw(h, w, b):
        return jnp.einsum("nhwc,cd->nhwd", h, w,
                          precision=lax.Precision.HIGHEST) + b

    def dw(h, w, b, k):
        pad = k // 2
        hp = jnp.pad(h, ((0, 0), (pad, pad), (pad, pad), (0, 0)))
        H, W = h.shape[1], h.shape[2]
        out = jnp.zeros_like(h)
        for dh in range(k):
            for dwi in range(k):
                out = out + hp[:, dh:dh + H, dwi:dwi + W, :] * w[dh, dwi, :]
        return out + b

    y = gelu(x + pw(gelu(pw(x, raw["ffn1_w1"], raw["ffn1_b1"])),
                    raw["ffn1_w2"], raw["ffn1_b2"]))
    for i, k in enumerate(k_conv):
        y = gelu(y + dw(y, raw["dw_w"][i], raw["dw_b"][i], k))
    y = gelu(y + pw(y, raw["pw_w"], raw["pw_b"]))
    y = pw(gelu(pw(y, raw["ffn2_w1"], raw["ffn2_b1"])),
           raw["ffn2_w2"], raw["ffn2_b2"])
    return y


if __name__ == "__main__":
    key = jax.random.PRNGKey(0)
    Nb, H, W = 2, 16, 16
    C_in, C_out = 64, 128
    k_conv = (1, 3)   # odd kernels only (PyTorch padding=k//2 same-size conv)

    kx, kp = jax.random.split(key)
    # Layout note: inputs are NHWC (the PyTorch reference module is NCHW).
    x = jax.random.normal(kx, (Nb, H, W, C_in), jnp.float32)

    raw = init_pcblock_raw(kp, C_in, C_out, k_conv)
    params = prepare_params(raw, C_in, C_out, k_conv)

    fwd = jax.jit(functools.partial(pcblock_forward, k_conv=k_conv,
                                    c_out=C_out))
    out = jax.block_until_ready(fwd(x, params))

    # Tight check vs a reference using the same (tanh-approx) GELU: verifies
    # the kernel math (fusions, halo handling, residual folds).
    ref_approx = pcblock_reference(x, raw, k_conv, approx=True)
    # Looser check vs the exact-erf GELU reference (torch default semantics).
    ref_exact = pcblock_reference(x, raw, k_conv, approx=False)

    err_a = float(jnp.max(jnp.abs(out - ref_approx)))
    err_e = float(jnp.max(jnp.abs(out - ref_exact)))

    assert out.shape == (Nb, H, W, C_out), out.shape
    assert out.dtype == jnp.float32
    assert err_a < 5e-3, f"max abs diff vs approx-gelu reference: {err_a}"
    assert err_e < 2e-2, f"max abs diff vs exact-gelu reference: {err_e}"
    print("KERNEL_OK")
</pallas_src>

<mosaic_0001>
module attributes {stable_mosaic.version = 11 : i64} {
  func.func @_fused_block_kernel(%arg0: i32, %arg1: memref<1x256x64xf32, #tpu.memory_space<vmem>>, %arg2: memref<64x128xf32, #tpu.memory_space<vmem>>, %arg3: memref<1x128xf32, #tpu.memory_space<vmem>>, %arg4: memref<128x64xf32, #tpu.memory_space<vmem>>, %arg5: memref<1x64xf32, #tpu.memory_space<vmem>>, %arg6: memref<1x64xf32, #tpu.memory_space<vmem>>, %arg7: memref<1x64xf32, #tpu.memory_space<vmem>>, %arg8: memref<3x3x64xf32, #tpu.memory_space<vmem>>, %arg9: memref<1x64xf32, #tpu.memory_space<vmem>>, %arg10: memref<64x64xf32, #tpu.memory_space<vmem>>, %arg11: memref<1x64xf32, #tpu.memory_space<vmem>>, %arg12: memref<64x128xf32, #tpu.memory_space<vmem>>, %arg13: memref<1x128xf32, #tpu.memory_space<vmem>>, %arg14: memref<128x128xf32, #tpu.memory_space<vmem>>, %arg15: memref<1x128xf32, #tpu.memory_space<vmem>>, %arg16: memref<1x256x128xf32, #tpu.memory_space<vmem>>, %arg17: memref<18x32x64xf32, #tpu.memory_space<vmem>>) attributes {dimension_semantics = [#tpu.dimension_semantics<parallel>], iteration_bounds = array<i64: 2>, scalar_prefetch = 0 : i64, scratch_operands = 1 : i64, tpu.core_type = #tpu.core_type<tc>, window_params = [{transform_indices = @transform_0, window_bounds = array<i64: 1, 256, 64>}, {pipeline_mode = #tpu.pipeline_mode<synchronous>, transform_indices = @transform_1, window_bounds = array<i64: 64, 128>}, {pipeline_mode = #tpu.pipeline_mode<synchronous>, transform_indices = @transform_2, window_bounds = array<i64: 1, 128>}, {pipeline_mode = #tpu.pipeline_mode<synchronous>, transform_indices = @transform_3, window_bounds = array<i64: 128, 64>}, {pipeline_mode = #tpu.pipeline_mode<synchronous>, transform_indices = @transform_4, window_bounds = array<i64: 1, 64>}, {pipeline_mode = #tpu.pipeline_mode<synchronous>, transform_indices = @transform_5, window_bounds = array<i64: 1, 64>}, {pipeline_mode = #tpu.pipeline_mode<synchronous>, transform_indices = @transform_6, window_bounds = array<i64: 1, 64>}, {pipeline_mode = #tpu.pipeline_mode<synchronous>, transform_indices = @transform_7, window_bounds = array<i64: 3, 3, 64>}, {pipeline_mode = #tpu.pipeline_mode<synchronous>, transform_indices = @transform_8, window_bounds = array<i64: 1, 64>}, {pipeline_mode = #tpu.pipeline_mode<synchronous>, transform_indices = @transform_9, window_bounds = array<i64: 64, 64>}, {pipeline_mode = #tpu.pipeline_mode<synchronous>, transform_indices = @transform_10, window_bounds = array<i64: 1, 64>}, {pipeline_mode = #tpu.pipeline_mode<synchronous>, transform_indices = @transform_11, window_bounds = array<i64: 64, 128>}, {pipeline_mode = #tpu.pipeline_mode<synchronous>, transform_indices = @transform_12, window_bounds = array<i64: 1, 128>}, {pipeline_mode = #tpu.pipeline_mode<synchronous>, transform_indices = @transform_13, window_bounds = array<i64: 128, 128>}, {pipeline_mode = #tpu.pipeline_mode<synchronous>, transform_indices = @transform_14, window_bounds = array<i64: 1, 128>}, {transform_indices = @transform_15, window_bounds = array<i64: 1, 256, 128>}]} {
    %c0 = arith.constant 0 : index
    %c0_0 = arith.constant 0 : index
    %c0_1 = arith.constant 0 : index
    %0 = vector.load %arg1[%c0, %c0_0, %c0_1] : memref<1x256x64xf32, #tpu.memory_space<vmem>>, vector<1x256x64xf32>
    %1 = vector.shape_cast %0 : vector<1x256x64xf32> to vector<256x64xf32>
    %c0_2 = arith.constant 0 : index
    %c0_3 = arith.constant 0 : index
    %2 = vector.load %arg2[%c0_2, %c0_3] : memref<64x128xf32, #tpu.memory_space<vmem>>, vector<64x128xf32>
    %cst = arith.constant dense<0.000000e+00> : vector<256x128xf32>
    %3 = tpu.matmul %1, %2, %cst {dimension_numbers = #tpu.dot_dimension_numbers<[1], [0], [0], [1], [0, 0, 1, 1], [], []>} : vector<256x64xf32>, vector<64x128xf32>, vector<256x128xf32> -> vector<256x128xf32>
    %c0_4 = arith.constant 0 : index
    %c0_5 = arith.constant 0 : index
    %4 = vector.load %arg3[%c0_4, %c0_5] : memref<1x128xf32, #tpu.memory_space<vmem>>, vector<1x128xf32>
    %5 = vector.shape_cast %4 : vector<1x128xf32> to vector<128xf32>
    %6 = vector.shape_cast %5 : vector<128xf32> to vector<1x128xf32>
    %7 = vector.broadcast %6 : vector<1x128xf32> to vector<256x128xf32>
    %8 = arith.addf %3, %7 : vector<256x128xf32>
    %cst_6 = arith.constant 5.000000e-01 : f32
    %9 = vector.broadcast %cst_6 : f32 to vector<256x128xf32>
    %10 = arith.mulf %9, %8 : vector<256x128xf32>
    %cst_7 = arith.constant 4.471500e-02 : f32
    %11 = vector.broadcast %cst_7 : f32 to vector<256x128xf32>
    %12 = arith.mulf %11, %8 : vector<256x128xf32>
    %13 = arith.mulf %12, %8 : vector<256x128xf32>
    %14 = arith.mulf %13, %8 : vector<256x128xf32>
    %15 = arith.addf %8, %14 : vector<256x128xf32>
    %cst_8 = arith.constant 0.797884583 : f32
    %16 = vector.broadcast %cst_8 : f32 to vector<256x128xf32>
    %17 = arith.mulf %16, %15 : vector<256x128xf32>
    %18 = math.tanh %17 : vector<256x128xf32>
    %cst_9 = arith.constant 1.000000e+00 : f32
    %19 = vector.broadcast %cst_9 : f32 to vector<256x128xf32>
    %20 = arith.addf %19, %18 : vector<256x128xf32>
    %21 = arith.mulf %10, %20 : vector<256x128xf32>
    %c0_10 = arith.constant 0 : index
    %c0_11 = arith.constant 0 : index
    %22 = vector.load %arg4[%c0_10, %c0_11] : memref<128x64xf32, #tpu.memory_space<vmem>>, vector<128x64xf32>
    %cst_12 = arith.constant dense<0.000000e+00> : vector<256x64xf32>
    %23 = tpu.matmul %21, %22, %cst_12 {dimension_numbers = #tpu.dot_dimension_numbers<[1], [0], [0], [1], [0, 0, 1, 1], [], []>} : vector<256x128xf32>, vector<128x64xf32>, vector<256x64xf32> -> vector<256x64xf32>
    %24 = arith.addf %1, %23 : vector<256x64xf32>
    %c0_13 = arith.constant 0 : index
    %c0_14 = arith.constant 0 : index
    %25 = vector.load %arg5[%c0_13, %c0_14] : memref<1x64xf32, #tpu.memory_space<vmem>>, vector<1x64xf32>
    %26 = vector.shape_cast %25 : vector<1x64xf32> to vector<64xf32>
    %27 = vector.shape_cast %26 : vector<64xf32> to vector<1x64xf32>
    %28 = vector.broadcast %27 : vector<1x64xf32> to vector<256x64xf32>
    %29 = arith.addf %24, %28 : vector<256x64xf32>
    %cst_15 = arith.constant 5.000000e-01 : f32
    %30 = vector.broadcast %cst_15 : f32 to vector<256x64xf32>
    %31 = arith.mulf %30, %29 : vector<256x64xf32>
    %cst_16 = arith.constant 4.471500e-02 : f32
    %32 = vector.broadcast %cst_16 : f32 to vector<256x64xf32>
    %33 = arith.mulf %32, %29 : vector<256x64xf32>
    %34 = arith.mulf %33, %29 : vector<256x64xf32>
    %35 = arith.mulf %34, %29 : vector<256x64xf32>
    %36 = arith.addf %29, %35 : vector<256x64xf32>
    %cst_17 = arith.constant 0.797884583 : f32
    %37 = vector.broadcast %cst_17 : f32 to vector<256x64xf32>
    %38 = arith.mulf %37, %36 : vector<256x64xf32>
    %39 = math.tanh %38 : vector<256x64xf32>
    %cst_18 = arith.constant 1.000000e+00 : f32
    %40 = vector.broadcast %cst_18 : f32 to vector<256x64xf32>
    %41 = arith.addf %40, %39 : vector<256x64xf32>
    %42 = arith.mulf %31, %41 : vector<256x64xf32>
    %c0_19 = arith.constant 0 : index
    %c0_20 = arith.constant 0 : index
    %43 = vector.load %arg6[%c0_19, %c0_20] : memref<1x64xf32, #tpu.memory_space<vmem>>, vector<1x64xf32>
    %44 = vector.shape_cast %43 : vector<1x64xf32> to vector<64xf32>
    %45 = vector.shape_cast %44 : vector<64xf32> to vector<1x64xf32>
    %46 = vector.broadcast %45 : vector<1x64xf32> to vector<256x64xf32>
    %47 = arith.mulf %42, %46 : vector<256x64xf32>
    %c0_21 = arith.constant 0 : index
    %c0_22 = arith.constant 0 : index
    %48 = vector.load %arg7[%c0_21, %c0_22] : memref<1x64xf32, #tpu.memory_space<vmem>>, vector<1x64xf32>
    %49 = vector.shape_cast %48 : vector<1x64xf32> to vector<64xf32>
    %50 = vector.shape_cast %49 : vector<64xf32> to vector<1x64xf32>
    %51 = vector.broadcast %50 : vector<1x64xf32> to vector<256x64xf32>
    %52 = arith.addf %47, %51 : vector<256x64xf32>
    %cst_23 = arith.constant 5.000000e-01 : f32
    %53 = vector.broadcast %cst_23 : f32 to vector<256x64xf32>
    %54 = arith.mulf %53, %52 : vector<256x64xf32>
    %cst_24 = arith.constant 4.471500e-02 : f32
    %55 = vector.broadcast %cst_24 : f32 to vector<256x64xf32>
    %56 = arith.mulf %55, %52 : vector<256x64xf32>
    %57 = arith.mulf %56, %52 : vector<256x64xf32>
    %58 = arith.mulf %57, %52 : vector<256x64xf32>
    %59 = arith.addf %52, %58 : vector<256x64xf32>
    %cst_25 = arith.constant 0.797884583 : f32
    %60 = vector.broadcast %cst_25 : f32 to vector<256x64xf32>
    %61 = arith.mulf %60, %59 : vector<256x64xf32>
    %62 = math.tanh %61 : vector<256x64xf32>
    %cst_26 = arith.constant 1.000000e+00 : f32
    %63 = vector.broadcast %cst_26 : f32 to vector<256x64xf32>
    %64 = arith.addf %63, %62 : vector<256x64xf32>
    %65 = arith.mulf %54, %64 : vector<256x64xf32>
    %cst_27 = arith.constant 0.000000e+00 : f32
    %66 = vector.broadcast %cst_27 : f32 to vector<18x32x64xf32>
    %c0_28 = arith.constant 0 : index
    %c0_29 = arith.constant 0 : index
    %c0_30 = arith.constant 0 : index
    %67 = vector.load %arg17[%c0_28, %c0_29, %c0_30] : memref<18x32x64xf32, #tpu.memory_space<vmem>>, vector<18x32x64xf32>
    tpu.vector_store %arg17[%c0_28, %c0_29, %c0_30], %66 {strides = array<i32>} : memref<18x32x64xf32, #tpu.memory_space<vmem>>, vector<18x32x64xf32>,
    %68 = vector.shape_cast %65 : vector<256x64xf32> to vector<16x16x64xf32>
    %c1 = arith.constant 1 : index
    %c8 = arith.constant 8 : index
    %c0_31 = arith.constant 0 : index
    %69 = vector.load %arg17[%c1, %c8, %c0_31] : memref<18x32x64xf32, #tpu.memory_space<vmem>>, vector<16x16x64xf32>
    tpu.vector_store %arg17[%c1, %c8, %c0_31], %68 {strides = array<i32>} : memref<18x32x64xf32, #tpu.memory_space<vmem>>, vector<16x16x64xf32>,
    %cst_32 = arith.constant 0.000000e+00 : f32
    %70 = vector.broadcast %cst_32 : f32 to vector<16x16x64xf32>
    %c0_33 = arith.constant 0 : index
    %c7 = arith.constant 7 : index
    %c0_34 = arith.constant 0 : index
    %71 = vector.load %arg17[%c0_33, %c7, %c0_34] : memref<18x32x64xf32, #tpu.memory_space<vmem>>, vector<18x16x64xf32>
    %72 = vector.extract_strided_slice %71 {offsets = [0, 0, 0], sizes = [16, 16, 64], strides = [1, 1, 1]} : vector<18x16x64xf32> to vector<16x16x64xf32>
    %c0_35 = arith.constant 0 : index
    %c0_36 = arith.constant 0 : index
    %c0_37 = arith.constant 0 : index
    %73 = vector.load %arg8[%c0_35, %c0_36, %c0_37] : memref<3x3x64xf32, #tpu.memory_space<vmem>>, vector<1x1x64xf32>
    %74 = vector.shape_cast %73 : vector<1x1x64xf32> to vector<64xf32>
    %75 = vector.shape_cast %74 : vector<64xf32> to vector<1x1x64xf32>
    %76 = vector.broadcast %75 : vector<1x1x64xf32> to vector<16x16x64xf32>
    %77 = arith.mulf %72, %76 : vector<16x16x64xf32>
    %78 = arith.addf %70, %77 : vector<16x16x64xf32>
    %79 = vector.extract_strided_slice %71 {offsets = [1, 0, 0], sizes = [16, 16, 64], strides = [1, 1, 1]} : vector<18x16x64xf32> to vector<16x16x64xf32>
    %c1_38 = arith.constant 1 : index
    %c0_39 = arith.constant 0 : index
    %c0_40 = arith.constant 0 : index
    %80 = vector.load %arg8[%c1_38, %c0_39, %c0_40] : memref<3x3x64xf32, #tpu.memory_space<vmem>>, vector<1x1x64xf32>
    %81 = vector.shape_cast %80 : vector<1x1x64xf32> to vector<64xf32>
    %82 = vector.shape_cast %81 : vector<64xf32> to vector<1x1x64xf32>
    %83 = vector.broadcast %82 : vector<1x1x64xf32> to vector<16x16x64xf32>
    %84 = arith.mulf %79, %83 : vector<16x16x64xf32>
    %85 = arith.addf %78, %84 : vector<16x16x64xf32>
    %86 = vector.extract_strided_slice %71 {offsets = [2, 0, 0], sizes = [16, 16, 64], strides = [1, 1, 1]} : vector<18x16x64xf32> to vector<16x16x64xf32>
    %c2 = arith.constant 2 : index
    %c0_41 = arith.constant 0 : index
    %c0_42 = arith.constant 0 : index
    %87 = vector.load %arg8[%c2, %c0_41, %c0_42] : memref<3x3x64xf32, #tpu.memory_space<vmem>>, vector<1x1x64xf32>
    %88 = vector.shape_cast %87 : vector<1x1x64xf32> to vector<64xf32>
    %89 = vector.shape_cast %88 : vector<64xf32> to vector<1x1x64xf32>
    %90 = vector.broadcast %89 : vector<1x1x64xf32> to vector<16x16x64xf32>
    %91 = arith.mulf %86, %90 : vector<16x16x64xf32>
    %92 = arith.addf %85, %91 : vector<16x16x64xf32>
    %c0_43 = arith.constant 0 : index
    %c8_44 = arith.constant 8 : index
    %c0_45 = arith.constant 0 : index
    %93 = vector.load %arg17[%c0_43, %c8_44, %c0_45] : memref<18x32x64xf32, #tpu.memory_space<vmem>>, vector<18x16x64xf32>
    %94 = vector.extract_strided_slice %93 {offsets = [0, 0, 0], sizes = [16, 16, 64], strides = [1, 1, 1]} : vector<18x16x64xf32> to vector<16x16x64xf32>
    %c0_46 = arith.constant 0 : index
    %c1_47 = arith.constant 1 : index
    %c0_48 = arith.constant 0 : index
    %95 = vector.load %arg8[%c0_46, %c1_47, %c0_48] : memref<3x3x64xf32, #tpu.memory_space<vmem>>, vector<1x1x64xf32>
    %96 = vector.shape_cast %95 : vector<1x1x64xf32> to vector<64xf32>
    %97 = vector.shape_cast %96 : vector<64xf32> to vector<1x1x64xf32>
    %98 = vector.broadcast %97 : vector<1x1x64xf32> to vector<16x16x64xf32>
    %99 = arith.mulf %94, %98 : vector<16x16x64xf32>
    %100 = arith.addf %92, %99 : vector<16x16x64xf32>
    %101 = vector.extract_strided_slice %93 {offsets = [1, 0, 0], sizes = [16, 16, 64], strides = [1, 1, 1]} : vector<18x16x64xf32> to vector<16x16x64xf32>
    %c1_49 = arith.constant 1 : index
    %c1_50 = arith.constant 1 : index
    %c0_51 = arith.constant 0 : index
    %102 = vector.load %arg8[%c1_49, %c1_50, %c0_51] : memref<3x3x64xf32, #tpu.memory_space<vmem>>, vector<1x1x64xf32>
    %103 = vector.shape_cast %102 : vector<1x1x64xf32> to vector<64xf32>
    %104 = vector.shape_cast %103 : vector<64xf32> to vector<1x1x64xf32>
    %105 = vector.broadcast %104 : vector<1x1x64xf32> to vector<16x16x64xf32>
    %106 = arith.mulf %101, %105 : vector<16x16x64xf32>
    %107 = arith.addf %100, %106 : vector<16x16x64xf32>
    %108 = vector.extract_strided_slice %93 {offsets = [2, 0, 0], sizes = [16, 16, 64], strides = [1, 1, 1]} : vector<18x16x64xf32> to vector<16x16x64xf32>
    %c2_52 = arith.constant 2 : index
    %c1_53 = arith.constant 1 : index
    %c0_54 = arith.constant 0 : index
    %109 = vector.load %arg8[%c2_52, %c1_53, %c0_54] : memref<3x3x64xf32, #tpu.memory_space<vmem>>, vector<1x1x64xf32>
    %110 = vector.shape_cast %109 : vector<1x1x64xf32> to vector<64xf32>
    %111 = vector.shape_cast %110 : vector<64xf32> to vector<1x1x64xf32>
    %112 = vector.broadcast %111 : vector<1x1x64xf32> to vector<16x16x64xf32>
    %113 = arith.mulf %108, %112 : vector<16x16x64xf32>
    %114 = arith.addf %107, %113 : vector<16x16x64xf32>
    %c0_55 = arith.constant 0 : index
    %c9 = arith.constant 9 : index
    %c0_56 = arith.constant 0 : index
    %115 = vector.load %arg17[%c0_55, %c9, %c0_56] : memref<18x32x64xf32, #tpu.memory_space<vmem>>, vector<18x16x64xf32>
    %116 = vector.extract_strided_slice %115 {offsets = [0, 0, 0], sizes = [16, 16, 64], strides = [1, 1, 1]} : vector<18x16x64xf32> to vector<16x16x64xf32>
    %c0_57 = arith.constant 0 : index
    %c2_58 = arith.constant 2 : index
    %c0_59 = arith.constant 0 : index
    %117 = vector.load %arg8[%c0_57, %c2_58, %c0_59] : memref<3x3x64xf32, #tpu.memory_space<vmem>>, vector<1x1x64xf32>
    %118 = vector.shape_cast %117 : vector<1x1x64xf32> to vector<64xf32>
    %119 = vector.shape_cast %118 : vector<64xf32> to vector<1x1x64xf32>
    %120 = vector.broadcast %119 : vector<1x1x64xf32> to vector<16x16x64xf32>
    %121 = arith.mulf %116, %120 : vector<16x16x64xf32>
    %122 = arith.addf %114, %121 : vector<16x16x64xf32>
    %123 = vector.extract_strided_slice %115 {offsets = [1, 0, 0], sizes = [16, 16, 64], strides = [1, 1, 1]} : vector<18x16x64xf32> to vector<16x16x64xf32>
    %c1_60 = arith.constant 1 : index
    %c2_61 = arith.constant 2 : index
    %c0_62 = arith.constant 0 : index
    %124 = vector.load %arg8[%c1_60, %c2_61, %c0_62] : memref<3x3x64xf32, #tpu.memory_space<vmem>>, vector<1x1x64xf32>
    %125 = vector.shape_cast %124 : vector<1x1x64xf32> to vector<64xf32>
    %126 = vector.shape_cast %125 : vector<64xf32> to vector<1x1x64xf32>
    %127 = vector.broadcast %126 : vector<1x1x64xf32> to vector<16x16x64xf32>
    %128 = arith.mulf %123, %127 : vector<16x16x64xf32>
    %129 = arith.addf %122, %128 : vector<16x16x64xf32>
    %130 = vector.extract_strided_slice %115 {offsets = [2, 0, 0], sizes = [16, 16, 64], strides = [1, 1, 1]} : vector<18x16x64xf32> to vector<16x16x64xf32>
    %c2_63 = arith.constant 2 : index
    %c2_64 = arith.constant 2 : index
    %c0_65 = arith.constant 0 : index
    %131 = vector.load %arg8[%c2_63, %c2_64, %c0_65] : memref<3x3x64xf32, #tpu.memory_space<vmem>>, vector<1x1x64xf32>
    %132 = vector.shape_cast %131 : vector<1x1x64xf32> to vector<64xf32>
    %133 = vector.shape_cast %132 : vector<64xf32> to vector<1x1x64xf32>
    %134 = vector.broadcast %133 : vector<1x1x64xf32> to vector<16x16x64xf32>
    %135 = arith.mulf %130, %134 : vector<16x16x64xf32>
    %136 = arith.addf %129, %135 : vector<16x16x64xf32>
    %c0_66 = arith.constant 0 : index
    %c0_67 = arith.constant 0 : index
    %137 = vector.load %arg9[%c0_66, %c0_67] : memref<1x64xf32, #tpu.memory_space<vmem>>, vector<1x64xf32>
    %138 = vector.shape_cast %137 : vector<1x64xf32> to vector<64xf32>
    %139 = vector.shape_cast %138 : vector<64xf32> to vector<1x1x64xf32>
    %140 = vector.broadcast %139 : vector<1x1x64xf32> to vector<16x16x64xf32>
    %141 = arith.addf %136, %140 : vector<16x16x64xf32>
    %cst_68 = arith.constant 5.000000e-01 : f32
    %142 = vector.broadcast %cst_68 : f32 to vector<16x16x64xf32>
    %143 = arith.mulf %142, %141 : vector<16x16x64xf32>
    %cst_69 = arith.constant 4.471500e-02 : f32
    %144 = vector.broadcast %cst_69 : f32 to vector<16x16x64xf32>
    %145 = arith.mulf %144, %141 : vector<16x16x64xf32>
    %146 = arith.mulf %145, %141 : vector<16x16x64xf32>
    %147 = arith.mulf %146, %141 : vector<16x16x64xf32>
    %148 = arith.addf %141, %147 : vector<16x16x64xf32>
    %cst_70 = arith.constant 0.797884583 : f32
    %149 = vector.broadcast %cst_70 : f32 to vector<16x16x64xf32>
    %150 = arith.mulf %149, %148 : vector<16x16x64xf32>
    %151 = math.tanh %150 : vector<16x16x64xf32>
    %cst_71 = arith.constant 1.000000e+00 : f32
    %152 = vector.broadcast %cst_71 : f32 to vector<16x16x64xf32>
    %153 = arith.addf %152, %151 : vector<16x16x64xf32>
    %154 = arith.mulf %143, %153 : vector<16x16x64xf32>
    %155 = vector.shape_cast %154 : vector<16x16x64xf32> to vector<256x64xf32>
    %c0_72 = arith.constant 0 : index
    %c0_73 = arith.constant 0 : index
    %156 = vector.load %arg10[%c0_72, %c0_73] : memref<64x64xf32, #tpu.memory_space<vmem>>, vector<64x64xf32>
    %cst_74 = arith.constant dense<0.000000e+00> : vector<256x64xf32>
    %157 = tpu.matmul %155, %156, %cst_74 {dimension_numbers = #tpu.dot_dimension_numbers<[1], [0], [0], [1], [0, 0, 1, 1], [], []>} : vector<256x64xf32>, vector<64x64xf32>, vector<256x64xf32> -> vector<256x64xf32>
    %158 = arith.addf %155, %157 : vector<256x64xf32>
    %c0_75 = arith.constant 0 : index
    %c0_76 = arith.constant 0 : index
    %159 = vector.load %arg11[%c0_75, %c0_76] : memref<1x64xf32, #tpu.memory_space<vmem>>, vector<1x64xf32>
    %160 = vector.shape_cast %159 : vector<1x64xf32> to vector<64xf32>
    %161 = vector.shape_cast %160 : vector<64xf32> to vector<1x64xf32>
    %162 = vector.broadcast %161 : vector<1x64xf32> to vector<256x64xf32>
    %163 = arith.addf %158, %162 : vector<256x64xf32>
    %cst_77 = arith.constant 5.000000e-01 : f32
    %164 = vector.broadcast %cst_77 : f32 to vector<256x64xf32>
    %165 = arith.mulf %164, %163 : vector<256x64xf32>
    %cst_78 = arith.constant 4.471500e-02 : f32
    %166 = vector.broadcast %cst_78 : f32 to vector<256x64xf32>
    %167 = arith.mulf %166, %163 : vector<256x64xf32>
    %168 = arith.mulf %167, %163 : vector<256x64xf32>
    %169 = arith.mulf %168, %163 : vector<256x64xf32>
    %170 = arith.addf %163, %169 : vector<256x64xf32>
    %cst_79 = arith.constant 0.797884583 : f32
    %171 = vector.broadcast %cst_79 : f32 to vector<256x64xf32>
    %172 = arith.mulf %171, %170 : vector<256x64xf32>
    %173 = math.tanh %172 : vector<256x64xf32>
    %cst_80 = arith.constant 1.000000e+00 : f32
    %174 = vector.broadcast %cst_80 : f32 to vector<256x64xf32>
    %175 = arith.addf %174, %173 : vector<256x64xf32>
    %176 = arith.mulf %165, %175 : vector<256x64xf32>
    %c0_81 = arith.constant 0 : index
    %c0_82 = arith.constant 0 : index
    %177 = vector.load %arg12[%c0_81, %c0_82] : memref<64x128xf32, #tpu.memory_space<vmem>>, vector<64x128xf32>
    %cst_83 = arith.constant dense<0.000000e+00> : vector<256x128xf32>
    %178 = tpu.matmul %176, %177, %cst_83 {dimension_numbers = #tpu.dot_dimension_numbers<[1], [0], [0], [1], [0, 0, 1, 1], [], []>} : vector<256x64xf32>, vector<64x128xf32>, vector<256x128xf32> -> vector<256x128xf32>
    %c0_84 = arith.constant 0 : index
    %c0_85 = arith.constant 0 : index
    %179 = vector.load %arg13[%c0_84, %c0_85] : memref<1x128xf32, #tpu.memory_space<vmem>>, vector<1x128xf32>
    %180 = vector.shape_cast %179 : vector<1x128xf32> to vector<128xf32>
    %181 = vector.shape_cast %180 : vector<128xf32> to vector<1x128xf32>
    %182 = vector.broadcast %181 : vector<1x128xf32> to vector<256x128xf32>
    %183 = arith.addf %178, %182 : vector<256x128xf32>
    %cst_86 = arith.constant 5.000000e-01 : f32
    %184 = vector.broadcast %cst_86 : f32 to vector<256x128xf32>
    %185 = arith.mulf %184, %183 : vector<256x128xf32>
    %cst_87 = arith.constant 4.471500e-02 : f32
    %186 = vector.broadcast %cst_87 : f32 to vector<256x128xf32>
    %187 = arith.mulf %186, %183 : vector<256x128xf32>
    %188 = arith.mulf %187, %183 : vector<256x128xf32>
    %189 = arith.mulf %188, %183 : vector<256x128xf32>
    %190 = arith.addf %183, %189 : vector<256x128xf32>
    %cst_88 = arith.constant 0.797884583 : f32
    %191 = vector.broadcast %cst_88 : f32 to vector<256x128xf32>
    %192 = arith.mulf %191, %190 : vector<256x128xf32>
    %193 = math.tanh %192 : vector<256x128xf32>
    %cst_89 = arith.constant 1.000000e+00 : f32
    %194 = vector.broadcast %cst_89 : f32 to vector<256x128xf32>
    %195 = arith.addf %194, %193 : vector<256x128xf32>
    %196 = arith.mulf %185, %195 : vector<256x128xf32>
    %c0_90 = arith.constant 0 : index
    %c0_91 = arith.constant 0 : index
    %197 = vector.load %arg14[%c0_90, %c0_91] : memref<128x128xf32, #tpu.memory_space<vmem>>, vector<128x128xf32>
    %cst_92 = arith.constant dense<0.000000e+00> : vector<256x128xf32>
    %198 = tpu.matmul %196, %197, %cst_92 {dimension_numbers = #tpu.dot_dimension_numbers<[1], [0], [0], [1], [0, 0, 1, 1], [], []>} : vector<256x128xf32>, vector<128x128xf32>, vector<256x128xf32> -> vector<256x128xf32>
    %c0_93 = arith.constant 0 : index
    %c0_94 = arith.constant 0 : index
    %199 = vector.load %arg15[%c0_93, %c0_94] : memref<1x128xf32, #tpu.memory_space<vmem>>, vector<1x128xf32>
    %200 = vector.shape_cast %199 : vector<1x128xf32> to vector<128xf32>
    %201 = vector.shape_cast %200 : vector<128xf32> to vector<1x128xf32>
    %202 = vector.broadcast %201 : vector<1x128xf32> to vector<256x128xf32>
    %203 = arith.addf %198, %202 : vector<256x128xf32>
    %c0_95 = arith.constant 0 : index
    %c0_96 = arith.constant 0 : index
    %c0_97 = arith.constant 0 : index
    %204 = vector.load %arg16[%c0_95, %c0_96, %c0_97] : memref<1x256x128xf32, #tpu.memory_space<vmem>>, vector<1x256x128xf32>
    %205 = vector.shape_cast %204 : vector<1x256x128xf32> to vector<256x128xf32>
    %206 = vector.shape_cast %203 : vector<256x128xf32> to vector<1x256x128xf32>
    tpu.vector_store %arg16[%c0_95, %c0_96, %c0_97], %206 {strides = array<i32>} : memref<1x256x128xf32, #tpu.memory_space<vmem>>, vector<1x256x128xf32>,
    return
  }
  func.func @transform_0(%arg0: i32) -> (i32, i32, i32) {
    %c0_i32 = arith.constant 0 : i32
    %c0_i32_0 = arith.constant 0 : i32
    %c0_i32_1 = arith.constant 0 : i32
    return %arg0, %c0_i32, %c0_i32_0 : i32, i32, i32
  }
  func.func @transform_1(%arg0: i32) -> (i32, i32) {
    %c0_i32 = arith.constant 0 : i32
    %c0_i32_0 = arith.constant 0 : i32
    %c0_i32_1 = arith.constant 0 : i32
    return %c0_i32, %c0_i32_0 : i32, i32
  }
  func.func @transform_2(%arg0: i32) -> (i32, i32) {
    %c0_i32 = arith.constant 0 : i32
    %c0_i32_0 = arith.constant 0 : i32
    %c0_i32_1 = arith.constant 0 : i32
    return %c0_i32, %c0_i32_0 : i32, i32
  }
  func.func @transform_3(%arg0: i32) -> (i32, i32) {
    %c0_i32 = arith.constant 0 : i32
    %c0_i32_0 = arith.constant 0 : i32
    %c0_i32_1 = arith.constant 0 : i32
    return %c0_i32, %c0_i32_0 : i32, i32
  }
  func.func @transform_4(%arg0: i32) -> (i32, i32) {
    %c0_i32 = arith.constant 0 : i32
    %c0_i32_0 = arith.constant 0 : i32
    %c0_i32_1 = arith.constant 0 : i32
    return %c0_i32, %c0_i32_0 : i32, i32
  }
  func.func @transform_5(%arg0: i32) -> (i32, i32) {
    %c0_i32 = arith.constant 0 : i32
    %c0_i32_0 = arith.constant 0 : i32
    %c0_i32_1 = arith.constant 0 : i32
    return %c0_i32, %c0_i32_0 : i32, i32
  }
  func.func @transform_6(%arg0: i32) -> (i32, i32) {
    %c0_i32 = arith.constant 0 : i32
    %c0_i32_0 = arith.constant 0 : i32
    %c0_i32_1 = arith.constant 0 : i32
    return %c0_i32, %c0_i32_0 : i32, i32
  }
  func.func @transform_7(%arg0: i32) -> (i32, i32, i32) {
    %c0_i32 = arith.constant 0 : i32
    %c0_i32_0 = arith.constant 0 : i32
    %c0_i32_1 = arith.constant 0 : i32
    %c0_i32_2 = arith.constant 0 : i32
    return %c0_i32, %c0_i32_0, %c0_i32_1 : i32, i32, i32
  }
  func.func @transform_8(%arg0: i32) -> (i32, i32) {
    %c0_i32 = arith.constant 0 : i32
    %c0_i32_0 = arith.constant 0 : i32
    %c0_i32_1 = arith.constant 0 : i32
    return %c0_i32, %c0_i32_0 : i32, i32
  }
  func.func @transform_9(%arg0: i32) -> (i32, i32) {
    %c0_i32 = arith.constant 0 : i32
    %c0_i32_0 = arith.constant 0 : i32
    %c0_i32_1 = arith.constant 0 : i32
    return %c0_i32, %c0_i32_0 : i32, i32
  }
  func.func @transform_10(%arg0: i32) -> (i32, i32) {
    %c0_i32 = arith.constant 0 : i32
    %c0_i32_0 = arith.constant 0 : i32
    %c0_i32_1 = arith.constant 0 : i32
    return %c0_i32, %c0_i32_0 : i32, i32
  }
  func.func @transform_11(%arg0: i32) -> (i32, i32) {
    %c0_i32 = arith.constant 0 : i32
    %c0_i32_0 = arith.constant 0 : i32
    %c0_i32_1 = arith.constant 0 : i32
    return %c0_i32, %c0_i32_0 : i32, i32
  }
  func.func @transform_12(%arg0: i32) -> (i32, i32) {
    %c0_i32 = arith.constant 0 : i32
    %c0_i32_0 = arith.constant 0 : i32
    %c0_i32_1 = arith.constant 0 : i32
    return %c0_i32, %c0_i32_0 : i32, i32
  }
  func.func @transform_13(%arg0: i32) -> (i32, i32) {
    %c0_i32 = arith.constant 0 : i32
    %c0_i32_0 = arith.constant 0 : i32
    %c0_i32_1 = arith.constant 0 : i32
    return %c0_i32, %c0_i32_0 : i32, i32
  }
  func.func @transform_14(%arg0: i32) -> (i32, i32) {
    %c0_i32 = arith.constant 0 : i32
    %c0_i32_0 = arith.constant 0 : i32
    %c0_i32_1 = arith.constant 0 : i32
    return %c0_i32, %c0_i32_0 : i32, i32
  }
  func.func @transform_15(%arg0: i32) -> (i32, i32, i32) {
    %c0_i32 = arith.constant 0 : i32
    %c0_i32_0 = arith.constant 0 : i32
    %c0_i32_1 = arith.constant 0 : i32
    return %arg0, %c0_i32, %c0_i32_0 : i32, i32, i32
  }
}

</mosaic_0001>

<bundles_post_ra>
// kernel: pcblock_forward.1
= control target key start
LH: loop header
LB: loop body
LE: loop exit
PB: predicated region body
PF: predicated region fallthrough
CT: control target
= control target key end

     0   :  { %s9578_s0 = inlined_call_operand.hbm [shape: f32[2,256,64], index: 0, kind: input, shape index: {}]   ;;  %s9579_s1 = inlined_call_operand.vmem [shape: f32[64,128], index: 1, kind: input, shape index: {}]   ;;  %s9580_s2 = inlined_call_operand.vmem [shape: f32[1,128], index: 2, kind: input, shape index: {}]   ;;  %s9581_s3 = inlined_call_operand.vmem [shape: f32[128,64], index: 3, kind: input, shape index: {}]   ;;  %s9582_s4 = inlined_call_operand.vmem [shape: f32[1,64], index: 4, kind: input, shape index: {}]   ;;  %s9583_s5 = inlined_call_operand.vmem [shape: f32[1,64], index: 5, kind: input, shape index: {}]   ;;  %s9584_s6 = inlined_call_operand.vmem [shape: f32[1,64], index: 6, kind: input, shape index: {}]   ;;  %s9585_s7 = inlined_call_operand.vmem [shape: f32[3,3,64], index: 7, kind: input, shape index: {}]   ;;  %s9586_s8 = inlined_call_operand.vmem [shape: f32[1,64], index: 8, kind: input, shape index: {}]   ;;  %s9587_s9 = inlined_call_operand.hbm [shape: f32[64,64], index: 9, kind: input, shape index: {}]   ;;  %s9588_s10 = inlined_call_operand.vmem [shape: f32[1,64], index: 10, kind: input, shape index: {}]   ;;  %s9589_s11 = inlined_call_operand.hbm [shape: f32[64,128], index: 11, kind: input, shape index: {}]   ;;  %s9590_s12 = inlined_call_operand.vmem [shape: f32[1,128], index: 12, kind: input, shape index: {}]   ;;  %s9591_s13 = inlined_call_operand.vmem [shape: f32[128,128], index: 13, kind: input, shape index: {}]   ;;  %s9592_s14 = inlined_call_operand.vmem [shape: f32[1,128], index: 14, kind: input, shape index: {}]   ;;  %s9593_s15 = inlined_call_operand.hbm [shape: f32[2,256,128], index: 15, kind: output, shape index: {}]  }
   0x1   :  { %9611 = sst [smem:[#allocation21_spill]] %s9588_s10 }
   0x2   :  { %9612 = sst [smem:[#allocation22_spill]] %s9590_s12 }
   0x3   :  { %9613 = sst [smem:[#allocation23_spill]] %s9591_s13 }
   0x4   :  { %9614 = sst [smem:[#allocation24_spill]] %s9592_s14 }
   0x5   :  { %9615 = sst [smem:[#allocation25_spill]] %s9593_s15 }
   0x6   :  { %20 = vsyncpa [#allocation4], 0 }
   0x7   :  { %22 = vsyncpa [#allocation4 + $0x1], 0 }
   0x8   :  { %23 = vsyncpa [#allocation7], 0 }
   0x9   :  { %24 = vsyncpa [#allocation5], 0 }
   0xa   :  { %26 = vsyncpa [#allocation5 + $0x1], 0  ;;  %s6611_s18 = smov 0   ;;  %s6613_s19 = smov 0  }
   0xb   :  { %s6615_s20 = smov 0   ;;  %s6617_s21 = smov 0  }
   0xc LB: > { %9616 = sst [smem:[#allocation13_spill]] %s6508_s18  ;;  %s6632_s22 = sadd.s32 4294967295, %s6520_s21   ;;  %s6520_s21 = sphi %s6617_s21, %s9661_s21   ;;  %s6516_s20 = sphi %s6615_s20, %s9660_s20   ;;  %s6512_s19 = sphi %s6613_s19, %s9659_s19   ;;  %s6508_s18 = sphi %s6611_s18, %s9658_s18  }
   0xd   : > { %s5026_s23 = sadd.s32 4294967294, %s6520_s21   ;;  %p52_p0 = scmp.ne.s32.totalorder %s6512_s19, %s6508_s18 }
   0xe   : > { %p9597_p1 = scmp.eq.s32.totalorder %s6632_s22, 0  ;;  %p376_p3 = scmp.eq.s32.totalorder %s5026_s23, 1 }
   0xf   : > { %p5027_p5 = scmp.ge.s32.totalorder %s6520_s21, 1  ;;  %p383_p7 = scmp.lt.s32.totalorder %s6520_s21, 3 }
  0x10   : > { %p6641_p4 = por %p9597_p1, %p52_p0  ;;  %p6646_p6 = por %p376_p3, %p52_p0 }
  0x11   : > { %p6651_p8 = pnand %p5027_p5, %p383_p7  ;;  %s6522_s27 = smov [#allocation6]  }
  0x12   : > { %s9617_s24 = scalar_select %p6641_p4, 1, 0 }
  0x13   : > { %s9618_s25 = scalar_select %p6646_p6, 1, 0 }
  0x14   : > { %s419_s28 = sshll.u32 %s6522_s27, 4  ;;  %p5865_p9 = pneg %p6651_p8  ;;  %s6655_s28 = int_to_ptr.vmem [resolvable:$true] %s419_s28 }
  0x15   : > { %9619 = sst [smem:[#allocation14_spill]] %s9618_s25  ;;  %s6523_s30 = smov [#allocation8]  }
  0x16   : > { %p6662_p11 = pnand %p5865_p9, %p9597_p1  ;;  %s435_s16 = sshll.u32 %s6523_s30, 4  ;;  %s6666_s16 = int_to_ptr.vmem [resolvable:$true] %s435_s16 }
  0x17   : > { %s6364_s27 = scalar_lea.hbm %s9587_s9, 1024 }
  0x18   : > { %p6365_p12 = scmp.ne.s32.totalorder %s9587_s9, %s6364_s27  ;;  %p6366_p13 = pneg %p6662_p11 }
  0x19   : > { %p6371_p5 = scmp.lt.u32.totalorder %s6364_s27, %s9587_s9 }
  0x1a   : > { %p6367_p0 = pnand %p6366_p13, %p6365_p12 }
  0x1c   : > { %p6368_p3 = pneg %p6367_p0 }
  0x1e   : > { %p6373_p7 = pnand %p6371_p5, %p6368_p3 }
  0x20   : > { %6376 = shalt.err (!%p6373_p7)
}
  0x21   : > { %s6377_s30 = scalar_lea.vmem %s6655_s28, 1024  ;;  %p6385_p2 = scmp.lt.s32.totalorder %s6655_s28, %s6655_s28 }
  0x22   : > { %p6378_p9 = scmp.ne.s32.totalorder %s6655_s28, %s6377_s30  ;;  %p6386_p12 = scmp.lt.s32.totalorder %s6377_s30, %s6377_s30 }
  0x24   : > { %p6380_p10 = pnand %p6378_p9, %p6366_p13  ;;  %p6387_p0 = por %p6386_p12, %p6385_p2 }
  0x26   : > { %p6381_p1 = pneg %p6380_p10 }
  0x28   : > { %p6388_p6 = pnand %p6387_p0, %p6381_p1 }
  0x2a   : > { %6391 = shalt.err (!%p6388_p6)
}
  0x2b   : > { %s9599_s14 = smov 128   ;;  %s9600_s15 = smov 8  }
  0x2c   : > { %5868 = dma.hbm_to_vmem [thread:$0]  (!%p6662_p11), %s9587_s9, 1024, %s6655_s28, [#allocation7], %s9599_s14, %s9599_s14, %s9600_s15  }
  0x2d   : > { %s6392_s27 = scalar_lea.hbm %s9589_s11, 1024 }
  0x2e   : > { %p6393_p1 = scmp.ne.s32.totalorder %s9589_s11, %s6392_s27  ;;  %p6399_p10 = scmp.lt.u32.totalorder %s6392_s27, %s9589_s11 }
  0x30   : > { %p6395_p2 = pnand %p6393_p1, %p6366_p13 }
  0x32   : > { %p6396_p6 = pneg %p6395_p2 }
  0x34   : > { %p6401_p3 = pnand %p6399_p10, %p6396_p6 }
  0x36   : > { %6404 = shalt.err (!%p6401_p3)
}
  0x37   : > { %s6405_s28 = scalar_lea.vmem %s6666_s16, 1024  ;;  %p6413_p12 = scmp.lt.s32.totalorder %s6666_s16, %s6666_s16 }
  0x38   : > { %p6406_p5 = scmp.ne.s32.totalorder %s6666_s16, %s6405_s28  ;;  %p6414_p0 = scmp.lt.s32.totalorder %s6405_s28, %s6405_s28 }
  0x3a   : > { %p6408_p7 = pnand %p6406_p5, %p6366_p13  ;;  %p6415_p1 = por %p6414_p0, %p6413_p12 }
  0x3c   : > { %p6409_p9 = pneg %p6408_p7 }
  0x3e   : > { %p6416_p2 = pnand %p6415_p1, %p6409_p9 }
  0x40   : > { %6419 = shalt.err (!%p6416_p2)
}
  0x41   : > { %5871 = dma.hbm_to_vmem [thread:$0]  (!%p6662_p11), %s9589_s11, 1024, %s6666_s16, [#allocation7], %s9599_s14, %s9599_s14, %s9600_s15  }
  0x42   : > { %s6727_s13 = sadd.s32 1, %s6520_s21   ;;  %s39_s29 = sadd.s32 1, %s6516_s20 }
  0x43   : > { %s36_s18 = ssub.s32 %s6520_s21, %s6727_s13  ;;  %p46_p13 = scmp.ne.s32.totalorder %s6516_s20, %s6512_s19 }
  0x44   : > { %p37_p6 = scmp.eq.s32.totalorder %s36_s18, 0  ;;  %p47_p10 = scmp.eq.s32.totalorder %s6520_s21, 0 }
  0x45   : > { %p9622_p3 = scmp.eq.s32.totalorder %s6632_s22, 1  ;;  %p5882_p7 = scmp.lt.s32.totalorder %s6520_s21, 2 }
  0x46   : > { %s6743_s17 = scalar_select %p37_p6, %s6516_s20, %s39_s29  }
  0x47   : > { %p6737_p5 = por %p9622_p3, %p46_p13  ;;  %p48_p9 = por %p47_p10, %p46_p13 }
  0x48   : > { %s458_s23 = sand.u32 1, %s6516_s20   ;;  %s5163_s16 = sshll.u32 %s6520_s21, 12 }
  0x49   : > { %s9623_s25 = scalar_select %p6737_p5, 1, 0 }
  0x4a   : > { %s5031_s27 = sshll.u32 %s458_s23, 8  ;;  %s6750_s10 = scalar_lea.hbm %s9578_s0, %s5163_s16 }
  0x4b   : > { %s462_s12 = scalar_lea.vmem [#allocation3], %s5031_s27  ;;  %p6754_p11 = pnand %p5882_p7, %p48_p9 }
  0x4c   : > { %s469_s18 = sshll.u32 %s462_s12, 4  ;;  %s6758_s14 = scalar_lea.sflag [#allocation4], %s458_s23  ;;  %s6752_s18 = int_to_ptr.vmem [resolvable:$true] %s469_s18 }
  0x4d   : > { %s6420_s15 = scalar_lea.hbm %s6750_s10, 4096  ;;  %p6422_p0 = pneg %p6754_p11 }
  0x4e   : > { %p6421_p12 = scmp.ne.s32.totalorder %s6750_s10, %s6420_s15  ;;  %s6425_s30 = scalar_lea.hbm %s9578_s0, 8192 }
  0x4f   : > { %p6426_p13 = scmp.lt.u32.totalorder %s6750_s10, %s9578_s0  ;;  %p6427_p6 = scmp.lt.u32.totalorder %s6425_s30, %s6420_s15 }
  0x50   : > { %p6423_p1 = pnand %p6422_p0, %p6421_p12  ;;  %p6429_p3 = scmp.lt.u32.totalorder %s6420_s15, %s6750_s10 }
  0x51   : > { %p6428_p10 = por %p6427_p6, %p6426_p13 }
  0x52   : > { %p6424_p2 = pneg %p6423_p1 }
  0x53   : > { %p6430_p7 = por %p6429_p3, %p6428_p10 }
  0x55   : > { %p6431_p9 = pnand %p6430_p7, %p6424_p2 }
  0x57   : > { %6434 = shalt.err (!%p6431_p9)
}
  0x58   : > { %s6435_s23 = scalar_lea.vmem %s6752_s18, 4096  ;;  %s6526_s27 = smov [#allocation3]  }
  0x59   : > { %p6436_p12 = scmp.ne.s32.totalorder %s6752_s18, %s6435_s23  ;;  %s6440_s16 = sshll.u32 %s6526_s27, 4  ;;  %s6441_s16 = int_to_ptr.vmem [resolvable:$false] %s6440_s16 }
  0x5a   : > { %s6442_s28 = scalar_lea.vmem %s6441_s16, 8192  ;;  %p6443_p4 = scmp.lt.s32.totalorder %s6752_s18, %s6441_s16 }
  0x5b   : > { %p6438_p1 = pnand %p6436_p12, %p6422_p0  ;;  %p6444_p13 = scmp.lt.s32.totalorder %s6442_s28, %s6435_s23 }
  0x5d   : > { %p6439_p5 = pneg %p6438_p1  ;;  %p6445_p6 = por %p6444_p13, %p6443_p4 }
  0x5f   : > { %p6446_p10 = pnand %p6445_p6, %p6439_p5 }
  0x61   : > { %6449 = shalt.err (!%p6446_p10)
}
  0x62   : > { %s9625_s15 = smov 8   ;;  %s9626_s30 = smov 128  }
  0x63   : > { %5875 = dma.hbm_to_vmem [thread:$0]  (!%p6754_p11), %s6750_s10, 4096, %s6752_s18, %s6758_s14, %s9626_s30, %s9626_s30, %s9625_s15  }
  0x64   : > { %481 = sbr.rel (%p6651_p8) target bundleno = 1734 (0x6c6), region = 80 }
  0x6b   : > { %s6792_s12 = sand.u32 1, %s6512_s19   ;;  %p9627_p4 = scmp.ne.s32.totalorder %s9617_s24, 0 }
  0x6c   : > { %s5035_s23 = sshll.u32 %s6792_s12, 8  ;;  %s484_s27 = scalar_lea.sflag [#allocation4], %s6792_s12 }
  0x6d   : > { %s6798_s29 = scalar_lea.vmem [#allocation3], %s5035_s23 }
  0x6e   : > { %6495 = dma.done.wait (%p9627_p4), %s484_s27, 4096  }
  0x6f   : > { %6497 = vsyncadd (%p9627_p4), %s484_s27, 4294963200  ;;  %p9628_p5 = scmp.eq.s32.totalorder %s6632_s22, 0 }
  0x71   : > { %6499 = dma.done.wait (%p9628_p5), [#allocation7], 2048   ;;  %p9629_p8 = pmov %p9628_p5 }
  0x72   : > { %v574_v0 = vld [vmem:[%s9579_s1] sm:$0xff]  ;;  %v575_v1 = vld [vmem:[%s9579_s1 + $0x8] sm:$0xff]  ;;  %v576_v2 = vld [vmem:[%s9579_s1 + $0x10] sm:$0xff]  ;;  %vm589_vm0 = vcmask 523264   ;;  %s9642_s30 = sld [smem:[#allocation21_spill]]  ;;  %s9645_s14 = sld [smem:[#allocation23_spill]] }
  0x73   : > { %6501 = vsyncadd (%p9629_p8), [#allocation7], 4294965248  ;;  %v5733_v3 = vpack.c.bf16 %v575_v1, %v574_v0  ;;  %v577_v4 = vld [vmem:[%s9579_s1 + $0x18] sm:$0xff]  ;;  %v578_v6 = vld [vmem:[%s9579_s1 + $0x20] sm:$0xff]  ;;  %s9650_s18 = sld [smem:[#allocation22_spill]]  ;;  %s9651_s24 = sld [smem:[#allocation24_spill]] }
  0x74   : > { %v5737_v5 = vpack.c.bf16 %v577_v4, %v576_v2  ;;  %v579_v7 = vld [vmem:[%s9579_s1 + $0x28] sm:$0xff]  ;;  %v542_v8 = vld [vmem:[%s6798_s29] sm:$0xff]  ;;  %v580_v11 = vld [vmem:[%s9579_s1 + $0x30] sm:$0xff]  ;;  %s9463_s15 = scalar_lea.vmem [#allocation9], %s5035_s23  ;;  %s5164_s23 = sshll.u32 %s6632_s22, 12 }
  0x75   : > { %5734 = vmatprep.subr.bf16.mxu0 %v5733_v3  ;;  %5845 = vmatprep.subr.bf16.mxu1 %v5733_v3  ;;  %v558_v9 = vld [vmem:[%s6798_s29 + $0x80] sm:$0xff]  ;;  %v5741_v10 = vpack.c.bf16 %v579_v7, %v578_v6  ;;  %v581_v12 = vld [vmem:[%s9579_s1 + $0x38] sm:$0xff]  ;;  %v1200_v15 = vld [vmem:[%s9581_s3 + $0x8] sm:$0xff]  ;;  %s4921_s22 = scalar_lea.sflag [#allocation5], %s6792_s12  ;;  %p9653_p0 = scmp.ne.s32.totalorder %s9623_s25, 0 }
  0x76   : > { %5736 = vmatpush3.bf16.msra.mxu0 %v5733_v3  ;;  %5849 = vmatpush3.bf16.msra.mxu1 %v5733_v3  ;;  %v5745_v13 = vpack.c.bf16 %v581_v12, %v580_v11  ;;  %v1199_v14 = vld [vmem:[%s9581_s3] sm:$0xff]  ;;  %v543_v17 = vld [vmem:[%s6798_s29 + $0x8] sm:$0xff]  ;;  %v544_v19 = vld [vmem:[%s6798_s29 + $0x10] sm:$0xff]  ;;  %s6528_s16 = smov [#allocation9]  }
  0x77   : > { %5738 = vmatprep.subr.bf16.mxu0 %v5737_v5  ;;  %5846 = vmatprep.subr.bf16.mxu1 %v5737_v5  ;;  %v5749_v16 = vpack.c.bf16 %v1200_v15, %v1199_v14  ;;  %v559_v18 = vld [vmem:[%s6798_s29 + $0x88] sm:$0xff]  ;;  %v560_v20 = vld [vmem:[%s6798_s29 + $0x90] sm:$0xff]  ;;  %v545_v21 = vld [vmem:[%s6798_s29 + $0x18] sm:$0xff]  ;;  %s6454_s28 = sshll.u32 %s6528_s16, 4  ;;  %s6455_s28 = int_to_ptr.vmem [resolvable:$false] %s6454_s28 }
  0x78   : > { %5397 = vmatprep.mubr.msk.f32.mxu0 %vm589_vm0, %v542_v8  ;;  %5421 = vmatprep.mubr.msk.f32.mxu1 %vm589_vm0, %v558_v9  ;;  %v561_v22 = vld [vmem:[%s6798_s29 + $0x98] sm:$0xff]  ;;  %v546_v23 = vld [vmem:[%s6798_s29 + $0x20] sm:$0xff]  ;;  %v547_v25 = vld [vmem:[%s6798_s29 + $0x28] sm:$0xff] }
  0x79   : > { %v562_v24 = vld [vmem:[%s6798_s29 + $0xa0] sm:$0xff]  ;;  %v563_v26 = vld [vmem:[%s6798_s29 + $0xa8] sm:$0xff]  ;;  %v548_v27 = vld [vmem:[%s6798_s29 + $0x30] sm:$0xff] }
  0x7a   : > { %5740 = vmatpush3.bf16.msra.mxu0 %v5737_v5  ;;  %5850 = vmatpush3.bf16.msra.mxu1 %v5737_v5  ;;  %v564_v28 = vld [vmem:[%s6798_s29 + $0xb0] sm:$0xff]  ;;  %v549_v29 = vld [vmem:[%s6798_s29 + $0x38] sm:$0xff]  ;;  %v550_v31 = vld [vmem:[%s6798_s29 + $0x40] sm:$0xff] }
  0x7b   : > { %5742 = vmatprep.subr.bf16.mxu0 %v5741_v10  ;;  %5847 = vmatprep.subr.bf16.mxu1 %v5741_v10  ;;  %v565_v30 = vld [vmem:[%s6798_s29 + $0xb8] sm:$0xff]  ;;  %v566_v32 = vld [vmem:[%s6798_s29 + $0xc0] sm:$0xff]  ;;  %v551_v33 = vld [vmem:[%s6798_s29 + $0x48] sm:$0xff] }
  0x7c   : > { %v567_v34 = vld [vmem:[%s6798_s29 + $0xc8] sm:$0xff]  ;;  %v552_v35 = vld [vmem:[%s6798_s29 + $0x50] sm:$0xff]  ;;  %v553_v37 = vld [vmem:[%s6798_s29 + $0x58] sm:$0xff] }
  0x7d   : > { %v568_v36 = vld [vmem:[%s6798_s29 + $0xd0] sm:$0xff]  ;;  %v569_v38 = vld [vmem:[%s6798_s29 + $0xd8] sm:$0xff]  ;;  %v554_v39 = vld [vmem:[%s6798_s29 + $0x60] sm:$0xff] }
  0x7e   : > { %5744 = vmatpush3.bf16.msra.mxu0 %v5741_v10  ;;  %5851 = vmatpush3.bf16.msra.mxu1 %v5741_v10  ;;  %v570_v40 = vld [vmem:[%s6798_s29 + $0xe0] sm:$0xff]  ;;  %v555_v41 = vld [vmem:[%s6798_s29 + $0x68] sm:$0xff]  ;;  %v556_v43 = vld [vmem:[%s6798_s29 + $0x70] sm:$0xff] }
  0x7f   : > { %5746 = vmatprep.subr.bf16.mxu0 %v5745_v13  ;;  %5848 = vmatprep.subr.bf16.mxu1 %v5745_v13  ;;  %v571_v42 = vld [vmem:[%s6798_s29 + $0xe8] sm:$0xff]  ;;  %v572_v44 = vld [vmem:[%s6798_s29 + $0xf0] sm:$0xff]  ;;  %v557_v45 = vld [vmem:[%s6798_s29 + $0x78] sm:$0xff] }
  0x80   : > { %v573_v46 = vld [vmem:[%s6798_s29 + $0xf8] sm:$0xff]  ;;  %v1201_v47 = vld [vmem:[%s9581_s3 + $0x10] sm:$0xff]  ;;  %v1203_v50 = vld [vmem:[%s9581_s3 + $0x20] sm:$0xff] }
  0x81   : > { %v1202_v48 = vld [vmem:[%s9581_s3 + $0x18] sm:$0xff]  ;;  %v1204_v51 = vld [vmem:[%s9581_s3 + $0x28] sm:$0xff]  ;;  %v1205_v53 = vld [vmem:[%s9581_s3 + $0x30] sm:$0xff] }
  0x82   : > { %5748 = vmatpush3.bf16.msra.mxu0 %v5745_v13  ;;  %5852 = vmatpush3.bf16.msra.mxu1 %v5745_v13  ;;  %v5753_v49 = vpack.c.bf16 %v1202_v48, %v1201_v47  ;;  %v5757_v52 = vpack.c.bf16 %v1204_v51, %v1203_v50  ;;  %v1206_v54 = vld [vmem:[%s9581_s3 + $0x38] sm:$0xff]  ;;  %v1207_v56 = vld [vmem:[%s9581_s3 + $0x40] sm:$0xff]  ;;  %v1208_v57 = vld [vmem:[%s9581_s3 + $0x48] sm:$0xff] }
  0x83   : > { %5750 = vmatprep.subr.bf16.mxu1 %v5749_v16  ;;  %v5761_v55 = vpack.c.bf16 %v1206_v54, %v1205_v53  ;;  %v5765_v58 = vpack.c.bf16 %v1208_v57, %v1207_v56  ;;  %v1209_v59 = vld [vmem:[%s9581_s3 + $0x50] sm:$0xff]  ;;  %v1210_v60 = vld [vmem:[%s9581_s3 + $0x58] sm:$0xff]  ;;  %v1211_v62 = vld [vmem:[%s9581_s3 + $0x60] sm:$0xff] }
  0x84   : > { %v5769_v61 = vpack.c.bf16 %v1210_v60, %v1209_v59  ;;  %v1212_v63 = vld [vmem:[%s9581_s3 + $0x68] sm:$0xff]  ;;  %v1213_v1 = vld [vmem:[%s9581_s3 + $0x70] sm:$0xff]  ;;  %v1214_v2 = vld [vmem:[%s9581_s3 + $0x78] sm:$0xff] }
  0x85   : > { %5398 = vmatmul.mubr.msk.f32.vlgmr.msra.gmra.mrb[0].mxu0 %vm589_vm0, %v543_v17  ;;  %5422 = vmatmul.mubr.msk.f32.vlgmr.msra.gmra.mrb[0].mxu1 %vm589_vm0, %v559_v18  ;;  %v5773_v0 = vpack.c.bf16 %v1212_v63, %v1211_v62  ;;  %v5777_v3 = vpack.c.bf16 %v1214_v2, %v1213_v1  ;;  %v6947_v4 = vld [vmem:[%s9580_s2] ss:$0 sm:$0xff] }
  0x86   : > { %5400 = vmatprep.mubr.msk.f32.mxu0 %vm589_vm0, %v544_v19  ;;  %5424 = vmatprep.mubr.msk.f32.mxu1 %vm589_vm0, %v560_v20 }
  0x87   : > { %5752 = vmatpush3.bf16.msra.mxu1 %v5749_v16 }
  0x88   : > { %5754 = vmatprep.subr.bf16.mxu1 %v5753_v49 }
  0x89   : > { %5401 = vmatmul.mubr.msk.f32.gmra.mrb[2].mxu0 %vm589_vm0, %v545_v21  ;;  %5425 = vmatmul.mubr.msk.f32.gmra.mrb[2].mxu1 %vm589_vm0, %v561_v22 }
  0x8a   : > { %5403 = vmatprep.mubr.msk.f32.mxu0 %vm589_vm0, %v546_v23  ;;  %5427 = vmatprep.mubr.msk.f32.mxu1 %vm589_vm0, %v562_v24 }
  0x8b   : > { %5756 = vmatpush3.bf16.msra.mxu1 %v5753_v49 }
  0x8c   : > { %5758 = vmatprep.subr.bf16.mxu1 %v5757_v52 }
  0x8d   : > { %5404 = vmatmul.mubr.msk.f32.gmra.mrb[4].mxu0 %vm589_vm0, %v547_v25  ;;  %5428 = vmatmul.mubr.msk.f32.gmra.mrb[4].mxu1 %vm589_vm0, %v563_v26 }
  0x8e   : > { %5406 = vmatprep.mubr.msk.f32.mxu0 %vm589_vm0, %v548_v27  ;;  %5430 = vmatprep.mubr.msk.f32.mxu1 %vm589_vm0, %v564_v28 }
  0x8f   : > { %5760 = vmatpush3.bf16.msra.mxu1 %v5757_v52 }
  0x90   : > { %5762 = vmatprep.subr.bf16.mxu1 %v5761_v55 }
  0x91   : > { %5407 = vmatmul.mubr.msk.f32.gmra.mrb[6].mxu0 %vm589_vm0, %v549_v29  ;;  %5431 = vmatmul.mubr.msk.f32.gmra.mrb[6].mxu1 %vm589_vm0, %v565_v30 }
  0x92   : > { %5409 = vmatprep.mubr.msk.f32.mxu0 %vm589_vm0, %v550_v31  ;;  %5433 = vmatprep.mubr.msk.f32.mxu1 %vm589_vm0, %v566_v32 }
  0x93   : > { %5764 = vmatpush3.bf16.msra.mxu1 %v5761_v55 }
  0x94   : > { %5766 = vmatprep.subr.bf16.mxu1 %v5765_v58 }
  0x95   : > { %5410 = vmatmul.mubr.msk.f32.gmra.mrb[8].mxu0 %vm589_vm0, %v551_v33  ;;  %5434 = vmatmul.mubr.msk.f32.gmra.mrb[8].mxu1 %vm589_vm0, %v567_v34 }
  0x96   : > { %5412 = vmatprep.mubr.msk.f32.mxu0 %vm589_vm0, %v552_v35  ;;  %5436 = vmatprep.mubr.msk.f32.mxu1 %vm589_vm0, %v568_v36 }
  0x97   : > { %5768 = vmatpush3.bf16.msra.mxu1 %v5765_v58 }
  0x98   : > { %5770 = vmatprep.subr.bf16.mxu1 %v5769_v61 }
  0x99   : > { %5413 = vmatmul.mubr.msk.f32.gmra.mrb[10].mxu0 %vm589_vm0, %v553_v37  ;;  %5437 = vmatmul.mubr.msk.f32.gmra.mrb[10].mxu1 %vm589_vm0, %v569_v38 }
  0x9a   : > { %5415 = vmatprep.mubr.msk.f32.mxu0 %vm589_vm0, %v554_v39  ;;  %5439 = vmatprep.mubr.msk.f32.mxu1 %vm589_vm0, %v570_v40 }
  0x9b   : > { %5772 = vmatpush3.bf16.msra.mxu1 %v5769_v61 }
  0x9c   : > { %5774 = vmatprep.subr.bf16.mxu1 %v5773_v0 }
  0x9d   : > { %5416 = vmatmul.mubr.msk.f32.gmra.mrb[12].mxu0 %vm589_vm0, %v555_v41  ;;  %5440 = vmatmul.mubr.msk.f32.gmra.mrb[12].mxu1 %vm589_vm0, %v571_v42 }
  0x9e   : > { %5418 = vmatprep.mubr.msk.f32.mxu0 %vm589_vm0, %v556_v43  ;;  %5442 = vmatprep.mubr.msk.f32.mxu1 %vm589_vm0, %v572_v44 }
  0x9f   : > { %5776 = vmatpush3.bf16.msra.mxu1 %v5773_v0 }
  0xa0   : > { %5778 = vmatprep.subr.bf16.mxu1 %v5777_v3 }
  0xa1   : > { %5419 = vmatmul.mubr.msk.f32.gmra.mrb[14].mxu0 %vm589_vm0, %v557_v45  ;;  %5443 = vmatmul.mubr.msk.f32.gmra.mrb[14].mxu1 %vm589_vm0, %v573_v46 }
  0xa3   : > { %5780 = vmatpush3.bf16.msra.mxu1 %v5777_v3 }
 0x158   : > { %v5399_v5 = vpop.f32.mrb[0].mxu0  ;;  %v5423_v6 = vpop.f32.mrb[0].mxu1 }
 0x159   : > { %v758_v7 = vadd.f32 %v5399_v5, %v6947_v4  ;;  %v752_v8 = vpop.f32.mrb[1].mxu0  ;;  %v832_v9 = vpop.f32.mrb[1].mxu1  ;;  %v6955_v18 = vadd.f32 %v5423_v6, %v6947_v4 }
 0x15a   : > { %v753_v10 = vadd.f32 %v6947_v4, %v752_v8  ;;  %v6952_v14 = vadd.f32 %v6947_v4, %v832_v9 }
 0x15b   : > { %v944_v11 = vmul.f32 0.044715, %v758_v7  ;;  %v960_v31 = vmul.f32 0.044715, %v6955_v18  ;;  %v6975_v36 = vmul.f32 0.5, %v758_v7  ;;  %v6979_v39 = vmul.f32 0.5, %v6955_v18 }
 0x15c   : > { %v943_v12 = vmul.f32 0.044715, %v753_v10  ;;  %v5402_v13 = vpop.f32.mrb[2].mxu0  ;;  %v5426_v15 = vpop.f32.mrb[2].mxu1  ;;  %v959_v25 = vmul.f32 0.044715, %v6952_v14 }
 0x15d   : > { %v976_v16 = vmul.f32 %v944_v11, %v758_v7  ;;  %v762_v17 = vpop.f32.mrb[3].mxu0  ;;  %v842_v19 = vpop.f32.mrb[3].mxu1  ;;  %v6961_v23 = vadd.f32 %v5402_v13, %v6947_v4  ;;  %v6967_v32 = vadd.f32 %v5426_v15, %v6947_v4  ;;  %9630 = vst [vmem:[#allocation15_spill] sm:$0xff] %v6979_v39  ;;  %v6988_v47 = vmul.f32 %v960_v31, %v6955_v18 }
 0x15e   : > { %v975_v20 = vmul.f32 %v943_v12, %v753_v10  ;;  %v6958_v21 = vadd.f32 %v6947_v4, %v762_v17  ;;  %v6973_v35 = vadd.f32 %v6947_v4, %v842_v19  ;;  %v991_v42 = vmul.f32 %v959_v25, %v6952_v14 }
 0x15f   : > { %v1008_v22 = vmul.f32 %v976_v16, %v758_v7  ;;  %v946_v37 = vmul.f32 0.044715, %v6961_v23  ;;  %v962_v49 = vmul.f32 0.044715, %v6967_v32  ;;  %v6998_v54 = vmul.f32 0.5, %v753_v10 }
 0x160   : > { %v5405_v24 = vpop.f32.mrb[4].mxu0  ;;  %v5429_v26 = vpop.f32.mrb[4].mxu1  ;;  %v1007_v27 = vmul.f32 %v975_v20, %v753_v10  ;;  %v945_v29 = vmul.f32 0.044715, %v6958_v21  ;;  %v961_v51 = vmul.f32 0.044715, %v6973_v35  ;;  %v7012_v63 = vmul.f32 %v991_v42, %v6952_v14 }
 0x161   : > { %v1040_v28 = vadd.f32 %v1008_v22, %v758_v7  ;;  %v772_v30 = vpop.f32.mrb[5].mxu0  ;;  %v852_v33 = vpop.f32.mrb[5].mxu1  ;;  %v6985_v46 = vadd.f32 %v5405_v24, %v6947_v4  ;;  %v6993_v52 = vadd.f32 %v5429_v26, %v6947_v4  ;;  %v978_v55 = vmul.f32 %v946_v37, %v6961_v23 }
 0x162   : > { %v6970_v34 = vadd.f32 %v6947_v4, %v772_v30  ;;  %v1039_v38 = vadd.f32 %v1007_v27, %v753_v10  ;;  %v977_v45 = vmul.f32 %v945_v29, %v6958_v21  ;;  %v6996_v53 = vadd.f32 %v6947_v4, %v852_v33 }
 0x163   : > { %v1072_v40 = vmul.f32 0.7978846, %v1040_v28  ;;  %v948_v0 = vmul.f32 0.044715, %v6985_v46  ;;  %v7016_v1 = vmul.f32 %v962_v49, %v6967_v32  ;;  %v964_v8 = vmul.f32 0.044715, %v6993_v52 }
 0x164   : > { %v947_v41 = vmul.f32 0.044715, %v6970_v34  ;;  %v5408_v43 = vpop.f32.mrb[6].mxu0  ;;  %v5432_v44 = vpop.f32.mrb[6].mxu1  ;;  %v1071_v58 = vmul.f32 0.7978846, %v1039_v38  ;;  %v1009_v6 = vmul.f32 %v977_v45, %v6958_v21  ;;  %v1010_v13 = vmul.f32 %v978_v55, %v6961_v23 }
 0x165   : > { %v782_v48 = vpop.f32.mrb[7].mxu0  ;;  %v862_v50 = vpop.f32.mrb[7].mxu1  ;;  %v7002_v56 = vadd.f32 %v5408_v43, %v6947_v4  ;;  %5925 = vtanh.f32 %v1072_v40  ;;  %v7009_v61 = vadd.f32 %v5432_v44, %v6947_v4  ;;  %v963_v9 = vmul.f32 0.044715, %v6996_v53 }
 0x166   : > { %v7005_v57 = vadd.f32 %v6947_v4, %v782_v48  ;;  %v979_v59 = vmul.f32 %v947_v41, %v6970_v34  ;;  %v7019_v3 = vadd.f32 %v6947_v4, %v862_v50  ;;  %5927 = vtanh.f32 %v1071_v58 }
 0x167   : > { %v950_v11 = vmul.f32 0.044715, %v7002_v56  ;;  %v7034_v15 = vmul.f32 %v961_v51, %v6973_v35  ;;  %v966_v19 = vmul.f32 0.044715, %v7009_v61  ;;  %v980_v24 = vmul.f32 %v948_v0, %v6985_v46 }
 0x168   : > { %v5411_v60 = vpop.f32.mrb[8].mxu0  ;;  %v5435_v62 = vpop.f32.mrb[8].mxu1  ;;  %v949_v12 = vmul.f32 0.044715, %v7005_v57  ;;  %v1011_v22 = vmul.f32 %v979_v59, %v6970_v34  ;;  %v965_v26 = vmul.f32 0.044715, %v7019_v3  ;;  %v1041_v29 = vadd.f32 %v1009_v6, %v6958_v21 }
 0x169   : > { %v792_v2 = vpop.f32.mrb[9].mxu0  ;;  %v872_v5 = vpop.f32.mrb[9].mxu1  ;;  %v7023_v7 = vadd.f32 %v5411_v60, %v6947_v4  ;;  %v7028_v10 = vadd.f32 %v5435_v62, %v6947_v4  ;;  %v7049_v31 = vmul.f32 %v964_v8, %v6993_v52  ;;  %v7052_v33 = vmul.f32 %v963_v9, %v6996_v53 }
 0x16a   : > { %v7037_v16 = vadd.f32 %v6947_v4, %v792_v2  ;;  %v7044_v27 = vadd.f32 %v6947_v4, %v872_v5  ;;  %v7056_v38 = vmul.f32 %v950_v11, %v7002_v56  ;;  %v981_v40 = vmul.f32 %v949_v12, %v7005_v57 }
 0x16b   : > { %v952_v30 = vmul.f32 0.044715, %v7023_v7  ;;  %v968_v37 = vmul.f32 0.044715, %v7028_v10  ;;  %v1042_v42 = vadd.f32 %v1010_v13, %v6961_v23  ;;  %v7065_v44 = vmul.f32 %v966_v19, %v7009_v61 }
 0x16c   : > { %v5414_v17 = vpop.f32.mrb[10].mxu0  ;;  %v5438_v20 = vpop.f32.mrb[10].mxu1  ;;  %v951_v43 = vmul.f32 0.044715, %v7037_v16  ;;  %v1043_v49 = vadd.f32 %v1011_v22, %v6970_v34  ;;  %v7072_v50 = vmul.f32 %v965_v26, %v7019_v3  ;;  %v967_v55 = vmul.f32 0.044715, %v7044_v27 }
 0x16d   : > { %v802_v25 = vpop.f32.mrb[11].mxu0  ;;  %v882_v28 = vpop.f32.mrb[11].mxu1  ;;  %v7060_v41 = vadd.f32 %v5414_v17, %v6947_v4  ;;  %v7068_v48 = vadd.f32 %v5438_v20, %v6947_v4  ;;  %v1073_v58 = vmul.f32 0.7978846, %v1041_v29  ;;  %v1012_v60 = vmul.f32 %v980_v24, %v6985_v46 }
 0x16e   : > { %v984_v0 = vmul.f32 %v952_v30, %v7023_v7  ;;  %v7078_v2 = vadd.f32 %v6947_v4, %v802_v25  ;;  %v7081_v5 = vmul.f32 %v968_v37, %v7028_v10  ;;  %v7084_v6 = vadd.f32 %v6947_v4, %v882_v28 }
 0x16f   : > { %9631 = vst [vmem:[#allocation16_spill] sm:$0xff] %v7068_v48  ;;  %v5926_v62 = vpop.eup %5925  ;;  %v954_v9 = vmul.f32 0.044715, %v7060_v41  ;;  %5929 = vtanh.f32 %v1073_v58  ;;  %v1074_v12 = vmul.f32 0.7978846, %v1042_v42  ;;  %v983_v13 = vmul.f32 %v951_v43, %v7037_v16 }
 0x170   : > { %v5417_v45 = vpop.f32.mrb[12].mxu0  ;;  %v5441_v59 = vpop.f32.mrb[12].mxu1  ;;  %v970_v20 = vmul.f32 0.044715, %v7068_v48  ;;  %v1075_v22 = vmul.f32 0.7978846, %v1043_v49  ;;  %v7101_v42 = vmul.f32 %v967_v55, %v7044_v27  ;;  %v1044_v39 = vadd.f32 %v1012_v60, %v6985_v46 }
 0x171   : > { %v812_v51 = vpop.f32.mrb[13].mxu0  ;;  %v892_v8 = vpop.f32.mrb[13].mxu1  ;;  %v7088_v11 = vadd.f32 %v5441_v59, %v6947_v4  ;;  %v7092_v17 = vadd.f32 %v5417_v45, %v6947_v4  ;;  %v1136_v28 = vadd.f32 1.0, %v5926_v62  ;;  %v913_v29 = vmul.f32 0.5, %v6958_v21 }
 0x172   : > { %v5928_v24 = vpop.eup %5927  ;;  %v7096_v25 = vadd.f32 %v6947_v4, %v812_v51  ;;  %5931 = vtanh.f32 %v1074_v12  ;;  %v953_v37 = vmul.f32 0.044715, %v7078_v2  ;;  %v969_v45 = vmul.f32 0.044715, %v7084_v6 }
 0x173   : > { %v1135_v43 = vadd.f32 1.0, %v5928_v24  ;;  %v914_v51 = vmul.f32 0.5, %v6961_v23  ;;  %5933 = vtanh.f32 %v1075_v22  ;;  %v986_v21 = vmul.f32 %v954_v9, %v7060_v41 }
 0x174   : > { %v5420_v19 = vpop.f32.mrb[14].mxu0  ;;  %v5444_v30 = vpop.f32.mrb[14].mxu1  ;;  %v956_v62 = vmul.f32 0.044715, %v7092_v17  ;;  %v7115_v12 = vmul.f32 %v970_v20, %v7068_v48  ;;  %v955_v24 = vmul.f32 0.044715, %v7096_v25  ;;  %v985_v22 = vmul.f32 %v953_v37, %v7078_v2 }
 0x175   : > { %v822_v26 = vpop.f32.mrb[15].mxu0  ;;  %v902_v58 = vpop.f32.mrb[15].mxu1  ;;  %v7109_v59 = vadd.f32 %v5444_v30, %v6947_v4  ;;  %v1167_v55 = vmul.f32 %v1135_v43, %v6998_v54  ;;  %v7125_v9 = vadd.f32 %v5420_v19, %v6947_v4  ;;  %v7128_v54 = vmul.f32 %v969_v45, %v7084_v6 }
 0x176   : > { %v7105_v49 = vadd.f32 %v6947_v4, %v822_v26  ;;  %9632 = vst [vmem:[#allocation17_spill] sm:$0xff] %v7115_v12  ;;  %v1168_v26 = vmul.f32 %v1136_v28, %v6975_v36  ;;  %v7121_v23 = vadd.f32 %v6947_v4, %v902_v58  ;;  %v1013_v20 = vmul.f32 %v981_v40, %v7005_v57 }
 0x177   : > { %5477 = vmatprep.mubr.f32.mxu1 %v1167_v55  ;;  %v7133_v36 = vadd.f32 %v6947_v4, %v892_v8  ;;  %v1076_v60 = vmul.f32 0.7978846, %v1044_v39  ;;  %v1014_v28 = vmul.f32 %v7056_v38, %v7002_v56  ;;  %v988_v37 = vmul.f32 %v956_v62, %v7092_v17 }
 0x178   : > { %v957_v30 = vmul.f32 0.044715, %v7105_v49  ;;  %5478 = vmatmul.mubr.f32.vlgmr.msra.gmra.mrb[16].mxu1 %v1168_v26  ;;  %v915_v19 = vmul.f32 0.5, %v6970_v34  ;;  %v1045_v43 = vadd.f32 %v1013_v20, %v7005_v57  ;;  %v1015_v45 = vmul.f32 %v983_v13, %v7037_v16 }
 0x179   : > { %v5930_v58 = vpop.eup %5929  ;;  %v987_v40 = vmul.f32 %v955_v24, %v7096_v25  ;;  %5935 = vtanh.f32 %v1076_v60  ;;  %v1046_v55 = vadd.f32 %v1014_v28, %v7002_v56  ;;  %v1016_v4 = vmul.f32 %v984_v0, %v7023_v7 }
 0x17a   : > { %v958_v39 = vmul.f32 0.044715, %v7125_v9  ;;  %v1137_v8 = vadd.f32 1.0, %v5930_v58  ;;  %v1077_v38 = vmul.f32 0.7978846, %v1045_v43  ;;  %v1047_v62 = vadd.f32 %v1015_v45, %v7037_v16 }
 0x17b   : > { %v989_v34 = vmul.f32 %v957_v30, %v7105_v49  ;;  %v1078_v20 = vmul.f32 0.7978846, %v1046_v55  ;;  %v1048_v13 = vadd.f32 %v1016_v4, %v7023_v7  ;;  %v1017_v12 = vmul.f32 %v985_v22, %v7078_v2 }
 0x17c   : > { %v5932_v26 = vpop.eup %5931  ;;  %v1169_v24 = vmul.f32 %v1137_v8, %v913_v29  ;;  %5937 = vtanh.f32 %v1077_v38  ;;  %v1079_v28 = vmul.f32 0.7978846, %v1047_v62  ;;  %v1018_v43 = vmul.f32 %v986_v21, %v7060_v41 }
 0x17d   : > { %v1138_v60 = vadd.f32 1.0, %v5932_v26  ;;  %v5934_v48 = vpop.eup %5933  ;;  %5939 = vtanh.f32 %v1078_v20  ;;  %v1080_v0 = vmul.f32 0.7978846, %v1048_v13  ;;  %v1049_v58 = vadd.f32 %v1017_v12, %v7078_v2 }
 0x17e   : > { %v990_v45 = vmul.f32 %v958_v39, %v7125_v9  ;;  %5480 = vmatprep.mubr.f32.mxu1 %v1169_v24  ;;  %v1139_v55 = vadd.f32 1.0, %v5934_v48  ;;  %5941 = vtanh.f32 %v1079_v28  ;;  %v1050_v29 = vadd.f32 %v1018_v43, %v7060_v41 }
 0x17f   : > { %v1170_v30 = vmul.f32 %v1138_v60, %v914_v51  ;;  %5943 = vtanh.f32 %v1080_v0  ;;  %v1081_v4 = vmul.f32 0.7978846, %v1049_v58  ;;  %v1019_v22 = vmul.f32 %v987_v40, %v7096_v25 }
 0x180   : > { %v7155_v8 = vmul.f32 0.044715, %v7088_v11  ;;  %v7158_v12 = vmul.f32 0.044715, %v7133_v36  ;;  %v1171_v21 = vmul.f32 %v1139_v55, %v915_v19  ;;  %v1020_v39 = vmul.f32 %v988_v37, %v7092_v17 }
 0x181   : > { %5481 = vmatmul.mubr.f32.gmra.mrb[18].mxu1 %v1170_v30  ;;  %5945 = vtanh.f32 %v1081_v4  ;;  %v1082_v51 = vmul.f32 0.7978846, %v1050_v29  ;;  %v1051_v48 = vadd.f32 %v1019_v22, %v7096_v25  ;;  %v1021_v38 = vmul.f32 %v989_v34, %v7105_v49 }
 0x182   : > { %5483 = vmatprep.mubr.f32.mxu1 %v1171_v21  ;;  %v7164_v62 = vmul.f32 0.044715, %v7109_v59  ;;  %v916_v40 = vmul.f32 0.5, %v6985_v46  ;;  %v1052_v26 = vadd.f32 %v1020_v39, %v7092_v17  ;;  %v1022_v20 = vmul.f32 %v990_v45, %v7125_v9 }
 0x183   : > { %v5936_v13 = vpop.eup %5935  ;;  %5947 = vtanh.f32 %v1082_v51  ;;  %v1083_v19 = vmul.f32 0.7978846, %v1051_v48  ;;  %v1053_v37 = vadd.f32 %v1021_v38, %v7105_v49  ;;  %v1055_v24 = vadd.f32 %v7012_v63, %v6952_v14 }
 0x184   : > { %v1140_v60 = vadd.f32 1.0, %v5936_v13  ;;  %v1084_v34 = vmul.f32 0.7978846, %v1052_v26  ;;  %v1054_v28 = vadd.f32 %v1022_v20, %v7125_v9  ;;  %v1024_v0 = vmul.f32 %v6988_v47, %v6955_v18 }
 0x185   : > { %v917_v46 = vmul.f32 0.5, %v7005_v57  ;;  %5949 = vtanh.f32 %v1083_v19  ;;  %v1085_v58 = vmul.f32 0.7978846, %v1053_v37  ;;  %v1087_v43 = vmul.f32 0.7978846, %v1055_v24 }
 0x186   : > { %v5938_v45 = vpop.eup %5937  ;;  %v1172_v30 = vmul.f32 %v1140_v60, %v916_v40  ;;  %5951 = vtanh.f32 %v1084_v34  ;;  %v1086_v55 = vmul.f32 0.7978846, %v1054_v28  ;;  %v1056_v4 = vadd.f32 %v1024_v0, %v6955_v18 }
 0x187   : > { %v5940_v29 = vpop.eup %5939  ;;  %v1141_v63 = vadd.f32 1.0, %v5938_v45  ;;  %v918_v22 = vmul.f32 0.5, %v7002_v56  ;;  %5953 = vtanh.f32 %v1085_v58  ;;  %v1025_v21 = vmul.f32 %v7034_v15, %v6973_v35 }
 0x188   : > { %v5942_v47 = vpop.eup %5941  ;;  %5484 = vmatmul.mubr.f32.gmra.mrb[20].mxu1 %v1172_v30  ;;  %v1142_v57 = vadd.f32 1.0, %v5940_v29  ;;  %v919_v39 = vmul.f32 0.5, %v7037_v16  ;;  %5955 = vtanh.f32 %v1086_v55  ;;  %v1026_v51 = vmul.f32 %v7016_v1, %v6967_v32 }
 0x189   : > { %v5944_v48 = vpop.eup %5943  ;;  %v1173_v38 = vmul.f32 %v1141_v63, %v917_v46  ;;  %v1143_v18 = vadd.f32 1.0, %v5942_v47  ;;  %v1088_v40 = vmul.f32 0.7978846, %v1056_v4  ;;  %v1057_v26 = vadd.f32 %v1025_v21, %v6973_v35 }
 0x18a   : > { %v1174_v56 = vmul.f32 %v1142_v57, %v918_v22  ;;  %v1144_v20 = vadd.f32 1.0, %v5944_v48  ;;  %5957 = vtanh.f32 %v1087_v43  ;;  %v1058_v15 = vadd.f32 %v1026_v51, %v6967_v32 }
 0x18b   : > { %v5946_v13 = vpop.eup %5945  ;;  %5486 = vmatprep.mubr.f32.mxu1 %v1173_v38  ;;  %v1175_v19 = vmul.f32 %v1143_v18, %v919_v39  ;;  %v920_v16 = vmul.f32 0.5, %v7023_v7  ;;  %v1089_v37 = vmul.f32 0.7978846, %v1057_v26  ;;  %v1027_v1 = vmul.f32 %v7052_v33, %v6996_v53 }
 0x18c   : > { %5487 = vmatmul.mubr.f32.gmra.mrb[22].mxu1 %v1174_v56  ;;  %v921_v24 = vmul.f32 0.5, %v7078_v2  ;;  %v1145_v60 = vadd.f32 1.0, %v5946_v13  ;;  %v922_v34 = vmul.f32 0.5, %v7060_v41  ;;  %v1090_v28 = vmul.f32 0.7978846, %v1058_v15 }
 0x18d   : > { %v5948_v0 = vpop.eup %5947  ;;  %5489 = vmatprep.mubr.f32.mxu1 %v1175_v19  ;;  %v1176_v46 = vmul.f32 %v1144_v20, %v920_v16  ;;  %5959 = vtanh.f32 %v1088_v40  ;;  %v1059_v58 = vadd.f32 %v1027_v1, %v6996_v53  ;;  %v1028_v7 = vmul.f32 %v7049_v31, %v6993_v52 }
 0x18e   : > { %v1177_v43 = vmul.f32 %v1145_v60, %v921_v24  ;;  %v1146_v45 = vadd.f32 1.0, %v5948_v0  ;;  %5961 = vtanh.f32 %v1089_v37  ;;  %v1029_v33 = vmul.f32 %v7072_v50, %v7019_v3  ;;  %v9633_v60 = vld [vmem:[#allocation16_spill] sm:$0xff] }
 0x18f   : > { %v5950_v2 = vpop.eup %5949  ;;  %v923_v30 = vmul.f32 0.5, %v7096_v25  ;;  %v1091_v41 = vmul.f32 0.7978846, %v1059_v58  ;;  %v1060_v55 = vadd.f32 %v1028_v7, %v6993_v52  ;;  %v1030_v4 = vmul.f32 %v7065_v44, %v7009_v61 }
 0x190   : > { %v5952_v29 = vpop.eup %5951  ;;  %5490 = vmatmul.mubr.f32.gmra.mrb[24].mxu1 %v1176_v46  ;;  %v1178_v63 = vmul.f32 %v1146_v45, %v922_v34  ;;  %v1147_v22 = vadd.f32 1.0, %v5950_v2  ;;  %5963 = vtanh.f32 %v1090_v28  ;;  %v1061_v31 = vadd.f32 %v1029_v33, %v7019_v3  ;;  %v9634_v34 = vld [vmem:[#allocation17_spill] sm:$0xff] }
 0x191   : > { %v5954_v21 = vpop.eup %5953  ;;  %5492 = vmatprep.mubr.f32.mxu1 %v1177_v43  ;;  %v1148_v47 = vadd.f32 1.0, %v5952_v29  ;;  %5965 = vtanh.f32 %v1091_v41  ;;  %v1092_v50 = vmul.f32 0.7978846, %v1060_v55  ;;  %v1062_v25 = vadd.f32 %v1030_v4, %v7009_v61 }
 0x192   : > { %v5956_v57 = vpop.eup %5955  ;;  %v1179_v39 = vmul.f32 %v1147_v22, %v923_v30  ;;  %v1149_v51 = vadd.f32 1.0, %v5954_v21  ;;  %v1093_v48 = vmul.f32 0.7978846, %v1061_v31  ;;  %v1031_v44 = vmul.f32 %v7101_v42, %v7044_v27 }
 0x193   : > { %v1004_v38 = vmul.f32 %v7155_v8, %v7088_v11  ;;  %v1003_v18 = vmul.f32 %v7158_v12, %v7133_v36  ;;  %v1006_v40 = vmul.f32 %v7164_v62, %v7109_v59  ;;  %v925_v26 = vmul.f32 0.5, %v7105_v49 }
 0x194   : > { %v5958_v56 = vpop.eup %5957  ;;  %v973_v20 = vmul.f32 0.044715, %v7121_v23  ;;  %5493 = vmatmul.mubr.f32.gmra.mrb[26].mxu1 %v1178_v63  ;;  %v924_v15 = vmul.f32 0.5, %v7092_v17  ;;  %v1150_v13 = vadd.f32 1.0, %v5956_v57  ;;  %v1063_v42 = vadd.f32 %v1031_v44, %v7044_v27 }
 0x195   : > { %5495 = vmatprep.mubr.f32.mxu1 %v1179_v39  ;;  %v1181_v19 = vmul.f32 %v1149_v51, %v925_v26  ;;  %v926_v8 = vmul.f32 0.5, %v7125_v9  ;;  %5967 = vtanh.f32 %v1092_v50  ;;  %v1094_v12 = vmul.f32 0.7978846, %v1062_v25 }
 0x196   : > { %v1180_v16 = vmul.f32 %v1148_v47, %v924_v15  ;;  %5969 = vtanh.f32 %v1093_v48  ;;  %v1095_v62 = vmul.f32 0.7978846, %v1063_v42  ;;  %v1032_v49 = vmul.f32 %v7081_v5, %v7028_v10  ;;  %v9635_v47 = vld [vmem:[#allocation15_spill] sm:$0xff] }
 0x197   : > { %v5960_v37 = vpop.eup %5959  ;;  %v927_v1 = vmul.f32 0.5, %v6952_v14  ;;  %v1151_v24 = vadd.f32 1.0, %v5958_v56  ;;  %v1033_v17 = vmul.f32 %v7128_v54, %v7084_v6  ;;  %v1034_v28 = vmul.f32 %v9634_v34, %v9633_v60 }
 0x198   : > { %v5962_v0 = vpop.eup %5961  ;;  %v1005_v9 = vmul.f32 %v973_v20, %v7121_v23  ;;  %5496 = vmatmul.mubr.f32.gmra.mrb[28].mxu1 %v1180_v16  ;;  %v1182_v46 = vmul.f32 %v1150_v13, %v926_v8  ;;  %v929_v58 = vmul.f32 0.5, %v6973_v35  ;;  %v1064_v7 = vadd.f32 %v1032_v49, %v7028_v10 }
 0x199   : > { %5498 = vmatprep.mubr.f32.mxu1 %v1181_v19  ;;  %5971 = vtanh.f32 %v1094_v12  ;;  %v1065_v14 = vadd.f32 %v1033_v17, %v7084_v6  ;;  %v1066_v5 = vadd.f32 %v1034_v28, %v9633_v60  ;;  %v1035_v54 = vmul.f32 %v1003_v18, %v7133_v36 }
 0x19a   : > { %v5964_v43 = vpop.eup %5963  ;;  %v1152_v45 = vadd.f32 1.0, %v5960_v37  ;;  %5973 = vtanh.f32 %v1095_v62  ;;  %v1096_v33 = vmul.f32 0.7978846, %v1064_v7  ;;  %v1036_v2 = vmul.f32 %v1004_v38, %v7088_v11 }
 0x19b   : > { %v5966_v30 = vpop.eup %5965  ;;  %v1183_v41 = vmul.f32 %v1151_v24, %v927_v1  ;;  %v1153_v55 = vadd.f32 1.0, %v5962_v0  ;;  %v1097_v35 = vmul.f32 0.7978846, %v1065_v14  ;;  %v1067_v4 = vadd.f32 %v1035_v54, %v7133_v36 }
 0x19c   : > { %5499 = vmatmul.mubr.f32.gmra.mrb[30].mxu1 %v1182_v46  ;;  %v930_v29 = vmul.f32 0.5, %v6967_v32  ;;  %v931_v63 = vmul.f32 0.5, %v6996_v53  ;;  %5975 = vtanh.f32 %v1096_v33  ;;  %v1098_v22 = vmul.f32 0.7978846, %v1066_v5 }
 0x19d   : > { %5501 = vmatprep.mubr.f32.mxu1 %v1183_v41  ;;  %v1068_v31 = vadd.f32 %v1036_v2, %v7088_v11  ;;  %v1037_v21 = vmul.f32 %v1005_v9, %v7121_v23  ;;  %v1184_v50 = vmul.f32 %v1152_v45, %v9635_v47  ;;  %v1154_v25 = vadd.f32 1.0, %v5964_v43  ;;  %v6310_v47 = vld [vmem:[%s6798_s29] sm:$0xff] }
 0x19e   : > { %5977 = vtanh.f32 %v1097_v35  ;;  %v1099_v57 = vmul.f32 0.7978846, %v1067_v4  ;;  %v1185_v51 = vmul.f32 %v1153_v55, %v929_v58  ;;  %v1155_v48 = vadd.f32 1.0, %v5966_v30 }
 0x19f   : > { %v5968_v39 = vpop.eup %5967  ;;  %v1069_v44 = vadd.f32 %v1037_v21, %v7121_v23  ;;  %v1038_v32 = vmul.f32 %v1006_v40, %v7109_v59  ;;  %v932_v38 = vmul.f32 0.5, %v6993_v52  ;;  %5979 = vtanh.f32 %v1098_v22 }
 0x1a0   : > { %v5970_v53 = vpop.eup %5969  ;;  %5502 = vmatmul.mubr.f32.gmra.mrb[32].mxu1 %v1184_v50  ;;  %v1100_v18 = vmul.f32 0.7978846, %v1068_v31  ;;  %v1186_v56 = vmul.f32 %v1154_v25, %v930_v29  ;;  %v1156_v20 = vadd.f32 1.0, %v5968_v39  ;;  %5981 = vtanh.f32 %v1099_v57 }
 0x1a1   : > { %5504 = vmatprep.mubr.f32.mxu1 %v1185_v51  ;;  %v1070_v26 = vadd.f32 %v1038_v32, %v7109_v59  ;;  %v1101_v15 = vmul.f32 0.7978846, %v1069_v44  ;;  %v1187_v42 = vmul.f32 %v1155_v48, %v931_v63  ;;  %v933_v19 = vmul.f32 0.5, %v7019_v3 }
 0x1a2   : > { %v1157_v8 = vadd.f32 1.0, %v5970_v53  ;;  %5983 = vtanh.f32 %v1100_v18  ;;  %v1188_v16 = vmul.f32 %v1156_v20, %v932_v38  ;;  %v934_v52 = vmul.f32 0.5, %v7009_v61  ;;  %v6311_v18 = vld [vmem:[%s6798_s29 + $0x18] sm:$0xff] }
 0x1a3   : > { %v5972_v13 = vpop.eup %5971  ;;  %v1102_v40 = vmul.f32 0.7978846, %v1070_v26  ;;  %5985 = vtanh.f32 %v1101_v15  ;;  %v935_v1 = vmul.f32 0.5, %v7044_v27  ;;  %v936_v34 = vmul.f32 0.5, %v7028_v10  ;;  %v6312_v15 = vld [vmem:[%s6798_s29 + $0x10] sm:$0xff] }
 0x1a4   : > { %v5974_v12 = vpop.eup %5973  ;;  %5505 = vmatmul.mubr.f32.gmra.mrb[34].mxu1 %v1186_v56  ;;  %v1158_v62 = vadd.f32 1.0, %v5972_v13  ;;  %v1189_v37 = vmul.f32 %v1157_v8, %v933_v19  ;;  %v937_v46 = vmul.f32 0.5, %v7084_v6  ;;  %v938_v27 = vmul.f32 0.5, %v9633_v60 }
 0x1a5   : > { %5507 = vmatprep.mubr.f32.mxu1 %v1187_v42  ;;  %v1159_v24 = vadd.f32 1.0, %v5974_v12  ;;  %5987 = vtanh.f32 %v1102_v40  ;;  %v939_v43 = vmul.f32 0.5, %v7133_v36  ;;  %v940_v2 = vmul.f32 0.5, %v7088_v11 }
 0x1a6   : > { %v5976_v49 = vpop.eup %5975  ;;  %v1190_v3 = vmul.f32 %v1158_v62, %v934_v52  ;;  %v941_v55 = vmul.f32 0.5, %v7121_v23  ;;  %v942_v4 = vmul.f32 0.5, %v7109_v59  ;;  %v6527_v22 = vmov 0.0   ;;  %v7395_v59 = vld [vmem:[%s9582_s4] ss:$0 sm:$0xff]  ;;  %v6309_v23 = vld [vmem:[%s6798_s29 + $0x8] sm:$0xff] }
 0x1a7   : > { %v1160_v28 = vadd.f32 1.0, %v5976_v49  ;;  %v1191_v9 = vmul.f32 %v1159_v24, %v935_v1  ;;  %2171 = vst.msk [vmem:[#allocation2 + $0x30] sm:$0xff] %vm589_vm0, %v6527_v22  ;;  %2165 = vst.msk [vmem:[#allocation2] sm:$0xff] %vm589_vm0, %v6527_v22  ;;  %v6313_v24 = vld [vmem:[%s6798_s29 + $0x28] sm:$0xff] }
 0x1a8   : > { %v5978_v17 = vpop.eup %5977  ;;  %5508 = vmatmul.mubr.f32.gmra.mrb[36].mxu1 %v1188_v16  ;;  %2166 = vst.msk [vmem:[#allocation2 + $0x8] sm:$0xff] %vm589_vm0, %v6527_v22  ;;  %2167 = vst.msk [vmem:[#allocation2 + $0x10] sm:$0xff] %vm589_vm0, %v6527_v22 }
 0x1a9   : > { %5510 = vmatprep.mubr.f32.mxu1 %v1189_v37  ;;  %v5980_v0 = vpop.eup %5979  ;;  %v1161_v61 = vadd.f32 1.0, %v5978_v17  ;;  %v1192_v7 = vmul.f32 %v1160_v28, %v936_v34  ;;  %2168 = vst.msk [vmem:[#allocation2 + $0x18] sm:$0xff] %vm589_vm0, %v6527_v22  ;;  %2169 = vst.msk [vmem:[#allocation2 + $0x20] sm:$0xff] %vm589_vm0, %v6527_v22  ;;  %v6314_v28 = vld [vmem:[%s6798_s29 + $0x20] sm:$0xff] }
 0x1aa   : > { %v5982_v58 = vpop.eup %5981  ;;  %v1162_v14 = vadd.f32 1.0, %v5980_v0  ;;  %2170 = vst.msk [vmem:[#allocation2 + $0x28] sm:$0xff] %vm589_vm0, %v6527_v22  ;;  %2172 = vst.msk [vmem:[#allocation2 + $0x38] sm:$0xff] %vm589_vm0, %v6527_v22 }
 0x1ab   : > { %v1193_v54 = vmul.f32 %v1161_v61, %v937_v46  ;;  %v1163_v45 = vadd.f32 1.0, %v5982_v58  ;;  %2173 = vst.msk [vmem:[#allocation2 + $0x40] sm:$0xff] %vm589_vm0, %v6527_v22  ;;  %2174 = vst.msk [vmem:[#allocation2 + $0x48] sm:$0xff] %vm589_vm0, %v6527_v22 }
 0x1ac   : > { %5511 = vmatmul.mubr.f32.gmra.mrb[38].mxu1 %v1190_v3  ;;  %v5984_v5 = vpop.eup %5983  ;;  %v1194_v10 = vmul.f32 %v1162_v14, %v938_v27  ;;  %2175 = vst.msk [vmem:[#allocation2 + $0x50] sm:$0xff] %vm589_vm0, %v6527_v22  ;;  %2176 = vst.msk [vmem:[#allocation2 + $0x58] sm:$0xff] %vm589_vm0, %v6527_v22 }
 0x1ad   : > { %5513 = vmatprep.mubr.f32.mxu1 %v1191_v9  ;;  %v5986_v33 = vpop.eup %5985  ;;  %v1164_v6 = vadd.f32 1.0, %v5984_v5  ;;  %v1195_v41 = vmul.f32 %v1163_v45, %v939_v43  ;;  %2177 = vst.msk [vmem:[#allocation2 + $0x60] sm:$0xff] %vm589_vm0, %v6527_v22  ;;  %2178 = vst.msk [vmem:[#allocation2 + $0x68] sm:$0xff] %vm589_vm0, %v6527_v22  ;;  %v6315_v5 = vld [vmem:[%s6798_s29 + $0x38] sm:$0xff] }
 0x1ae   : > { %v1165_v35 = vadd.f32 1.0, %v5986_v33  ;;  %2179 = vst.msk [vmem:[#allocation2 + $0x70] sm:$0xff] %vm589_vm0, %v6527_v22  ;;  %2180 = vst.msk [vmem:[#allocation2 + $0x78] sm:$0xff] %vm589_vm0, %v6527_v22 }
 0x1af   : > { %v5988_v30 = vpop.eup %5987  ;;  %v1196_v60 = vmul.f32 %v1164_v6, %v940_v2  ;;  %2181 = vst.msk [vmem:[#allocation2 + $0x80] sm:$0xff] %vm589_vm0, %v6527_v22  ;;  %2182 = vst.msk [vmem:[#allocation2 + $0x88] sm:$0xff] %vm589_vm0, %v6527_v22 }
 0x1b0   : > { %5514 = vmatmul.mubr.f32.gmra.mrb[40].mxu1 %v1192_v7  ;;  %v1166_v29 = vadd.f32 1.0, %v5988_v30  ;;  %v1197_v36 = vmul.f32 %v1165_v35, %v941_v55  ;;  %2183 = vst.msk [vmem:[#allocation2 + $0x90] sm:$0xff] %vm589_vm0, %v6527_v22  ;;  %2184 = vst.msk [vmem:[#allocation2 + $0x98] sm:$0xff] %vm589_vm0, %v6527_v22 }
 0x1b1   : > { %5516 = vmatprep.mubr.f32.mxu1 %v1193_v54  ;;  %2185 = vst.msk [vmem:[#allocation2 + $0xa0] sm:$0xff] %vm589_vm0, %v6527_v22  ;;  %2186 = vst.msk [vmem:[#allocation2 + $0xa8] sm:$0xff] %vm589_vm0, %v6527_v22 }
 0x1b2   : > { %v1198_v63 = vmul.f32 %v1166_v29, %v942_v4  ;;  %2187 = vst.msk [vmem:[#allocation2 + $0xb0] sm:$0xff] %vm589_vm0, %v6527_v22  ;;  %2188 = vst.msk [vmem:[#allocation2 + $0xb8] sm:$0xff] %vm589_vm0, %v6527_v22 }
 0x1b3   : > { %2189 = vst.msk [vmem:[#allocation2 + $0xc0] sm:$0xff] %vm589_vm0, %v6527_v22  ;;  %2190 = vst.msk [vmem:[#allocation2 + $0xc8] sm:$0xff] %vm589_vm0, %v6527_v22 }
 0x1b4   : > { %5517 = vmatmul.mubr.f32.gmra.mrb[42].mxu1 %v1194_v10  ;;  %2191 = vst.msk [vmem:[#allocation2 + $0xd0] sm:$0xff] %vm589_vm0, %v6527_v22  ;;  %2192 = vst.msk [vmem:[#allocation2 + $0xd8] sm:$0xff] %vm589_vm0, %v6527_v22  ;;  %v6316_v10 = vld [vmem:[%s6798_s29 + $0x30] sm:$0xff] }
 0x1b5   : > { %5519 = vmatprep.mubr.f32.mxu1 %v1195_v41  ;;  %2193 = vst.msk [vmem:[#allocation2 + $0xe0] sm:$0xff] %vm589_vm0, %v6527_v22  ;;  %2194 = vst.msk [vmem:[#allocation2 + $0xe8] sm:$0xff] %vm589_vm0, %v6527_v22 }
 0x1b6   : > { %2195 = vst.msk [vmem:[#allocation2 + $0xf0] sm:$0xff] %vm589_vm0, %v6527_v22  ;;  %2196 = vst.msk [vmem:[#allocation2 + $0xf8] sm:$0xff] %vm589_vm0, %v6527_v22 }
 0x1b7   : > { %2197 = vst.msk [vmem:[#allocation2 + $0x100] sm:$0xff] %vm589_vm0, %v6527_v22  ;;  %2198 = vst.msk [vmem:[#allocation2 + $0x108] sm:$0xff] %vm589_vm0, %v6527_v22 }
 0x1b8   : > { %5520 = vmatmul.mubr.f32.gmra.mrb[44].mxu1 %v1196_v60  ;;  %2199 = vst.msk [vmem:[#allocation2 + $0x110] sm:$0xff] %vm589_vm0, %v6527_v22  ;;  %2200 = vst.msk [vmem:[#allocation2 + $0x118] sm:$0xff] %vm589_vm0, %v6527_v22 }
 0x1b9   : > { %5522 = vmatprep.mubr.f32.mxu1 %v1197_v36  ;;  %2201 = vst.msk [vmem:[#allocation2 + $0x120] sm:$0xff] %vm589_vm0, %v6527_v22  ;;  %2202 = vst.msk [vmem:[#allocation2 + $0x128] sm:$0xff] %vm589_vm0, %v6527_v22 }
 0x1ba   : > { %2203 = vst.msk [vmem:[#allocation2 + $0x130] sm:$0xff] %vm589_vm0, %v6527_v22  ;;  %2204 = vst.msk [vmem:[#allocation2 + $0x138] sm:$0xff] %vm589_vm0, %v6527_v22 }
 0x1bb   : > { %2205 = vst.msk [vmem:[#allocation2 + $0x140] sm:$0xff] %vm589_vm0, %v6527_v22  ;;  %2206 = vst.msk [vmem:[#allocation2 + $0x148] sm:$0xff] %vm589_vm0, %v6527_v22 }
 0x1bc   : > { %5523 = vmatmul.mubr.f32.gmra.mrb[46].mxu1 %v1198_v63  ;;  %2207 = vst.msk [vmem:[#allocation2 + $0x150] sm:$0xff] %vm589_vm0, %v6527_v22  ;;  %2208 = vst.msk [vmem:[#allocation2 + $0x158] sm:$0xff] %vm589_vm0, %v6527_v22 }
 0x1bd   : > { %2209 = vst.msk [vmem:[#allocation2 + $0x160] sm:$0xff] %vm589_vm0, %v6527_v22  ;;  %2210 = vst.msk [vmem:[#allocation2 + $0x168] sm:$0xff] %vm589_vm0, %v6527_v22 }
 0x1be   : > { %2211 = vst.msk [vmem:[#allocation2 + $0x170] sm:$0xff] %vm589_vm0, %v6527_v22  ;;  %2212 = vst.msk [vmem:[#allocation2 + $0x178] sm:$0xff] %vm589_vm0, %v6527_v22 }
 0x1bf   : > { %2213 = vst.msk [vmem:[#allocation2 + $0x180] sm:$0xff] %vm589_vm0, %v6527_v22  ;;  %2214 = vst.msk [vmem:[#allocation2 + $0x188] sm:$0xff] %vm589_vm0, %v6527_v22 }
 0x1c0   : > { %2215 = vst.msk [vmem:[#allocation2 + $0x190] sm:$0xff] %vm589_vm0, %v6527_v22  ;;  %2216 = vst.msk [vmem:[#allocation2 + $0x198] sm:$0xff] %vm589_vm0, %v6527_v22 }
 0x1c1   : > { %2217 = vst.msk [vmem:[#allocation2 + $0x1a0] sm:$0xff] %vm589_vm0, %v6527_v22  ;;  %2218 = vst.msk [vmem:[#allocation2 + $0x1a8] sm:$0xff] %vm589_vm0, %v6527_v22 }
 0x1c2   : > { %2219 = vst.msk [vmem:[#allocation2 + $0x1b0] sm:$0xff] %vm589_vm0, %v6527_v22  ;;  %2220 = vst.msk [vmem:[#allocation2 + $0x1b8] sm:$0xff] %vm589_vm0, %v6527_v22 }
 0x1c3   : > { %2221 = vst.msk [vmem:[#allocation2 + $0x1c0] sm:$0xff] %vm589_vm0, %v6527_v22  ;;  %2222 = vst.msk [vmem:[#allocation2 + $0x1c8] sm:$0xff] %vm589_vm0, %v6527_v22 }
 0x1c4   : > { %2223 = vst.msk [vmem:[#allocation2 + $0x1d0] sm:$0xff] %vm589_vm0, %v6527_v22  ;;  %2224 = vst.msk [vmem:[#allocation2 + $0x1d8] sm:$0xff] %vm589_vm0, %v6527_v22 }
 0x1c5   : > { %2225 = vst.msk [vmem:[#allocation2 + $0x1e0] sm:$0xff] %vm589_vm0, %v6527_v22  ;;  %2226 = vst.msk [vmem:[#allocation2 + $0x1e8] sm:$0xff] %vm589_vm0, %v6527_v22 }
 0x1c6   : > { %2227 = vst.msk [vmem:[#allocation2 + $0x1f0] sm:$0xff] %vm589_vm0, %v6527_v22  ;;  %2228 = vst.msk [vmem:[#allocation2 + $0x1f8] sm:$0xff] %vm589_vm0, %v6527_v22 }
 0x1c7   : > { %2229 = vst.msk [vmem:[#allocation2 + $0x200] sm:$0xff] %vm589_vm0, %v6527_v22  ;;  %2230 = vst.msk [vmem:[#allocation2 + $0x208] sm:$0xff] %vm589_vm0, %v6527_v22 }
 0x1c8   : > { %2231 = vst.msk [vmem:[#allocation2 + $0x210] sm:$0xff] %vm589_vm0, %v6527_v22  ;;  %2232 = vst.msk [vmem:[#allocation2 + $0x218] sm:$0xff] %vm589_vm0, %v6527_v22 }
 0x1c9   : > { %2233 = vst.msk [vmem:[#allocation2 + $0x220] sm:$0xff] %vm589_vm0, %v6527_v22  ;;  %2234 = vst.msk [vmem:[#allocation2 + $0x228] sm:$0xff] %vm589_vm0, %v6527_v22 }
 0x1ca   : > { %2235 = vst.msk [vmem:[#allocation2 + $0x230] sm:$0xff] %vm589_vm0, %v6527_v22  ;;  %2236 = vst.msk [vmem:[#allocation2 + $0x238] sm:$0xff] %vm589_vm0, %v6527_v22 }
 0x24b   : > { %v5479_v11 = vpop.f32.mrb[16].mxu1 }
 0x24c   : > { %v1441_v31 = vadd.f32 %v6309_v23, %v5479_v11  ;;  %v1281_v21 = vpop.f32.mrb[17].mxu1 }
 0x24d   : > { %v1440_v50 = vadd.f32 %v6310_v47, %v1281_v21 }
 0x24e   : > { %v1480_v25 = vadd.f32 %v7395_v59, %v1441_v31  ;;  %v7433_v31 = vld [vmem:[%s9583_s5] ss:$0 sm:$0xff] }
 0x24f   : > { %v1479_v57 = vadd.f32 %v7395_v59, %v1440_v50 }
 0x250   : > { %v1544_v39 = vmul.f32 0.044715, %v1480_v25  ;;  %v1512_v55 = vmul.f32 0.5, %v1480_v25 }
 0x251   : > { %v1543_v51 = vmul.f32 0.044715, %v1479_v57  ;;  %v1511_v63 = vmul.f32 0.5, %v1479_v57 }
 0x252   : > { %v1576_v48 = vmul.f32 %v1544_v39, %v1480_v25 }
 0x253   : > { %v1575_v44 = vmul.f32 %v1543_v51, %v1479_v57 }
 0x254   : > { %v1608_v32 = vmul.f32 %v1576_v48, %v1480_v25  ;;  %v5482_v53 = vpop.f32.mrb[18].mxu1  ;;  %v6317_v48 = vld [vmem:[%s6798_s29 + $0x48] sm:$0xff] }
 0x255   : > { %v1607_v38 = vmul.f32 %v1575_v44, %v1479_v57  ;;  %v1443_v26 = vadd.f32 %v6311_v18, %v5482_v53  ;;  %v1291_v56 = vpop.f32.mrb[19].mxu1 }
 0x256   : > { %v1640_v20 = vadd.f32 %v1608_v32, %v1480_v25  ;;  %v1442_v13 = vadd.f32 %v6312_v15, %v1291_v56  ;;  %v7442_v32 = vld [vmem:[%s9584_s6] ss:$0 sm:$0xff] }
 0x257   : > { %v1639_v42 = vadd.f32 %v1607_v38, %v1479_v57  ;;  %v1482_v19 = vadd.f32 %v7395_v59, %v1443_v26  ;;  %v6318_v26 = vld [vmem:[%s6798_s29 + $0x40] sm:$0xff] }
 0x258   : > { %v1672_v8 = vmul.f32 0.7978846, %v1640_v20  ;;  %v7405_v12 = vadd.f32 %v7395_v59, %v1442_v13 }
 0x259   : > { %v1671_v40 = vmul.f32 0.7978846, %v1639_v42  ;;  %v1546_v16 = vmul.f32 0.044715, %v1482_v19  ;;  %v1514_v47 = vmul.f32 0.5, %v1482_v19 }
 0x25a   : > { %5989 = vtanh.f32 %v1672_v8  ;;  %v1545_v52 = vmul.f32 0.044715, %v7405_v12 }
 0x25b   : > { %5991 = vtanh.f32 %v1671_v40  ;;  %v1578_v62 = vmul.f32 %v1546_v16, %v1482_v19  ;;  %v5485_v37 = vpop.f32.mrb[20].mxu1  ;;  %v1513_v16 = vmul.f32 0.5, %v7405_v12 }
 0x25c   : > { %v1577_v49 = vmul.f32 %v1545_v52, %v7405_v12  ;;  %v1445_v17 = vadd.f32 %v6313_v24, %v5485_v37  ;;  %v1301_v3 = vpop.f32.mrb[21].mxu1 }
 0x25d   : > { %v1610_v1 = vmul.f32 %v1578_v62, %v1482_v19  ;;  %v1444_v0 = vadd.f32 %v6314_v28, %v1301_v3 }
 0x25e   : > { %v1609_v34 = vmul.f32 %v1577_v49, %v7405_v12  ;;  %v7413_v46 = vadd.f32 %v7395_v59, %v1445_v17 }
 0x25f   : > { %v1642_v9 = vadd.f32 %v1610_v1, %v1482_v19  ;;  %v7417_v58 = vadd.f32 %v7395_v59, %v1444_v0  ;;  %v5488_v7 = vpop.f32.mrb[22].mxu1 }
 0x260   : > { %v1641_v61 = vadd.f32 %v1609_v34, %v7405_v12  ;;  %v1548_v14 = vmul.f32 0.044715, %v7413_v46  ;;  %v1447_v54 = vadd.f32 %v6315_v5, %v5488_v7  ;;  %v1311_v43 = vpop.f32.mrb[23].mxu1  ;;  %v1516_v0 = vmul.f32 0.5, %v7413_v46 }
 0x261   : > { %v1674_v27 = vmul.f32 0.7978846, %v1642_v9  ;;  %v1547_v33 = vmul.f32 0.044715, %v7417_v58  ;;  %v1446_v2 = vadd.f32 %v6316_v10, %v1311_v43  ;;  %v1515_v9 = vmul.f32 0.5, %v7417_v58 }
 0x262   : > { %v1673_v45 = vmul.f32 0.7978846, %v1641_v61  ;;  %v1580_v6 = vmul.f32 %v1548_v14, %v7413_v46  ;;  %v1486_v30 = vadd.f32 %v7395_v59, %v1447_v54 }
 0x263   : > { %5993 = vtanh.f32 %v1674_v27  ;;  %v1579_v35 = vmul.f32 %v1547_v33, %v7417_v58  ;;  %v7427_v60 = vadd.f32 %v7395_v59, %v1446_v2  ;;  %v5491_v4 = vpop.f32.mrb[24].mxu1 }
 0x264   : > { %v5990_v41 = vpop.eup %5989  ;;  %5995 = vtanh.f32 %v1673_v45  ;;  %v1612_v22 = vmul.f32 %v1580_v6, %v7413_v46  ;;  %v1550_v11 = vmul.f32 0.044715, %v1486_v30  ;;  %v1321_v23 = vpop.f32.mrb[25].mxu1  ;;  %v1449_v44 = vadd.f32 %v6317_v48, %v5491_v4 }
 0x265   : > { %v5992_v29 = vpop.eup %5991  ;;  %v1736_v36 = vadd.f32 1.0, %v5990_v41  ;;  %v1611_v50 = vmul.f32 %v1579_v35, %v7417_v58  ;;  %v1549_v25 = vmul.f32 0.044715, %v7427_v60  ;;  %v1448_v56 = vadd.f32 %v6318_v26, %v1321_v23 }
 0x266   : > { %v1735_v21 = vadd.f32 1.0, %v5992_v29  ;;  %v1644_v51 = vadd.f32 %v1612_v22, %v7413_v46  ;;  %v1582_v57 = vmul.f32 %v1550_v11, %v1486_v30  ;;  %v1488_v19 = vadd.f32 %v7395_v59, %v1449_v44 }
 0x267   : > { %v1768_v39 = vmul.f32 %v1736_v36, %v1512_v55  ;;  %v1643_v38 = vadd.f32 %v1611_v50, %v7417_v58  ;;  %v1581_v18 = vmul.f32 %v1549_v25, %v7427_v60  ;;  %v5494_v20 = vpop.f32.mrb[26].mxu1  ;;  %v7456_v1 = vadd.f32 %v7395_v59, %v1448_v56 }
 0x268   : > { %v1767_v53 = vmul.f32 %v1735_v21, %v1511_v63  ;;  %v1676_v13 = vmul.f32 0.7978846, %v1644_v51  ;;  %v1614_v42 = vmul.f32 %v1582_v57, %v1486_v30  ;;  %v7449_v8 = vpop.f32.mrb[27].mxu1  ;;  %v1552_v3 = vmul.f32 0.044715, %v1488_v19 }
 0x269   : > { %v1807_v15 = vmul.f32 %v7433_v31, %v1768_v39  ;;  %v1675_v52 = vmul.f32 0.7978846, %v1643_v38  ;;  %v1613_v62 = vmul.f32 %v1581_v18, %v7427_v60  ;;  %v7467_v5 = vmul.f32 0.5, %v1486_v30 }
 0x26a   : > { %v1806_v40 = vmul.f32 %v7433_v31, %v1767_v53  ;;  %5997 = vtanh.f32 %v1676_v13  ;;  %v1646_v37 = vadd.f32 %v1614_v42, %v1486_v30  ;;  %v1584_v33 = vmul.f32 %v1552_v3, %v1488_v19  ;;  %v6319_v30 = vld [vmem:[%s6798_s29 + $0x58] sm:$0xff] }
 0x26b   : > { %v1846_v49 = vadd.f32 %v7442_v32, %v1807_v15  ;;  %5999 = vtanh.f32 %v1675_v52  ;;  %v1645_v17 = vadd.f32 %v1613_v62, %v7427_v60  ;;  %v7462_v34 = vpop.f32.mrb[28].mxu1  ;;  %v1551_v58 = vmul.f32 0.044715, %v7456_v1 }
 0x26c   : > { %v7459_v24 = vadd.f32 %v7442_v32, %v1806_v40  ;;  %v1678_v61 = vmul.f32 0.7978846, %v1646_v37  ;;  %v7469_v10 = vpop.f32.mrb[29].mxu1  ;;  %v1616_v35 = vmul.f32 %v1584_v33, %v1488_v19  ;;  %v1451_v4 = vadd.f32 %v6319_v30, %v5494_v20 }
 0x26d   : > { %v5994_v12 = vpop.eup %5993  ;;  %v1910_v28 = vmul.f32 0.044715, %v1846_v49  ;;  %v1677_v54 = vmul.f32 0.7978846, %v1645_v17  ;;  %v1517_v22 = vmul.f32 0.5, %v7427_v60  ;;  %v1583_v11 = vmul.f32 %v1551_v58, %v7456_v1 }
 0x26e   : > { %v5996_v7 = vpop.eup %5995  ;;  %v1909_v27 = vmul.f32 0.044715, %v7459_v24  ;;  %v1738_v14 = vadd.f32 1.0, %v5994_v12  ;;  %6001 = vtanh.f32 %v1678_v61  ;;  %v1648_v50 = vadd.f32 %v1616_v35, %v1488_v19 }
 0x26f   : > { %v1942_v43 = vmul.f32 %v1910_v28, %v1846_v49  ;;  %v1737_v45 = vadd.f32 1.0, %v5996_v7  ;;  %6003 = vtanh.f32 %v1677_v54  ;;  %v7473_v6 = vpop.f32.mrb[30].mxu1  ;;  %v7485_v25 = vmul.f32 0.5, %v1846_v49 }
 0x270   : > { %v1941_v2 = vmul.f32 %v1909_v27, %v7459_v24  ;;  %v1770_v46 = vmul.f32 %v1738_v14, %v1514_v47  ;;  %v7476_v29 = vpop.f32.mrb[31].mxu1  ;;  %v7483_v47 = vmul.f32 0.5, %v1488_v19  ;;  %v1615_v57 = vmul.f32 %v1583_v11, %v7456_v1 }
 0x271   : > { %v1974_v41 = vmul.f32 %v1942_v43, %v1846_v49  ;;  %v1769_v55 = vmul.f32 %v1737_v45, %v1513_v16  ;;  %v1680_v38 = vmul.f32 0.7978846, %v1648_v50  ;;  %v1490_v18 = vadd.f32 %v7395_v59, %v1451_v4  ;;  %v6320_v16 = vld [vmem:[%s6798_s29 + $0x50] sm:$0xff] }
 0x272   : > { %v1973_v36 = vmul.f32 %v1941_v2, %v7459_v24  ;;  %v1809_v63 = vmul.f32 %v7433_v31, %v1770_v46  ;;  %v7502_v42 = vmul.f32 0.5, %v7456_v1  ;;  %v1450_v52 = vadd.f32 %v6320_v16, %v7449_v8 }
 0x273   : > { %v2006_v23 = vadd.f32 %v1974_v41, %v1846_v49  ;;  %v1808_v21 = vmul.f32 %v7433_v31, %v1769_v55  ;;  %v7492_v48 = vpop.f32.mrb[32].mxu1  ;;  %v1647_v37 = vadd.f32 %v1615_v57, %v7456_v1  ;;  %v1554_v61 = vmul.f32 0.044715, %v1490_v18 }
 0x274   : > { %v2005_v39 = vadd.f32 %v1973_v36, %v7459_v24  ;;  %v7489_v51 = vadd.f32 %v7442_v32, %v1809_v63  ;;  %v5998_v60 = vpop.eup %5997  ;;  %v7498_v26 = vpop.f32.mrb[33].mxu1  ;;  %v1877_v36 = vmul.f32 0.5, %v7459_v24  ;;  %v7543_v24 = vmul.f32 0.5, %v1490_v18 }
 0x275   : > { %v2038_v44 = vmul.f32 0.7978846, %v2006_v23  ;;  %v7495_v53 = vadd.f32 %v7442_v32, %v1808_v21  ;;  %v6000_v56 = vpop.eup %5999  ;;  %v1740_v13 = vadd.f32 1.0, %v5998_v60  ;;  %v1679_v43 = vmul.f32 0.7978846, %v1647_v37 }
 0x276   : > { %v2037_v20 = vmul.f32 0.7978846, %v2005_v39  ;;  %v1912_v15 = vmul.f32 0.044715, %v7489_v51  ;;  %v1739_v40 = vadd.f32 1.0, %v6000_v56  ;;  %v1586_v33 = vmul.f32 %v1554_v61, %v1490_v18 }
 0x277   : > { %6005 = vtanh.f32 %v2038_v44  ;;  %v1911_v19 = vmul.f32 0.044715, %v7495_v53  ;;  %v1772_v49 = vmul.f32 %v1740_v13, %v1516_v0  ;;  %v7509_v17 = vpop.f32.mrb[34].mxu1  ;;  %v7537_v39 = vadd.f32 %v7395_v59, %v1450_v52 }
 0x278   : > { %6007 = vtanh.f32 %v2037_v20  ;;  %v1944_v62 = vmul.f32 %v1912_v15, %v7489_v51  ;;  %v6002_v3 = vpop.eup %6001  ;;  %v1771_v28 = vmul.f32 %v1739_v40, %v1515_v9  ;;  %v7512_v7 = vpop.f32.mrb[35].mxu1  ;;  %v1618_v30 = vmul.f32 %v1586_v33, %v1490_v18 }
 0x279   : > { %v1943_v12 = vmul.f32 %v1911_v19, %v7495_v53  ;;  %6009 = vtanh.f32 %v1680_v38  ;;  %v6004_v27 = vpop.eup %6003  ;;  %v1811_v8 = vmul.f32 %v7433_v31, %v1772_v49  ;;  %v1742_v54 = vadd.f32 1.0, %v6002_v3 }
 0x27a   : > { %v1976_v14 = vmul.f32 %v1944_v62, %v7489_v51  ;;  %v1810_v1 = vmul.f32 %v7433_v31, %v1771_v28  ;;  %v1741_v45 = vadd.f32 1.0, %v6004_v27  ;;  %6011 = vtanh.f32 %v1679_v43 }
 0x27b   : > { %v1975_v0 = vmul.f32 %v1943_v12, %v7495_v53  ;;  %v7520_v9 = vadd.f32 %v7442_v32, %v1811_v8  ;;  %v1774_v46 = vmul.f32 %v1742_v54, %v7467_v5  ;;  %v7523_v58 = vpop.f32.mrb[36].mxu1  ;;  %v1650_v20 = vadd.f32 %v1618_v30, %v1490_v18 }
 0x27c   : > { %v2008_v2 = vadd.f32 %v1976_v14, %v7489_v51  ;;  %v7527_v55 = vadd.f32 %v7442_v32, %v1810_v1  ;;  %v1773_v35 = vmul.f32 %v1741_v45, %v1517_v22  ;;  %v7529_v4 = vpop.f32.mrb[37].mxu1  ;;  %v1880_v40 = vmul.f32 0.5, %v7489_v51 }
 0x27d   : > { %v2007_v41 = vadd.f32 %v1975_v0, %v7495_v53  ;;  %v1914_v11 = vmul.f32 0.044715, %v7520_v9  ;;  %v1813_v23 = vmul.f32 %v7433_v31, %v1774_v46  ;;  %v1879_v37 = vmul.f32 0.5, %v7495_v53 }
 0x27e   : > { %v2040_v63 = vmul.f32 0.7978846, %v2008_v2  ;;  %v1913_v21 = vmul.f32 0.044715, %v7527_v55  ;;  %v1812_v50 = vmul.f32 %v7433_v31, %v1773_v35  ;;  %v1682_v43 = vmul.f32 0.7978846, %v1650_v20 }
 0x27f   : > { %v2039_v5 = vmul.f32 0.7978846, %v2007_v41  ;;  %v1946_v22 = vmul.f32 %v1914_v11, %v7520_v9  ;;  %v7541_v57 = vadd.f32 %v7442_v32, %v1813_v23  ;;  %v7545_v60 = vpop.f32.mrb[38].mxu1  ;;  %v1553_v33 = vmul.f32 0.044715, %v7537_v39  ;;  %v6321_v23 = vld [vmem:[%s6798_s29 + $0x68] sm:$0xff] }
 0x280   : > { %6013 = vtanh.f32 %v2040_v63  ;;  %v1945_v38 = vmul.f32 %v1913_v21, %v7527_v55  ;;  %v7549_v56 = vadd.f32 %v7442_v32, %v1812_v50  ;;  %v7551_v15 = vpop.f32.mrb[39].mxu1  ;;  %v6322_v20 = vld [vmem:[%s6798_s29 + $0x60] sm:$0xff] }
 0x281   : > { %v6006_v44 = vpop.eup %6005  ;;  %6015 = vtanh.f32 %v2039_v5  ;;  %v1978_v16 = vmul.f32 %v1946_v22, %v7520_v9  ;;  %v1916_v52 = vmul.f32 0.044715, %v7541_v57  ;;  %v1453_v5 = vadd.f32 %v6321_v23, %v7462_v34 }
 0x282   : > { %v6008_v13 = vpop.eup %6007  ;;  %v2102_v19 = vadd.f32 1.0, %v6006_v44  ;;  %v1977_v3 = vmul.f32 %v1945_v38, %v7527_v55  ;;  %v1915_v12 = vmul.f32 0.044715, %v7549_v56  ;;  %6017 = vtanh.f32 %v1682_v43 }
 0x283   : > { %v6010_v62 = vpop.eup %6009  ;;  %v2101_v49 = vadd.f32 1.0, %v6008_v13  ;;  %v2010_v28 = vadd.f32 %v1978_v16, %v7520_v9  ;;  %v1948_v61 = vmul.f32 %v1916_v52, %v7541_v57  ;;  %v7562_v51 = vpop.f32.mrb[40].mxu1  ;;  %v1452_v13 = vadd.f32 %v6322_v20, %v7469_v10 }
 0x284   : > { %v2134_v18 = vmul.f32 %v2102_v19, %v7485_v25  ;;  %v1744_v27 = vadd.f32 1.0, %v6010_v62  ;;  %v2009_v8 = vadd.f32 %v1977_v3, %v7527_v55  ;;  %v1947_v54 = vmul.f32 %v1915_v12, %v7549_v56  ;;  %v7566_v53 = vpop.f32.mrb[41].mxu1  ;;  %v6012_v0 = vpop.eup %6011 }
 0x285   : > { %v2133_v14 = vmul.f32 %v2101_v49, %v1877_v36  ;;  %v2042_v1 = vmul.f32 0.7978846, %v2010_v28  ;;  %v1980_v25 = vmul.f32 %v1948_v61, %v7541_v57  ;;  %v1743_v41 = vadd.f32 1.0, %v6012_v0 }
 0x286   : > { %2239 = vst.msk [vmem:[#allocation2 + $0x30] sm:$0xff] %vm589_vm0, %v2134_v18  ;;  %v1776_v45 = vmul.f32 %v1744_v27, %v7483_v47  ;;  %v2041_v2 = vmul.f32 0.7978846, %v2009_v8  ;;  %v1979_v46 = vmul.f32 %v1947_v54, %v7549_v56  ;;  %v1585_v36 = vmul.f32 %v1553_v33, %v7537_v39 }
 0x287   : > { %2238 = vst.msk [vmem:[#allocation2 + $0x28] sm:$0xff] %vm589_vm0, %v2133_v14  ;;  %6019 = vtanh.f32 %v2042_v1  ;;  %v2012_v35 = vadd.f32 %v1980_v25, %v7541_v57  ;;  %v7577_v63 = vpop.f32.mrb[42].mxu1  ;;  %v1775_v11 = vmul.f32 %v1743_v41, %v7502_v42  ;;  %v7593_v62 = vadd.f32 %v7395_v59, %v1453_v5  ;;  %v6323_v25 = vld [vmem:[%s6798_s29 + $0x78] sm:$0xff]  ;;  %v6324_v41 = vld [vmem:[%s6798_s29 + $0x70] sm:$0xff] }
 0x288   : > { %v1815_v30 = vmul.f32 %v7433_v31, %v1776_v45  ;;  %6021 = vtanh.f32 %v2041_v2  ;;  %v2011_v47 = vadd.f32 %v1979_v46, %v7549_v56  ;;  %v7583_v21 = vpop.f32.mrb[43].mxu1  ;;  %v1617_v38 = vmul.f32 %v1585_v36, %v7537_v39 }
 0x289   : > { %v2044_v22 = vmul.f32 0.7978846, %v2012_v35  ;;  %v1814_v42 = vmul.f32 %v7433_v31, %v1775_v11  ;;  %v1882_v49 = vmul.f32 0.5, %v7520_v9  ;;  %v1881_v14 = vmul.f32 0.5, %v7527_v55 }
 0x28a   : > { %v6014_v50 = vpop.eup %6013  ;;  %v7586_v44 = vadd.f32 %v7442_v32, %v1815_v30  ;;  %v2043_v52 = vmul.f32 0.7978846, %v2011_v47  ;;  %v1649_v28 = vadd.f32 %v1617_v38, %v7537_v39  ;;  %v1556_v8 = vmul.f32 0.044715, %v7593_v62 }
 0x28b   : > { %v6016_v19 = vpop.eup %6015  ;;  %v2104_v16 = vadd.f32 1.0, %v6014_v50  ;;  %6023 = vtanh.f32 %v2044_v22  ;;  %v7597_v12 = vpop.f32.mrb[44].mxu1  ;;  %v7600_v10 = vadd.f32 %v7442_v32, %v1814_v42  ;;  %v7611_v54 = vmul.f32 0.5, %v7537_v39 }
 0x28c   : > { %v2103_v34 = vadd.f32 1.0, %v6016_v19  ;;  %v1918_v3 = vmul.f32 0.044715, %v7586_v44  ;;  %6025 = vtanh.f32 %v2043_v52  ;;  %v7603_v61 = vpop.f32.mrb[45].mxu1  ;;  %v1681_v43 = vmul.f32 0.7978846, %v1649_v28  ;;  %v6018_v2 = vpop.eup %6017 }
 0x28d   : > { %v2136_v18 = vmul.f32 %v2104_v16, %v1880_v40  ;;  %v1917_v40 = vmul.f32 0.044715, %v7600_v10  ;;  %v7614_v0 = vadd.f32 %v7395_v59, %v1452_v13  ;;  %v1884_v55 = vmul.f32 0.5, %v7541_v57 }
 0x28e   : > { %v2135_v27 = vmul.f32 %v2103_v34, %v1879_v37  ;;  %v1950_v9 = vmul.f32 %v1918_v3, %v7586_v44  ;;  %v1588_v1 = vmul.f32 %v1556_v8, %v7593_v62  ;;  %v1455_v45 = vadd.f32 %v6323_v25, %v7473_v6 }
 0x28f   : > { %2241 = vst.msk [vmem:[#allocation2 + $0x50] sm:$0xff] %vm589_vm0, %v2136_v18  ;;  %v7622_v33 = vpop.f32.mrb[46].mxu1  ;;  %v1949_v39 = vmul.f32 %v1917_v40, %v7600_v10  ;;  %6027 = vtanh.f32 %v1681_v43  ;;  %v1555_v46 = vmul.f32 0.044715, %v7614_v0  ;;  %v1454_v35 = vadd.f32 %v6324_v41, %v7476_v29 }
 0x290   : > { %2240 = vst.msk [vmem:[#allocation2 + $0x48] sm:$0xff] %vm589_vm0, %v2135_v27  ;;  %v1982_v37 = vmul.f32 %v1950_v9, %v7586_v44  ;;  %v7628_v30 = vpop.f32.mrb[47].mxu1  ;;  %v1883_v36 = vmul.f32 0.5, %v7549_v56  ;;  %v1746_v11 = vadd.f32 1.0, %v6018_v2  ;;  %v1620_v6 = vmul.f32 %v1588_v1, %v7593_v62 }
 0x291   : > { %v6020_v57 = vpop.eup %6019  ;;  %v1981_v50 = vmul.f32 %v1949_v39, %v7600_v10  ;;  %v1587_v22 = vmul.f32 %v1555_v46, %v7614_v0  ;;  %v1494_v38 = vadd.f32 %v7395_v59, %v1455_v45  ;;  %v7641_v42 = vadd.f32 %v7395_v59, %v1454_v35  ;;  %v6325_v35 = vld [vmem:[%s6798_s29 + $0x88] sm:$0xff] }
 0x292   : > { %v2014_v47 = vadd.f32 %v1982_v37, %v7586_v44  ;;  %v6022_v23 = vpop.eup %6021  ;;  %v2106_v5 = vadd.f32 1.0, %v6020_v57  ;;  %v1778_v13 = vmul.f32 %v1746_v11, %v7543_v24  ;;  %v1652_v19 = vadd.f32 %v1620_v6, %v7593_v62  ;;  %v6327_v6 = vld [vmem:[%s6798_s29 + $0x98] sm:$0xff] }
 0x293   : > { %v2105_v20 = vadd.f32 1.0, %v6022_v23  ;;  %v2013_v16 = vadd.f32 %v1981_v50, %v7600_v10  ;;  %v1619_v52 = vmul.f32 %v1587_v22, %v7614_v0  ;;  %v1558_v8 = vmul.f32 0.044715, %v1494_v38 }
 0x294   : > { %v2046_v29 = vmul.f32 0.7978846, %v2014_v47  ;;  %v2138_v56 = vmul.f32 %v2106_v5, %v1882_v49  ;;  %v1817_v18 = vmul.f32 %v7433_v31, %v1778_v13  ;;  %v1684_v28 = vmul.f32 0.7978846, %v1652_v19 }
 0x295   : > { %v6024_v34 = vpop.eup %6023  ;;  %v2137_v3 = vmul.f32 %v2105_v20, %v1881_v14  ;;  %v2045_v9 = vmul.f32 0.7978846, %v2013_v16  ;;  %v1651_v49 = vadd.f32 %v1619_v52, %v7614_v0  ;;  %v1886_v43 = vmul.f32 0.5, %v7586_v44 }
 0x296   : > { %6029 = vtanh.f32 %v2046_v29  ;;  %v6026_v27 = vpop.eup %6025  ;;  %2243 = vst.msk [vmem:[#allocation2 + $0x70] sm:$0xff] %vm589_vm0, %v2138_v56  ;;  %v2108_v24 = vadd.f32 1.0, %v6024_v34  ;;  %v7649_v14 = vadd.f32 %v7442_v32, %v1817_v18  ;;  %v1590_v25 = vmul.f32 %v1558_v8, %v1494_v38  ;;  %v6328_v18 = vld [vmem:[%s6798_s29 + $0x90] sm:$0xff] }
 0x297   : > { %2242 = vst.msk [vmem:[#allocation2 + $0x68] sm:$0xff] %vm589_vm0, %v2137_v3  ;;  %v2107_v40 = vadd.f32 1.0, %v6026_v27  ;;  %6031 = vtanh.f32 %v1684_v28  ;;  %v1683_v1 = vmul.f32 0.7978846, %v1651_v49  ;;  %v1524_v39 = vmul.f32 0.5, %v7593_v62 }
 0x298   : > { %v2140_v37 = vmul.f32 %v2108_v24, %v1884_v55  ;;  %6033 = vtanh.f32 %v2045_v9  ;;  %v1920_v2 = vmul.f32 0.044715, %v7649_v14  ;;  %v1557_v46 = vmul.f32 0.044715, %v7641_v42  ;;  %v6326_v55 = vld [vmem:[%s6798_s29 + $0x80] sm:$0xff] }
 0x299   : > { %v2139_v45 = vmul.f32 %v2107_v40, %v1883_v36  ;;  %v6028_v41 = vpop.eup %6027  ;;  %6035 = vtanh.f32 %v1683_v1  ;;  %v1622_v44 = vmul.f32 %v1590_v25, %v1494_v38  ;;  %v1457_v57 = vadd.f32 %v6325_v35, %v7492_v48 }
 0x29a   : > { %2245 = vst.msk [vmem:[#allocation2 + $0x90] sm:$0xff] %vm589_vm0, %v2140_v37  ;;  %v1456_v47 = vadd.f32 %v6326_v55, %v7498_v26  ;;  %v1952_v36 = vmul.f32 %v1920_v2, %v7649_v14  ;;  %v1745_v11 = vadd.f32 1.0, %v6028_v41  ;;  %v1589_v62 = vmul.f32 %v1557_v46, %v7641_v42 }
 0x29b   : > { %2244 = vst.msk [vmem:[#allocation2 + $0x88] sm:$0xff] %vm589_vm0, %v2139_v45  ;;  %v1459_v23 = vadd.f32 %v6327_v6, %v7509_v17  ;;  %v1885_v5 = vmul.f32 0.5, %v7600_v10  ;;  %v1654_v50 = vadd.f32 %v1622_v44, %v1494_v38  ;;  %v7666_v22 = vadd.f32 %v7395_v59, %v1457_v57 }
 0x29c   : > { %v7669_v48 = vadd.f32 %v7395_v59, %v1456_v47  ;;  %v1984_v26 = vmul.f32 %v1952_v36, %v7649_v14  ;;  %v1777_v20 = vmul.f32 %v1745_v11, %v7611_v54  ;;  %v1523_v29 = vmul.f32 0.5, %v7614_v0 }
 0x29d   : > { %v1621_v13 = vmul.f32 %v1589_v62, %v7641_v42  ;;  %v7675_v19 = vmul.f32 0.5, %v1494_v38  ;;  %v1686_v17 = vmul.f32 0.7978846, %v1654_v50  ;;  %v1560_v10 = vmul.f32 0.044715, %v7666_v22 }
 0x29e   : > { %v7679_v56 = vadd.f32 %v7395_v59, %v1459_v23  ;;  %v2016_v52 = vadd.f32 %v1984_v26, %v7649_v14  ;;  %v1816_v34 = vmul.f32 %v7433_v31, %v1777_v20  ;;  %v1559_v54 = vmul.f32 0.044715, %v7669_v48 }
 0x29f   : > { %v1653_v3 = vadd.f32 %v1621_v13, %v7641_v42  ;;  %6037 = vtanh.f32 %v1686_v17  ;;  %v1592_v38 = vmul.f32 %v1560_v10, %v7666_v22  ;;  %v1458_v28 = vadd.f32 %v6328_v18, %v7512_v7 }
 0x2a0   : > { %v6030_v16 = vpop.eup %6029  ;;  %v2048_v24 = vmul.f32 0.7978846, %v2016_v52  ;;  %v7689_v9 = vadd.f32 %v7442_v32, %v1816_v34  ;;  %v1591_v8 = vmul.f32 %v1559_v54, %v7669_v48  ;;  %v1562_v45 = vmul.f32 0.044715, %v7679_v56 }
 0x2a1   : > { %v2110_v0 = vadd.f32 1.0, %v6030_v16  ;;  %v6032_v27 = vpop.eup %6031  ;;  %v1685_v49 = vmul.f32 0.7978846, %v1653_v3  ;;  %v1624_v25 = vmul.f32 %v1592_v38, %v7666_v22  ;;  %v7696_v7 = vmul.f32 0.5, %v7641_v42 }
 0x2a2   : > { %v6034_v40 = vpop.eup %6033  ;;  %v1748_v1 = vadd.f32 1.0, %v6032_v27  ;;  %6039 = vtanh.f32 %v2048_v24  ;;  %v1919_v46 = vmul.f32 0.044715, %v7689_v9  ;;  %v1623_v35 = vmul.f32 %v1591_v8, %v7669_v48 }
 0x2a3   : > { %v2142_v37 = vmul.f32 %v2110_v0, %v1886_v43  ;;  %v2109_v2 = vadd.f32 1.0, %v6034_v40  ;;  %v6036_v41 = vpop.eup %6035  ;;  %6041 = vtanh.f32 %v1685_v49  ;;  %v1656_v43 = vadd.f32 %v1624_v25, %v7666_v22 }
 0x2a4   : > { %v1780_v44 = vmul.f32 %v1748_v1, %v1524_v39  ;;  %v1951_v55 = vmul.f32 %v1919_v46, %v7689_v9  ;;  %v1747_v47 = vadd.f32 1.0, %v6036_v41  ;;  %v1594_v36 = vmul.f32 %v1562_v45, %v7679_v56 }
 0x2a5   : > { %2247 = vst.msk [vmem:[#allocation2 + $0xb0] sm:$0xff] %vm589_vm0, %v2142_v37  ;;  %v2141_v57 = vmul.f32 %v2109_v2, %v1885_v5  ;;  %v1688_v42 = vmul.f32 0.7978846, %v1656_v43  ;;  %v1655_v62 = vadd.f32 %v1623_v35, %v7669_v48  ;;  %v1497_v6 = vadd.f32 %v7395_v59, %v1458_v28  ;;  %v6329_v5 = vld [vmem:[%s6798_s29 + $0xa8] sm:$0xff] }
 0x2a6   : > { %v1819_v11 = vmul.f32 %v7433_v31, %v1780_v44  ;;  %v1983_v39 = vmul.f32 %v1951_v55, %v7689_v9  ;;  %v1779_v23 = vmul.f32 %v1747_v47, %v1523_v29  ;;  %v1626_v50 = vmul.f32 %v1594_v36, %v7679_v56 }
 0x2a7   : > { %2246 = vst.msk [vmem:[#allocation2 + $0xa8] sm:$0xff] %vm589_vm0, %v2141_v57  ;;  %v1461_v26 = vadd.f32 %v6329_v5, %v7523_v58  ;;  %v1888_v20 = vmul.f32 0.5, %v7649_v14  ;;  %6043 = vtanh.f32 %v1688_v42  ;;  %v1687_v17 = vmul.f32 0.7978846, %v1655_v62  ;;  %v6330_v57 = vld [vmem:[%s6798_s29 + $0xa0] sm:$0xff] }
 0x2a8   : > { %v7713_v13 = vadd.f32 %v7442_v32, %v1819_v11  ;;  %v2015_v10 = vadd.f32 %v1983_v39, %v7689_v9  ;;  %v1818_v16 = vmul.f32 %v7433_v31, %v1779_v23  ;;  %v1658_v52 = vadd.f32 %v1626_v50, %v7679_v56 }
 0x2a9   : > { %v1561_v34 = vmul.f32 0.044715, %v1497_v6  ;;  %v6038_v29 = vpop.eup %6037  ;;  %v1528_v54 = vmul.f32 0.5, %v7666_v22  ;;  %6045 = vtanh.f32 %v1687_v17  ;;  %v7721_v58 = vadd.f32 %v7395_v59, %v1461_v26 }
 0x2aa   : > { %v1922_v3 = vmul.f32 0.044715, %v7713_v13  ;;  %v2047_v14 = vmul.f32 0.7978846, %v2015_v10  ;;  %v7724_v0 = vadd.f32 %v7442_v32, %v1818_v16  ;;  %v1750_v38 = vadd.f32 1.0, %v6038_v29  ;;  %v6331_v16 = vld [vmem:[%s6798_s29 + $0xb8] sm:$0xff] }
 0x2ab   : > { %v1690_v18 = vmul.f32 0.7978846, %v1658_v52  ;;  %v1527_v27 = vmul.f32 0.5, %v7669_v48  ;;  %v1593_v24 = vmul.f32 %v1561_v34, %v1497_v6  ;;  %v1564_v49 = vmul.f32 0.044715, %v7721_v58 }
 0x2ac   : > { %v1954_v28 = vmul.f32 %v1922_v3, %v7713_v13  ;;  %v6040_v8 = vpop.eup %6039  ;;  %6047 = vtanh.f32 %v2047_v14  ;;  %v1921_v22 = vmul.f32 0.044715, %v7724_v0  ;;  %v1782_v40 = vmul.f32 %v1750_v38, %v7675_v19 }
 0x2ad   : > { %v7732_v37 = vmul.f32 0.5, %v7679_v56  ;;  %v6042_v1 = vpop.eup %6041  ;;  %v2112_v25 = vadd.f32 1.0, %v6040_v8  ;;  %6049 = vtanh.f32 %v1690_v18  ;;  %v1625_v2 = vmul.f32 %v1593_v24, %v1497_v6 }
 0x2ae   : > { %v1986_v45 = vmul.f32 %v1954_v28, %v7713_v13  ;;  %v1953_v48 = vmul.f32 %v1921_v22, %v7724_v0  ;;  %v1821_v46 = vmul.f32 %v7433_v31, %v1782_v40  ;;  %v1749_v41 = vadd.f32 1.0, %v6042_v1 }
 0x2af   : > { %v1596_v44 = vmul.f32 %v1564_v49, %v7721_v58  ;;  %v2144_v43 = vmul.f32 %v2112_v25, %v1888_v20  ;;  %v1657_v19 = vadd.f32 %v1625_v2, %v1497_v6  ;;  %v1460_v56 = vadd.f32 %v6330_v57, %v7529_v4 }
 0x2b0   : > { %v2018_v35 = vadd.f32 %v1986_v45, %v7713_v13  ;;  %v1985_v55 = vmul.f32 %v1953_v48, %v7724_v0  ;;  %v1860_v47 = vadd.f32 %v7442_v32, %v1821_v46  ;;  %v1781_v36 = vmul.f32 %v1749_v41, %v7696_v7 }
 0x2b1   : > { %v1628_v11 = vmul.f32 %v1596_v44, %v7721_v58  ;;  %v6044_v42 = vpop.eup %6043  ;;  %2249 = vst.msk [vmem:[#allocation2 + $0xd0] sm:$0xff] %vm589_vm0, %v2144_v43  ;;  %v1887_v62 = vmul.f32 0.5, %v7689_v9  ;;  %v1689_v23 = vmul.f32 0.7978846, %v1657_v19  ;;  %v1499_v50 = vadd.f32 %v7395_v59, %v1460_v56 }
 0x2b2   : > { %v2050_v39 = vmul.f32 0.7978846, %v2018_v35  ;;  %v2017_v4 = vadd.f32 %v1985_v55, %v7724_v0  ;;  %v1924_v5 = vmul.f32 0.044715, %v1860_v47  ;;  %v1820_v26 = vmul.f32 %v7433_v31, %v1781_v36 }
 0x2b3   : > { %v7750_v20 = vmul.f32 0.5, %v1497_v6  ;;  %v6046_v7 = vpop.eup %6045  ;;  %v1752_v17 = vadd.f32 1.0, %v6044_v42  ;;  %v1660_v10 = vadd.f32 %v1628_v11, %v7721_v58  ;;  %v1463_v52 = vadd.f32 %v6331_v16, %v7545_v60 }
 0x2b4   : > { %6051 = vtanh.f32 %v2050_v39  ;;  %v2049_v9 = vmul.f32 0.7978846, %v2017_v4  ;;  %v1956_v34 = vmul.f32 %v1924_v5, %v1860_v47  ;;  %v7756_v29 = vadd.f32 %v7442_v32, %v1820_v26 }
 0x2b5   : > { %v1751_v3 = vadd.f32 1.0, %v6046_v7  ;;  %v1784_v14 = vmul.f32 %v1752_v17, %v1528_v54  ;;  %6053 = vtanh.f32 %v1689_v23  ;;  %v1692_v38 = vmul.f32 0.7978846, %v1660_v10 }
 0x2b6   : > { %v1563_v18 = vmul.f32 0.044715, %v1499_v50  ;;  %v6048_v6 = vpop.eup %6047  ;;  %v1890_v28 = vmul.f32 0.5, %v7713_v13  ;;  %6055 = vtanh.f32 %v2049_v9  ;;  %v1988_v24 = vmul.f32 %v1956_v34, %v1860_v47  ;;  %v6332_v9 = vld [vmem:[%s6798_s29 + $0xb0] sm:$0xff] }
 0x2b7   : > { %v1923_v49 = vmul.f32 0.044715, %v7756_v29  ;;  %v6050_v8 = vpop.eup %6049  ;;  %v2111_v22 = vadd.f32 1.0, %v6048_v6  ;;  %v1823_v60 = vmul.f32 %v7433_v31, %v1784_v14  ;;  %v1783_v40 = vmul.f32 %v1751_v3, %v1527_v27 }
 0x2b8   : > { %6057 = vtanh.f32 %v1692_v38  ;;  %v2020_v1 = vadd.f32 %v1988_v24, %v1860_v47  ;;  %v1754_v54 = vadd.f32 1.0, %v6050_v8  ;;  %v1595_v45 = vmul.f32 %v1563_v18, %v1499_v50 }
 0x2b9   : > { %v1955_v25 = vmul.f32 %v1923_v49, %v7756_v29  ;;  %v2143_v2 = vmul.f32 %v2111_v22, %v1887_v62  ;;  %v7763_v48 = vadd.f32 %v7442_v32, %v1823_v60  ;;  %v1822_v13 = vmul.f32 %v7433_v31, %v1783_v40 }
 0x2ba   : > { %v7767_v46 = vadd.f32 %v7395_v59, %v1463_v52  ;;  %v2052_v41 = vmul.f32 0.7978846, %v2020_v1  ;;  %v1786_v27 = vmul.f32 %v1754_v54, %v7732_v37  ;;  %v1627_v43 = vmul.f32 %v1595_v45, %v1499_v50 }
 0x2bb   : > { %v1987_v44 = vmul.f32 %v1955_v25, %v7756_v29  ;;  %2248 = vst.msk [vmem:[#allocation2 + $0xc8] sm:$0xff] %vm589_vm0, %v2143_v2  ;;  %v1889_v35 = vmul.f32 0.5, %v7724_v0  ;;  %v1926_v19 = vmul.f32 0.044715, %v7763_v48  ;;  %v7775_v57 = vadd.f32 %v7442_v32, %v1822_v13  ;;  %v7806_v25 = vld [vmem:[%s9582_s4] ss:$0 sm:$0xff] }
 0x2bc   : > { %v1532_v56 = vmul.f32 0.5, %v7721_v58  ;;  %6059 = vtanh.f32 %v2052_v41  ;;  %v1825_v55 = vmul.f32 %v7433_v31, %v1786_v27  ;;  %v1659_v36 = vadd.f32 %v1627_v43, %v1499_v50 }
 0x2bd   : > { %v2019_v59 = vadd.f32 %v1987_v44, %v7756_v29  ;;  %v1892_v37 = vmul.f32 0.5, %v1860_v47  ;;  %v1958_v42 = vmul.f32 %v1926_v19, %v7763_v48  ;;  %v1925_v0 = vmul.f32 0.044715, %v7775_v57 }
 0x2be   : > { %v6052_v11 = vpop.eup %6051  ;;  %v1566_v62 = vmul.f32 0.044715, %v7767_v46  ;;  %v7784_v4 = vadd.f32 %v7442_v32, %v1825_v55  ;;  %v1691_v58 = vmul.f32 0.7978846, %v1659_v36  ;;  %v7788_v17 = vmul.f32 0.5, %v1499_v50 }
 0x2bf   : > { %v2114_v39 = vadd.f32 1.0, %v6052_v11  ;;  %v2051_v23 = vmul.f32 0.7978846, %v2019_v59  ;;  %v6054_v5 = vpop.eup %6053  ;;  %v1990_v26 = vmul.f32 %v1958_v42, %v7763_v48  ;;  %v1957_v7 = vmul.f32 %v1925_v0, %v7775_v57 }
 0x2c0   : > { %v1598_v47 = vmul.f32 %v1566_v62, %v7767_v46  ;;  %v6056_v10 = vpop.eup %6055  ;;  %v1928_v52 = vmul.f32 0.044715, %v7784_v4  ;;  %v1462_v34 = vadd.f32 %v6332_v9, %v7551_v15  ;;  %v1753_v6 = vadd.f32 1.0, %v6054_v5 }
 0x2c1   : > { %v2146_v16 = vmul.f32 %v2114_v39, %v1890_v28  ;;  %6061 = vtanh.f32 %v2051_v23  ;;  %v2113_v14 = vadd.f32 1.0, %v6056_v10  ;;  %v2022_v38 = vadd.f32 %v1990_v26, %v7763_v48 }
 0x2c2   : > { %v6058_v3 = vpop.eup %6057  ;;  %v1989_v18 = vmul.f32 %v1957_v7, %v7775_v57  ;;  %v1960_v50 = vmul.f32 %v1928_v52, %v7784_v4  ;;  %6063 = vtanh.f32 %v1691_v58  ;;  %v1630_v28 = vmul.f32 %v1598_v47, %v7767_v46  ;;  %v6335_v7 = vld [vmem:[%s6798_s29 + $0xc0] sm:$0xff]  ;;  %v6336_v47 = vld [vmem:[%s6798_s29 + $0xd8] sm:$0xff] }
 0x2c3   : > { %2251 = vst.msk [vmem:[#allocation2 + $0xf0] sm:$0xff] %vm589_vm0, %v2146_v16  ;;  %v1756_v24 = vadd.f32 1.0, %v6058_v3  ;;  %v2145_v49 = vmul.f32 %v2113_v14, %v1889_v35  ;;  %v2054_v8 = vmul.f32 0.7978846, %v2022_v38  ;;  %v1785_v22 = vmul.f32 %v1753_v6, %v7750_v20  ;;  %v6334_v20 = vld [vmem:[%s6798_s29 + $0xc8] sm:$0xff]  ;;  %v6337_v16 = vld [vmem:[%s6798_s29 + $0xd0] sm:$0xff] }
 0x2c4   : > { %v2021_v15 = vadd.f32 %v1989_v18, %v7775_v57  ;;  %v1992_v60 = vmul.f32 %v1960_v50, %v7784_v4  ;;  %v1662_v1 = vadd.f32 %v1630_v28, %v7767_v46  ;;  %v7809_v54 = vadd.f32 %v7806_v25, %v1462_v34 }
 0x2c5   : > { %v1788_v40 = vmul.f32 %v1756_v24, %v1532_v56  ;;  %2250 = vst.msk [vmem:[#allocation2 + $0xe8] sm:$0xff] %vm589_vm0, %v2145_v49  ;;  %6065 = vtanh.f32 %v2054_v8  ;;  %v1824_v2 = vmul.f32 %v7433_v31, %v1785_v22  ;;  %v1465_v13 = vadd.f32 %v6334_v20, %v7562_v51 }
 0x2c6   : > { %v2053_v45 = vmul.f32 0.7978846, %v2021_v15  ;;  %v6060_v41 = vpop.eup %6059  ;;  %v1891_v44 = vmul.f32 0.5, %v7756_v29  ;;  %v2024_v27 = vadd.f32 %v1992_v60, %v7784_v4  ;;  %v1694_v35 = vmul.f32 0.7978846, %v1662_v1 }
 0x2c7   : > { %v1827_v43 = vmul.f32 %v7433_v31, %v1788_v40  ;;  %v2116_v19 = vadd.f32 1.0, %v6060_v41  ;;  %v7819_v56 = vadd.f32 %v7442_v32, %v1824_v2  ;;  %v1565_v59 = vmul.f32 0.044715, %v7809_v54  ;;  %v7863_v60 = vld [vmem:[%s9583_s5] ss:$0 sm:$0xff] }
 0x2c8   : > { %6067 = vtanh.f32 %v2053_v45  ;;  %v2056_v55 = vmul.f32 0.7978846, %v2024_v27  ;;  %v7826_v51 = vadd.f32 %v7806_v25, %v1465_v13  ;;  %v1894_v31 = vmul.f32 0.5, %v7763_v48  ;;  %v7870_v41 = vld [vmem:[%s9584_s6] ss:$0 sm:$0xff] }
 0x2c9   : > { %v7823_v36 = vadd.f32 %v7442_v32, %v1827_v43  ;;  %6069 = vtanh.f32 %v1694_v35  ;;  %v2148_v29 = vmul.f32 %v2116_v19, %v1892_v37  ;;  %v1927_v11 = vmul.f32 0.044715, %v7819_v56 }
 0x2ca   : > { %v1597_v42 = vmul.f32 %v1565_v59, %v7809_v54  ;;  %v1893_v62 = vmul.f32 0.5, %v7775_v57  ;;  %6071 = vtanh.f32 %v2056_v55  ;;  %v1534_v39 = vmul.f32 0.5, %v7767_v46 }
 0x2cb   : > { %v6062_v0 = vpop.eup %6061  ;;  %v1930_v32 = vmul.f32 0.044715, %v7823_v36  ;;  %2253 = vst.msk [vmem:[#allocation2 + $0x110] sm:$0xff] %vm589_vm0, %v2148_v29  ;;  %v1959_v23 = vmul.f32 %v1927_v11, %v7819_v56  ;;  %v1568_v58 = vmul.f32 0.044715, %v7826_v51  ;;  %v1464_v57 = vadd.f32 %v6335_v7, %v7566_v53 }
 0x2cc   : > { %v2115_v37 = vadd.f32 1.0, %v6062_v0  ;;  %v1629_v48 = vmul.f32 %v1597_v42, %v7809_v54  ;;  %v6064_v5 = vpop.eup %6063  ;;  %v1467_v10 = vadd.f32 %v6336_v47, %v7577_v63  ;;  %v1466_v46 = vadd.f32 %v6337_v16, %v7583_v21 }
 0x2cd   : > { %v1962_v26 = vmul.f32 %v1930_v32, %v7823_v36  ;;  %v1991_v9 = vmul.f32 %v1959_v23, %v7819_v56  ;;  %v1755_v34 = vadd.f32 1.0, %v6064_v5  ;;  %v1896_v14 = vmul.f32 0.5, %v7784_v4 }
 0x2ce   : > { %v2147_v52 = vmul.f32 %v2115_v37, %v1891_v44  ;;  %v1661_v3 = vadd.f32 %v1629_v48, %v7809_v54  ;;  %v1600_v18 = vmul.f32 %v1568_v58, %v7826_v51  ;;  %v1503_v53 = vadd.f32 %v7806_v25, %v1464_v57 }
 0x2cf   : > { %v1994_v38 = vmul.f32 %v1962_v26, %v7823_v36  ;;  %v6066_v6 = vpop.eup %6065  ;;  %v2023_v63 = vadd.f32 %v1991_v9, %v7819_v56  ;;  %v1787_v21 = vmul.f32 %v1755_v34, %v7788_v17  ;;  %v1506_v24 = vadd.f32 %v7806_v25, %v1467_v10 }
 0x2d0   : > { %2252 = vst.msk [vmem:[#allocation2 + $0x108] sm:$0xff] %vm589_vm0, %v2147_v52  ;;  %v1693_v50 = vmul.f32 0.7978846, %v1661_v3  ;;  %v2118_v28 = vadd.f32 1.0, %v6066_v6  ;;  %v1632_v4 = vmul.f32 %v1600_v18, %v7826_v51  ;;  %v7858_v8 = vadd.f32 %v7806_v25, %v1466_v46  ;;  %v6341_v46 = vld [vmem:[%s6798_s29 + $0xe0] sm:$0xff] }
 0x2d1   : > { %v2026_v49 = vadd.f32 %v1994_v38, %v7823_v36  ;;  %v2055_v22 = vmul.f32 0.7978846, %v2023_v63  ;;  %v1826_v17 = vmul.f32 %v7863_v60, %v1787_v21  ;;  %v1567_v40 = vmul.f32 0.044715, %v1503_v53 }
 0x2d2   : > { %v6068_v15 = vpop.eup %6067  ;;  %6073 = vtanh.f32 %v1693_v50  ;;  %v2150_v45 = vmul.f32 %v2118_v28, %v1894_v31  ;;  %v1664_v13 = vadd.f32 %v1632_v4, %v7826_v51  ;;  %v1533_v59 = vmul.f32 0.5, %v7809_v54 }
 0x2d3   : > { %v6070_v1 = vpop.eup %6069  ;;  %v2117_v2 = vadd.f32 1.0, %v6068_v15  ;;  %v2058_v20 = vmul.f32 0.7978846, %v2026_v49  ;;  %6075 = vtanh.f32 %v2055_v22  ;;  %v7873_v44 = vadd.f32 %v7870_v41, %v1826_v17 }
 0x2d4   : > { %v1758_v27 = vadd.f32 1.0, %v6070_v1  ;;  %v1599_v43 = vmul.f32 %v1567_v40, %v1503_v53  ;;  %v6072_v35 = vpop.eup %6071  ;;  %2255 = vst.msk [vmem:[#allocation2 + $0x130] sm:$0xff] %vm589_vm0, %v2150_v45  ;;  %v1696_v55 = vmul.f32 0.7978846, %v1664_v13  ;;  %v1895_v31 = vmul.f32 0.5, %v7819_v56  ;;  %v3328_v13 = vld [vmem:[#allocation6] sm:$0xff] }
 0x2d5   : > { %v2149_v19 = vmul.f32 %v2117_v2, %v1893_v62  ;;  %6077 = vtanh.f32 %v2058_v20  ;;  %v2120_v29 = vadd.f32 1.0, %v6072_v35  ;;  %v1929_v11 = vmul.f32 0.044715, %v7873_v44 }
 0x2d6   : > { %v1790_v42 = vmul.f32 %v1758_v27, %v1534_v39  ;;  %v1898_v0 = vmul.f32 0.5, %v7823_v36  ;;  %6079 = vtanh.f32 %v1696_v55  ;;  %v1631_v32 = vmul.f32 %v1599_v43, %v1503_v53  ;;  %v6340_v39 = vld [vmem:[%s6798_s29 + $0xe8] sm:$0xff] }
 0x2d7   : > { %2254 = vst.msk [vmem:[#allocation2 + $0x128] sm:$0xff] %vm589_vm0, %v2149_v19  ;;  %v1570_v37 = vmul.f32 0.044715, %v1506_v24  ;;  %v2152_v23 = vmul.f32 %v2120_v29, %v1896_v14  ;;  %v1961_v62 = vmul.f32 %v1929_v11, %v7873_v44  ;;  %v1569_v48 = vmul.f32 0.044715, %v7858_v8  ;;  %v3329_v27 = vld [vmem:[#allocation6 + $0x8] sm:$0xff] }
 0x2d8   : > { %v1829_v54 = vmul.f32 %v7863_v60, %v1790_v42  ;;  %v1536_v56 = vmul.f32 0.5, %v7826_v51  ;;  %v1663_v58 = vadd.f32 %v1631_v32, %v1503_v53  ;;  %v1469_v26 = vadd.f32 %v6340_v39, %v7597_v12 }
 0x2d9   : > { %v1602_v5 = vmul.f32 %v1570_v37, %v1506_v24  ;;  %2257 = vst.msk [vmem:[#allocation2 + $0x150] sm:$0xff] %vm589_vm0, %v2152_v23  ;;  %v1993_v36 = vmul.f32 %v1961_v62, %v7873_v44  ;;  %v7892_v57 = vmul.f32 0.5, %v1503_v53  ;;  %v1601_v47 = vmul.f32 %v1569_v48, %v7858_v8  ;;  %v6342_v53 = vld [vmem:[%s6798_s29 + $0xf8] sm:$0xff] }
 0x2da   : > { %v7890_v7 = vadd.f32 %v7870_v41, %v1829_v54  ;;  %v1695_v10 = vmul.f32 0.7978846, %v1663_v58  ;;  %v7896_v51 = vadd.f32 %v7806_v25, %v1469_v26  ;;  %v1468_v12 = vadd.f32 %v6341_v46, %v7603_v61  ;;  %v3330_v58 = vld [vmem:[#allocation6 + $0x10] sm:$0xff] }
 0x2db   : > { %v1634_v16 = vmul.f32 %v1602_v5, %v1506_v24  ;;  %v2025_v9 = vadd.f32 %v1993_v36, %v7873_v44  ;;  %v7902_v3 = vmul.f32 0.5, %v1506_v24  ;;  %v1633_v14 = vmul.f32 %v1601_v47, %v7858_v8  ;;  %v3331_v5 = vld [vmem:[#allocation6 + $0x18] sm:$0xff] }
 0x2dc   : > { %v6074_v52 = vpop.eup %6073  ;;  %v1932_v34 = vmul.f32 0.044715, %v7890_v7  ;;  %6081 = vtanh.f32 %v1695_v10  ;;  %v1471_v6 = vadd.f32 %v6342_v53, %v7622_v33  ;;  %v1572_v28 = vmul.f32 0.044715, %v7896_v51 }
 0x2dd   : > { %v1757_v38 = vadd.f32 1.0, %v6074_v52  ;;  %v1666_v18 = vadd.f32 %v1634_v16, %v1506_v24  ;;  %v6076_v63 = vpop.eup %6075  ;;  %v2057_v21 = vmul.f32 0.7978846, %v2025_v9  ;;  %v1665_v61 = vadd.f32 %v1633_v14, %v7858_v8 }
 0x2de   : > { %v1964_v50 = vmul.f32 %v1932_v34, %v7890_v7  ;;  %v2119_v4 = vadd.f32 1.0, %v6076_v63  ;;  %v7911_v17 = vadd.f32 %v7806_v25, %v1468_v12  ;;  %v1604_v20 = vmul.f32 %v1572_v28, %v7896_v51 }
 0x2df   : > { %v6078_v49 = vpop.eup %6077  ;;  %v1789_v15 = vmul.f32 %v1757_v38, %v1533_v59  ;;  %v1698_v22 = vmul.f32 0.7978846, %v1666_v18  ;;  %6083 = vtanh.f32 %v2057_v21  ;;  %v1697_v33 = vmul.f32 0.7978846, %v1665_v61 }
 0x2e0   : > { %v2122_v40 = vadd.f32 1.0, %v6078_v49  ;;  %v1996_v24 = vmul.f32 %v1964_v50, %v7890_v7  ;;  %v6080_v1 = vpop.eup %6079  ;;  %v2151_v45 = vmul.f32 %v2119_v4, %v1895_v31  ;;  %v1636_v55 = vmul.f32 %v1604_v20, %v7896_v51  ;;  %v3332_v4 = vld [vmem:[#allocation6 + $0x20] sm:$0xff] }
 0x2e1   : > { %v1828_v2 = vmul.f32 %v7863_v60, %v1789_v15  ;;  %6085 = vtanh.f32 %v1698_v22  ;;  %v1760_v19 = vadd.f32 1.0, %v6080_v1  ;;  %v1571_v29 = vmul.f32 0.044715, %v7911_v17  ;;  %v3333_v15 = vld [vmem:[#allocation6 + $0x28] sm:$0xff] }
 0x2e2   : > { %v2154_v43 = vmul.f32 %v2122_v40, %v1898_v0  ;;  %v2028_v35 = vadd.f32 %v1996_v24, %v7890_v7  ;;  %6087 = vtanh.f32 %v1697_v33  ;;  %2256 = vst.msk [vmem:[#allocation2 + $0x148] sm:$0xff] %vm589_vm0, %v2151_v45  ;;  %v7924_v31 = vadd.f32 %v7806_v25, %v1471_v6  ;;  %v6343_v0 = vld [vmem:[%s6798_s29 + $0xf0] sm:$0xff]  ;;  %s9652_s29 = sld [smem:[#allocation25_spill]] }
 0x2e3   : > { %v7919_v59 = vadd.f32 %v7870_v41, %v1828_v2  ;;  %v1792_v42 = vmul.f32 %v1760_v19, %v1536_v56  ;;  %v1470_v32 = vadd.f32 %v6343_v0, %v7628_v30  ;;  %v5781_v37 = vpack.c.bf16 %v3329_v27, %v3328_v13 }
 0x2e4   : > { %2259 = vst.msk [vmem:[#allocation2 + $0x170] sm:$0xff] %vm589_vm0, %v2154_v43  ;;  %v2060_v11 = vmul.f32 0.7978846, %v2028_v35  ;;  %v1897_v23 = vmul.f32 0.5, %v7873_v44  ;;  %v1668_v54 = vadd.f32 %v1636_v55, %v7896_v51  ;;  %v1603_v48 = vmul.f32 %v1571_v29, %v7911_v17  ;;  %v3334_v43 = vld [vmem:[#allocation6 + $0x30] sm:$0xff]  ;;  %v3335_v35 = vld [vmem:[#allocation6 + $0x38] sm:$0xff] }
 0x2e5   : > { %v1931_v62 = vmul.f32 0.044715, %v7919_v59  ;;  %v1831_v39 = vmul.f32 %v7863_v60, %v1792_v42  ;;  %v1537_v26 = vmul.f32 0.5, %v7858_v8  ;;  %v1574_v56 = vmul.f32 0.044715, %v7924_v31  ;;  %5782 = vmatprep.subr.bf16.mxu0 %v5781_v37 }
 0x2e6   : > { %6089 = vtanh.f32 %v2060_v11  ;;  %v6082_v30 = vpop.eup %6081  ;;  %v1700_v44 = vmul.f32 0.7978846, %v1668_v54  ;;  %v1635_v47 = vmul.f32 %v1603_v48, %v7911_v17  ;;  %v7939_v10 = vadd.f32 %v7806_v25, %v1470_v32  ;;  %5784 = vmatpush3.bf16.msra.mxu0 %v5781_v37  ;;  %v2270_v48 = vld [vmem:[#allocation2 + $0x7] sm:$0xff] }
 0x2e7   : > { %v1963_v36 = vmul.f32 %v1931_v62, %v7919_v59  ;;  %v7942_v16 = vadd.f32 %v7870_v41, %v1831_v39  ;;  %v1759_v46 = vadd.f32 1.0, %v6082_v30  ;;  %v1606_v12 = vmul.f32 %v1574_v56, %v7924_v31  ;;  %v7986_v30 = vld [vmem:[#allocation2 + $0x27] sm:$0xff] }
 0x2e8   : > { %v5785_v8 = vpack.c.bf16 %v3331_v5, %v3330_v58  ;;  %v1900_v52 = vmul.f32 0.5, %v7890_v7  ;;  %6091 = vtanh.f32 %v1700_v44  ;;  %v1667_v34 = vadd.f32 %v1635_v47, %v7911_v17  ;;  %s9529_s10 = scalar_lea.hbm %s9652_s29, %s5164_s23 }
 0x2e9   : > { %v1995_v9 = vmul.f32 %v1963_v36, %v7919_v59  ;;  %v6084_v14 = vpop.eup %6083  ;;  %v1934_v38 = vmul.f32 0.044715, %v7942_v16  ;;  %v1791_v25 = vmul.f32 %v1759_v46, %v7892_v57  ;;  %v7951_v18 = vmul.f32 0.5, %v7896_v51  ;;  %v7991_v36 = vld [vmem:[%s9585_s7 + $0x4] ss:$0 sm:$0xff] }
 0x2ea   : > { %v1638_v53 = vmul.f32 %v1606_v12, %v7924_v31  ;;  %5786 = vmatprep.subr.bf16.mxu0 %v5785_v8  ;;  %v2121_v63 = vadd.f32 1.0, %v6084_v14  ;;  %v1699_v21 = vmul.f32 0.7978846, %v1667_v34  ;;  %v1573_v50 = vmul.f32 0.044715, %v7939_v10 }
 0x2eb   : > { %v6086_v6 = vpop.eup %6085  ;;  %v2027_v7 = vadd.f32 %v1995_v9, %v7919_v59  ;;  %5788 = vmatpush3.bf16.msra.mxu0 %v5785_v8  ;;  %v1966_v28 = vmul.f32 %v1934_v38, %v7942_v16  ;;  %v1830_v49 = vmul.f32 %v7863_v60, %v1791_v25  ;;  %v5789_v27 = vpack.c.bf16 %v3333_v15, %v3332_v4  ;;  %v8001_v12 = vld [vmem:[%s9585_s7 + $0x8] ss:$0 sm:$0xff] }
 0x2ec   : > { %v6088_v61 = vpop.eup %6087  ;;  %v1762_v57 = vadd.f32 1.0, %v6086_v6  ;;  %v1670_v51 = vadd.f32 %v1638_v53, %v7924_v31  ;;  %v2153_v22 = vmul.f32 %v2121_v63, %v1897_v23  ;;  %6093 = vtanh.f32 %v1699_v21  ;;  %v2515_v53 = vld [vmem:[#allocation2 + $0x8] sm:$0xff] }
 0x2ed   : > { %v2059_v40 = vmul.f32 0.7978846, %v2027_v7  ;;  %v1761_v24 = vadd.f32 1.0, %v6088_v61  ;;  %v1998_v33 = vmul.f32 %v1966_v28, %v7942_v16  ;;  %v7961_v1 = vadd.f32 %v7870_v41, %v1830_v49  ;;  %5790 = vmatprep.subr.bf16.mxu0 %v5789_v27 }
 0x2ee   : > { %v1794_v45 = vmul.f32 %v1762_v57, %v7902_v3  ;;  %v1702_v2 = vmul.f32 0.7978846, %v1670_v51  ;;  %2258 = vst.msk [vmem:[#allocation2 + $0x168] sm:$0xff] %vm589_vm0, %v2153_v22  ;;  %v1605_v13 = vmul.f32 %v1573_v50, %v7939_v10  ;;  %v1539_v42 = vmul.f32 0.5, %v7911_v17  ;;  %v7979_v17 = vld [vmem:[%s9585_s7] ss:$0 sm:$0xff] }
 0x2ef   : > { %6095 = vtanh.f32 %v2059_v40  ;;  %v1793_v20 = vmul.f32 %v1761_v24, %v1537_v26  ;;  %v2030_v55 = vadd.f32 %v1998_v33, %v7942_v16  ;;  %v1933_v29 = vmul.f32 0.044715, %v7961_v1  ;;  %5792 = vmatpush3.bf16.msra.mxu0 %v5789_v27  ;;  %v8020_v50 = vld [vmem:[%s9585_s7 + $0x1] ss:$0 sm:$0xff]  ;;  %v8029_v57 = vld [vmem:[#allocation2 + $0x28] sm:$0xff] }
 0x2f0   : > { %v6090_v19 = vpop.eup %6089  ;;  %v1833_v11 = vmul.f32 %v7863_v60, %v1794_v45  ;;  %6097 = vtanh.f32 %v1702_v2  ;;  %v1637_v32 = vmul.f32 %v1605_v13, %v7939_v10  ;;  %v5793_v54 = vpack.c.bf16 %v3335_v35, %v3334_v43  ;;  %v8040_v2 = vld [vmem:[%s9585_s7 + $0x9] ss:$0 sm:$0xff] }
 0x2f1   : > { %v2124_v3 = vadd.f32 1.0, %v6090_v19  ;;  %v1832_v0 = vmul.f32 %v7863_v60, %v1793_v20  ;;  %v2062_v37 = vmul.f32 0.7978846, %v2030_v55  ;;  %v1965_v23 = vmul.f32 %v1933_v29, %v7961_v1  ;;  %v2758_v19 = vld [vmem:[#allocation2 + $0x9] sm:$0xff]  ;;  %v8051_v55 = vld [vmem:[%s9585_s7 + $0x2] ss:$0 sm:$0xff] }
 0x2f2   : > { %v7974_v62 = vadd.f32 %v7870_v41, %v1833_v11  ;;  %v6092_v58 = vpop.eup %6091  ;;  %v1899_v39 = vmul.f32 0.5, %v7919_v59  ;;  %v1669_v56 = vadd.f32 %v1637_v32, %v7939_v10  ;;  %v1542_v46 = vmul.f32 0.5, %v7924_v31  ;;  %5794 = vmatprep.subr.bf16.mxu0 %v5793_v54  ;;  %v7996_v59 = vld [vmem:[#allocation2 + $0x47] sm:$0xff] }
 0x2f3   : > { %v2156_v5 = vmul.f32 %v2124_v3, %v1900_v52  ;;  %v7983_v26 = vadd.f32 %v7870_v41, %v1832_v0  ;;  %6099 = vtanh.f32 %v2062_v37  ;;  %v1997_v44 = vmul.f32 %v1965_v23, %v7961_v1  ;;  %5796 = vmatpush3.bf16.msra.mxu0 %v5793_v54  ;;  %v8057_v0 = vld [vmem:[%s9585_s7 + $0x6] ss:$0 sm:$0xff] }
 0x2f4   : > { %v1936_v47 = vmul.f32 0.044715, %v7974_v62  ;;  %v1764_v52 = vadd.f32 1.0, %v6092_v58  ;;  %v1701_v9 = vmul.f32 0.7978846, %v1669_v56  ;;  %v2311_v34 = vmul.f32 %v7979_v17, %v2270_v48  ;;  %v8062_v48 = vld [vmem:[#allocation2 + $0x29] sm:$0xff] }
 0x2f5   : > { %2261 = vst.msk [vmem:[#allocation2 + $0x190] sm:$0xff] %vm589_vm0, %v2156_v5  ;;  %v1935_v8 = vmul.f32 0.044715, %v7983_v26  ;;  %v2029_v14 = vadd.f32 %v1997_v44, %v7961_v1  ;;  %v8009_v38 = vmul.f32 0.5, %v7939_v10  ;;  %v2381_v25 = vmul.f32 %v7991_v36, %v7986_v30  ;;  %v8025_v10 = vld [vmem:[%s9585_s7 + $0x5] ss:$0 sm:$0xff] }
 0x2f6   : > { %v1968_v31 = vmul.f32 %v1936_v47, %v7974_v62  ;;  %v6094_v6 = vpop.eup %6093  ;;  %v1796_v7 = vmul.f32 %v1764_v52, %v7951_v18  ;;  %6101 = vtanh.f32 %v1701_v9  ;;  %v2451_v21 = vmul.f32 %v8001_v12, %v7996_v59  ;;  %v2271_v44 = vld [vmem:[#allocation2 + $0xf] sm:$0xff]  ;;  %v8073_v9 = vld [vmem:[%s9585_s7 + $0xa] ss:$0 sm:$0xff] }
 0x2f7   : > { %v1967_v63 = vmul.f32 %v1935_v8, %v7983_v26  ;;  %v1902_v61 = vmul.f32 0.5, %v7942_v16  ;;  %v2061_v28 = vmul.f32 0.7978846, %v2029_v14  ;;  %v1763_v18 = vadd.f32 1.0, %v6094_v6  ;;  %v8035_v16 = vld [vmem:[#allocation2 + $0x48] sm:$0xff] }
 0x2f8   : > { %v2000_v49 = vmul.f32 %v1968_v31, %v7974_v62  ;;  %v1835_v15 = vmul.f32 %v7863_v60, %v1796_v7  ;;  %v2413_v22 = vadd.f32 %v2381_v25, %v2311_v34  ;;  %v2556_v40 = vmul.f32 %v8020_v50, %v2515_v53  ;;  %v8075_v34 = vld [vmem:[#allocation2 + $0x2f] sm:$0xff] }
 0x2f9   : > { %v6096_v51 = vpop.eup %6095  ;;  %v1999_v4 = vmul.f32 %v1967_v63, %v7983_v26  ;;  %6103 = vtanh.f32 %v2061_v28  ;;  %v1795_v45 = vmul.f32 %v1763_v18, %v1539_v42  ;;  %v2625_v35 = vmul.f32 %v8025_v10, %v8029_v57  ;;  %v8080_v25 = vld [vmem:[#allocation2 + $0x49] sm:$0xff] }
 0x2fa   : > { %v2123_v24 = vadd.f32 1.0, %v6096_v51  ;;  %v2032_v33 = vadd.f32 %v2000_v49, %v7974_v62  ;;  %v6098_v20 = vpop.eup %6097  ;;  %v8044_v27 = vadd.f32 %v7870_v41, %v1835_v15  ;;  %v2483_v43 = vadd.f32 %v2451_v21, %v2413_v22  ;;  %v8084_v6 = vld [vmem:[#allocation2 + $0x4f] sm:$0xff] }
 0x2fb   : > { %v2031_v13 = vadd.f32 %v1999_v4, %v7983_v26  ;;  %v1834_v42 = vmul.f32 %v7863_v60, %v1795_v45  ;;  %v1766_v3 = vadd.f32 1.0, %v6098_v20  ;;  %v2694_v54 = vmul.f32 %v8040_v2, %v8035_v16  ;;  %v2516_v18 = vld [vmem:[#allocation2 + $0x10] sm:$0xff] }
 0x2fc   : > { %v2155_v29 = vmul.f32 %v2123_v24, %v1899_v39  ;;  %v2064_v11 = vmul.f32 0.7978846, %v2032_v33  ;;  %v1938_v37 = vmul.f32 0.044715, %v8044_v27  ;;  %v2588_v23 = vadd.f32 %v2556_v40, %v2483_v43 }
 0x2fd   : > { %v2063_v32 = vmul.f32 0.7978846, %v2031_v13  ;;  %v6100_v58 = vpop.eup %6099  ;;  %v8066_v5 = vadd.f32 %v7870_v41, %v1834_v42  ;;  %v1798_v39 = vmul.f32 %v1766_v3, %v1542_v46  ;;  %v2799_v56 = vmul.f32 %v8051_v55, %v2758_v19 }
 0x2fe   : > { %2260 = vst.msk [vmem:[#allocation2 + $0x188] sm:$0xff] %vm589_vm0, %v2155_v29  ;;  %6105 = vtanh.f32 %v2064_v11  ;;  %v2126_v47 = vadd.f32 1.0, %v6100_v58  ;;  %v1970_v8 = vmul.f32 %v1938_v37, %v8044_v27  ;;  %v2657_v52 = vadd.f32 %v2625_v35, %v2588_v23  ;;  %v8111_v23 = vld [vmem:[%s9586_s8] ss:$0 sm:$0xff] }
 0x2ff   : > { %6107 = vtanh.f32 %v2063_v32  ;;  %v1901_v14 = vmul.f32 0.5, %v7961_v1  ;;  %v1937_v31 = vmul.f32 0.044715, %v8066_v5  ;;  %v1837_v46 = vmul.f32 %v7863_v60, %v1798_v39  ;;  %v8113_v39 = vld [vmem:[#allocation2 + $0x30] sm:$0xff] }
 0x300   : > { %v2868_v53 = vmul.f32 %v8057_v0, %v8062_v48  ;;  %v6102_v63 = vpop.eup %6101  ;;  %v2158_v7 = vmul.f32 %v2126_v47, %v1902_v61  ;;  %v2002_v21 = vmul.f32 %v1970_v8, %v8044_v27  ;;  %v2726_v28 = vadd.f32 %v2694_v54, %v2657_v52 }
 0x301   : > { %v2312_v49 = vmul.f32 %v7979_v17, %v2271_v44  ;;  %v1969_v1 = vmul.f32 %v1937_v31, %v8066_v5  ;;  %v8090_v51 = vadd.f32 %v7870_v41, %v1837_v46  ;;  %v1765_v4 = vadd.f32 1.0, %v6102_v63  ;;  %v2759_v63 = vld [vmem:[#allocation2 + $0x11] sm:$0xff] }
 0x302   : > { %v2382_v15 = vmul.f32 %v7991_v36, %v8075_v34  ;;  %2263 = vst.msk [vmem:[#allocation2 + $0x1b0] sm:$0xff] %vm589_vm0, %v2158_v7  ;;  %v2034_v22 = vadd.f32 %v2002_v21, %v8044_v27  ;;  %v2831_v61 = vadd.f32 %v2799_v56, %v2726_v28  ;;  %v2937_v40 = vmul.f32 %v8073_v9, %v8080_v25 }
 0x303   : > { %v2452_v24 = vmul.f32 %v8001_v12, %v8084_v6  ;;  %v6104_v33 = vpop.eup %6103  ;;  %v2001_v45 = vmul.f32 %v1969_v1, %v8066_v5  ;;  %v1940_v20 = vmul.f32 0.044715, %v8090_v51  ;;  %v1797_v13 = vmul.f32 %v1765_v4, %v8009_v38  ;;  %v8128_v1 = vld [vmem:[#allocation2 + $0x67] sm:$0xff] }
 0x304   : > { %v2557_v43 = vmul.f32 %v8020_v50, %v2516_v18  ;;  %v2125_v35 = vadd.f32 1.0, %v6104_v33  ;;  %v2066_v19 = vmul.f32 0.7978846, %v2034_v22  ;;  %v2900_v29 = vadd.f32 %v2868_v53, %v2831_v61  ;;  %v8133_v33 = vld [vmem:[#allocation2 + $0x31] sm:$0xff] }
 0x305   : > { %v2414_v11 = vadd.f32 %v2382_v15, %v2312_v49  ;;  %v1904_v42 = vmul.f32 0.5, %v7974_v62  ;;  %v2033_v3 = vadd.f32 %v2001_v45, %v8066_v5  ;;  %v1972_v32 = vmul.f32 %v1940_v20, %v8090_v51 }
 0x306   : > { %v1836_v37 = vmul.f32 %v7863_v60, %v1797_v13  ;;  %v2157_v38 = vmul.f32 %v2125_v35, %v1901_v14  ;;  %6109 = vtanh.f32 %v2066_v19  ;;  %v2969_v54 = vadd.f32 %v2937_v40, %v2900_v29  ;;  %v8118_v60 = vld [vmem:[#allocation2 + $0x50] sm:$0xff] }
 0x307   : > { %v2484_v58 = vadd.f32 %v2452_v24, %v2414_v11  ;;  %v1903_v62 = vmul.f32 0.5, %v7983_v26  ;;  %v2065_v44 = vmul.f32 0.7978846, %v2033_v3  ;;  %v2004_v47 = vmul.f32 %v1972_v32, %v8090_v51  ;;  %v8138_v13 = vld [vmem:[#allocation2 + $0x51] sm:$0xff] }
 0x308   : > { %v6106_v56 = vpop.eup %6105  ;;  %v1875_v8 = vadd.f32 %v7870_v41, %v1836_v37  ;;  %2262 = vst.msk [vmem:[#allocation2 + $0x1a8] sm:$0xff] %vm589_vm0, %v2157_v38  ;;  %v1906_v14 = vmul.f32 0.5, %v8044_v27  ;;  %v3008_v46 = vadd.f32 %v8111_v23, %v2969_v54  ;;  %v2626_v21 = vmul.f32 %v8025_v10, %v8113_v39  ;;  %v8151_v37 = vld [vmem:[#allocation2 + $0x6f] sm:$0xff] }
 0x309   : > { %v6108_v52 = vpop.eup %6107  ;;  %v2128_v31 = vadd.f32 1.0, %v6106_v56  ;;  %v2589_v53 = vadd.f32 %v2557_v43, %v2484_v58  ;;  %6111 = vtanh.f32 %v2065_v44  ;;  %v2036_v26 = vadd.f32 %v2004_v47, %v8090_v51 }
 0x30a   : > { %v2127_v7 = vadd.f32 1.0, %v6108_v52  ;;  %v1939_v28 = vmul.f32 0.044715, %v1875_v8  ;;  %v3072_v49 = vmul.f32 0.044715, %v3008_v46  ;;  %v2695_v18 = vmul.f32 %v8040_v2, %v8118_v60  ;;  %v8157_v52 = vld [vmem:[#allocation2 + $0x68] sm:$0xff] }
 0x30b   : > { %v2160_v41 = vmul.f32 %v2128_v31, %v1904_v42  ;;  %v2068_v4 = vmul.f32 0.7978846, %v2036_v26  ;;  %v2658_v15 = vadd.f32 %v2626_v21, %v2589_v53  ;;  %v2800_v22 = vmul.f32 %v8051_v55, %v2759_v63 }
 0x30c   : > { %v2159_v27 = vmul.f32 %v2127_v7, %v1903_v62  ;;  %v1905_v61 = vmul.f32 0.5, %v8066_v5  ;;  %v1971_v40 = vmul.f32 %v1939_v28, %v1875_v8  ;;  %v3104_v24 = vmul.f32 %v3072_v49, %v3008_v46  ;;  %v8169_v49 = vld [vmem:[#allocation2 + $0x69] sm:$0xff] }
 0x30d   : > { %2265 = vst.msk [vmem:[#allocation2 + $0x1d0] sm:$0xff] %vm589_vm0, %v2160_v41  ;;  %v2313_v45 = vmul.f32 %v7979_v17, %v7986_v30  ;;  %6113 = vtanh.f32 %v2068_v4  ;;  %v2727_v20 = vadd.f32 %v2695_v18, %v2658_v15  ;;  %v2383_v43 = vmul.f32 %v7991_v36, %v7996_v59 }
 0x30e   : > { %2264 = vst.msk [vmem:[#allocation2 + $0x1c8] sm:$0xff] %vm589_vm0, %v2159_v27  ;;  %v2453_v35 = vmul.f32 %v8001_v12, %v8128_v1  ;;  %v1908_v5 = vmul.f32 0.5, %v8090_v51  ;;  %v8145_v19 = vmul.f32 0.5, %v1875_v8  ;;  %v2003_v29 = vmul.f32 %v1971_v40, %v1875_v8 }
 0x30f   : > { %v3136_v11 = vmul.f32 %v3104_v24, %v3008_v46  ;;  %v8147_v42 = vmul.f32 0.5, %v3008_v46  ;;  %v2832_v30 = vadd.f32 %v2800_v22, %v2727_v20  ;;  %v2869_v3 = vmul.f32 %v8057_v0, %v8133_v33  ;;  %v8179_v24 = vld [vmem:[#allocation2 + $0x70] sm:$0xff]  ;;  %v8183_v20 = vld [vmem:[#allocation2 + $0x87] sm:$0xff] }
 0x310   : > { %v2415_v32 = vadd.f32 %v2383_v43, %v2313_v45  ;;  %v6110_v38 = vpop.eup %6109  ;;  %v2035_v54 = vadd.f32 %v2003_v29, %v1875_v8  ;;  %v2938_v56 = vmul.f32 %v8073_v9, %v8138_v13  ;;  %v2558_v51 = vmul.f32 %v8020_v50, %v8029_v57 }
 0x311   : > { %v3168_v58 = vadd.f32 %v3136_v11, %v3008_v46  ;;  %v2130_v62 = vadd.f32 1.0, %v6110_v38  ;;  %v2901_v44 = vadd.f32 %v2869_v3, %v2832_v30  ;;  %v2314_v31 = vmul.f32 %v7979_v17, %v8075_v34  ;;  %v8191_v3 = vld [vmem:[#allocation2 + $0x71] sm:$0xff] }
 0x312   : > { %v2485_v47 = vadd.f32 %v2453_v35, %v2415_v32  ;;  %v2067_v53 = vmul.f32 0.7978846, %v2035_v54  ;;  %v2384_v8 = vmul.f32 %v7991_v36, %v8084_v6  ;;  %v2454_v46 = vmul.f32 %v8001_v12, %v8151_v37 }
 0x313   : > { %v3200_v63 = vmul.f32 0.7978846, %v3168_v58  ;;  %v6112_v7 = vpop.eup %6111  ;;  %v2162_v26 = vmul.f32 %v2130_v62, %v1906_v14  ;;  %v2970_v21 = vadd.f32 %v2938_v56, %v2901_v44  ;;  %v2627_v41 = vmul.f32 %v8025_v10, %v8035_v16 }
 0x314   : > { %v2590_v57 = vadd.f32 %v2558_v51, %v2485_v47  ;;  %v2129_v28 = vadd.f32 1.0, %v6112_v7  ;;  %6115 = vtanh.f32 %v2067_v53  ;;  %v2696_v34 = vmul.f32 %v8040_v2, %v8157_v52 }
 0x315   : > { %v2416_v18 = vadd.f32 %v2384_v8, %v2314_v31  ;;  %2267 = vst.msk [vmem:[#allocation2 + $0x1f0] sm:$0xff] %vm589_vm0, %v2162_v26  ;;  %6117 = vtanh.f32 %v3200_v63  ;;  %v8173_v27 = vadd.f32 %v8111_v23, %v2970_v21  ;;  %v2801_v4 = vmul.f32 %v8051_v55, %v8062_v48  ;;  %v8204_v31 = vld [vmem:[#allocation2 + $0x88] sm:$0xff] }
 0x316   : > { %v2659_v14 = vadd.f32 %v2627_v41, %v2590_v57  ;;  %v2161_v15 = vmul.f32 %v2129_v28, %v1905_v61  ;;  %v2870_v22 = vmul.f32 %v8057_v0, %v8080_v25  ;;  %v2559_v45 = vmul.f32 %v8020_v50, %v8113_v39 }
 0x317   : > { %v2486_v40 = vadd.f32 %v2454_v46, %v2416_v18  ;;  %v6114_v43 = vpop.eup %6113  ;;  %v3073_v35 = vmul.f32 0.044715, %v8173_v27  ;;  %v2939_v11 = vmul.f32 %v8073_v9, %v8169_v49  ;;  %v2628_v48 = vmul.f32 %v8025_v10, %v8118_v60  ;;  %v8211_v46 = vld [vmem:[#allocation2 + $0x8f] sm:$0xff] }
 0x318   : > { %v2728_v29 = vadd.f32 %v2696_v34, %v2659_v14  ;;  %2266 = vst.msk [vmem:[#allocation2 + $0x1e8] sm:$0xff] %vm589_vm0, %v2161_v15  ;;  %v2132_v61 = vadd.f32 1.0, %v6114_v43  ;;  %v2315_v39 = vmul.f32 %v7979_v17, %v7996_v59  ;;  %v2385_v32 = vmul.f32 %v7991_v36, %v8128_v1 }
 0x319   : > { %v2591_v30 = vadd.f32 %v2559_v45, %v2486_v40  ;;  %v3105_v38 = vmul.f32 %v3073_v35, %v8173_v27  ;;  %v2697_v58 = vmul.f32 %v8040_v2, %v8179_v24  ;;  %v2455_v56 = vmul.f32 %v8001_v12, %v8183_v20 }
 0x31a   : > { %v2833_v54 = vadd.f32 %v2801_v4, %v2728_v29  ;;  %v2164_v51 = vmul.f32 %v2132_v61, %v1908_v5  ;;  %v2802_v44 = vmul.f32 %v8051_v55, %v8133_v33  ;;  %v2417_v47 = vadd.f32 %v2385_v32, %v2315_v39 }
 0x31b   : > { %v2660_v62 = vadd.f32 %v2628_v48, %v2591_v30  ;;  %v3137_v59 = vmul.f32 %v3105_v38, %v8173_v27  ;;  %v2871_v63 = vmul.f32 %v8057_v0, %v8138_v13  ;;  %v2940_v8 = vmul.f32 %v8073_v9, %v8191_v3  ;;  %v8232_v48 = vld [vmem:[#allocation2 + $0x89] sm:$0xff] }
 0x31c   : > { %v2902_v53 = vadd.f32 %v2870_v22, %v2833_v54  ;;  %2269 = vst.msk [vmem:[#allocation2 + $0x210] sm:$0xff] %vm589_vm0, %v2164_v51  ;;  %v2487_v7 = vadd.f32 %v2455_v56, %v2417_v47  ;;  %v2560_v33 = vmul.f32 %v8020_v50, %v8035_v16  ;;  %v2629_v26 = vmul.f32 %v8025_v10, %v8157_v52 }
 0x31d   : > { %v2729_v5 = vadd.f32 %v2697_v58, %v2660_v62  ;;  %v3169_v21 = vadd.f32 %v3137_v59, %v8173_v27  ;;  %v2698_v41 = vmul.f32 %v8040_v2, %v8204_v31  ;;  %v2386_v28 = vmul.f32 %v7991_v36, %v8151_v37  ;;  %v8241_v58 = vld [vmem:[#allocation2 + $0xa7] sm:$0xff]  ;;  %v8249_v62 = vld [vmem:[#allocation2 + $0x90] sm:$0xff] }
 0x31e   : > { %v2971_v57 = vadd.f32 %v2939_v11, %v2902_v53  ;;  %v6116_v34 = vpop.eup %6115  ;;  %v2592_v14 = vadd.f32 %v2560_v33, %v2487_v7  ;;  %v2316_v4 = vmul.f32 %v7979_v17, %v8084_v6  ;;  %v2456_v16 = vmul.f32 %v8001_v12, %v8211_v46 }
 0x31f   : > { %v2834_v18 = vadd.f32 %v2802_v44, %v2729_v5  ;;  %v6118_v15 = vpop.eup %6117  ;;  %v2131_v22 = vadd.f32 1.0, %v6116_v34  ;;  %v3201_v40 = vmul.f32 0.7978846, %v3169_v21  ;;  %v2803_v43 = vmul.f32 %v8051_v55, %v8080_v25  ;;  %v8268_v21 = vld [vmem:[#allocation2 + $0x91] sm:$0xff] }
 0x320   : > { %v8228_v45 = vadd.f32 %v8111_v23, %v2971_v57  ;;  %v3264_v35 = vadd.f32 1.0, %v6118_v15  ;;  %v2661_v11 = vadd.f32 %v2629_v26, %v2592_v14  ;;  %v2418_v61 = vadd.f32 %v2386_v28, %v2316_v4 }
 0x321   : > { %v2903_v29 = vadd.f32 %v2871_v63, %v2834_v18  ;;  %v2163_v6 = vmul.f32 %v2131_v22, %v8145_v19  ;;  %6119 = vtanh.f32 %v3201_v40  ;;  %v2561_v39 = vmul.f32 %v8020_v50, %v8118_v60  ;;  %v8279_v40 = vld [vmem:[#allocation2 + $0xa8] sm:$0xff] }
 0x322   : > { %v3074_v30 = vmul.f32 0.044715, %v8228_v45  ;;  %v8239_v32 = vmul.f32 %v3264_v35, %v8147_v42  ;;  %v2730_v54 = vadd.f32 %v2698_v41, %v2661_v11  ;;  %v2488_v25 = vadd.f32 %v2456_v16, %v2418_v61  ;;  %v8289_v11 = vld [vmem:[#allocation2 + $0xaf] sm:$0xff] }
 0x323   : > { %v2972_v38 = vadd.f32 %v2940_v8, %v2903_v29  ;;  %2268 = vst.msk [vmem:[#allocation2 + $0x208] sm:$0xff] %vm589_vm0, %v2163_v6  ;;  %v2872_v19 = vmul.f32 %v8057_v0, %v8169_v49  ;;  %v2941_v51 = vmul.f32 %v8073_v9, %v8232_v48  ;;  %v2630_v47 = vmul.f32 %v8025_v10, %v8179_v24 }
 0x324   : > { %v3106_v56 = vmul.f32 %v3074_v30, %v8228_v45  ;;  %5541 = vmatprep.mubr.msk.f32.mxu0 %vm589_vm0, %v8239_v32  ;;  %v2835_v42 = vadd.f32 %v2803_v43, %v2730_v54  ;;  %v2593_v44 = vadd.f32 %v2561_v39, %v2488_v25  ;;  %v2317_v53 = vmul.f32 %v7979_v17, %v8128_v1 }
 0x325   : > { %v8254_v60 = vadd.f32 %v8111_v23, %v2972_v38  ;;  %v2387_v63 = vmul.f32 %v7991_v36, %v8183_v20  ;;  %v2457_v8 = vmul.f32 %v8001_v12, %v8241_v58  ;;  %v2699_v26 = vmul.f32 %v8040_v2, %v8249_v62 }
 0x326   : > { %v3138_v59 = vmul.f32 %v3106_v56, %v8228_v45  ;;  %v2904_v7 = vadd.f32 %v2872_v19, %v2835_v42  ;;  %v2662_v33 = vadd.f32 %v2630_v47, %v2593_v44  ;;  %v3041_v57 = vmul.f32 0.5, %v8173_v27 }
 0x327   : > { %v3075_v5 = vmul.f32 0.044715, %v8254_v60  ;;  %v2804_v1 = vmul.f32 %v8051_v55, %v8138_v13  ;;  %v2419_v28 = vadd.f32 %v2387_v63, %v2317_v53  ;;  %v2873_v4 = vmul.f32 %v8057_v0, %v8191_v3 }
 0x328   : > { %v3170_v41 = vadd.f32 %v3138_v59, %v8228_v45  ;;  %v2973_v18 = vadd.f32 %v2941_v51, %v2904_v7  ;;  %v2731_v14 = vadd.f32 %v2699_v26, %v2662_v33  ;;  %v2942_v15 = vmul.f32 %v8073_v9, %v8268_v21 }
 0x329   : > { %v3107_v34 = vmul.f32 %v3075_v5, %v8254_v60  ;;  %v2489_v22 = vadd.f32 %v2457_v8, %v2419_v28  ;;  %v2562_v27 = vmul.f32 %v8020_v50, %v8157_v52  ;;  %v2631_v29 = vmul.f32 %v8025_v10, %v8204_v31  ;;  %v8306_v8 = vld [vmem:[#allocation2 + $0xa9] sm:$0xff] }
 0x32a   : > { %v3202_v16 = vmul.f32 0.7978846, %v3170_v41  ;;  %v8285_v43 = vadd.f32 %v8111_v23, %v2973_v18  ;;  %v2836_v35 = vadd.f32 %v2804_v1, %v2731_v14  ;;  %v2318_v30 = vmul.f32 %v7979_v17, %v8151_v37 }
 0x32b   : > { %v3139_v13 = vmul.f32 %v3107_v34, %v8254_v60  ;;  %v6120_v61 = vpop.eup %6119  ;;  %v2594_v6 = vadd.f32 %v2562_v27, %v2489_v22  ;;  %v2388_v52 = vmul.f32 %v7991_v36, %v8211_v46  ;;  %v2700_v25 = vmul.f32 %v8040_v2, %v8279_v40  ;;  %v8323_v34 = vld [vmem:[#allocation2 + $0xc7] sm:$0xff] }
 0x32c   : > { %6121 = vtanh.f32 %v3202_v16  ;;  %v3265_v39 = vadd.f32 1.0, %v6120_v61  ;;  %v3076_v54 = vmul.f32 0.044715, %v8285_v43  ;;  %v2905_v56 = vadd.f32 %v2873_v4, %v2836_v35 }
 0x32d   : > { %v3171_v38 = vadd.f32 %v3139_v13, %v8254_v60  ;;  %v2663_v19 = vadd.f32 %v2631_v29, %v2594_v6  ;;  %v2420_v51 = vadd.f32 %v2388_v52, %v2318_v30  ;;  %v2458_v42 = vmul.f32 %v8001_v12, %v8289_v11 }
 0x32e   : > { %v8301_v44 = vmul.f32 %v3265_v39, %v3041_v57  ;;  %v3108_v47 = vmul.f32 %v3076_v54, %v8285_v43  ;;  %v2805_v59 = vmul.f32 %v8051_v55, %v8169_v49  ;;  %v2974_v53 = vadd.f32 %v2942_v15, %v2905_v56  ;;  %v8316_v49 = vld [vmem:[#allocation2 + $0xb0] sm:$0xff]  ;;  %v8343_v56 = vld [vmem:[#allocation2 + $0xc8] sm:$0xff] }
 0x32f   : > { %v3203_v37 = vmul.f32 0.7978846, %v3171_v38  ;;  %v2732_v63 = vadd.f32 %v2700_v25, %v2663_v19  ;;  %v2490_v5 = vadd.f32 %v2458_v42, %v2420_v51  ;;  %v2563_v7 = vmul.f32 %v8020_v50, %v8179_v24  ;;  %v8339_v39 = vld [vmem:[#allocation2 + $0xb1] sm:$0xff] }
 0x330   : > { %5542 = vmatmul.mubr.msk.f32.vlgmr.msra.gmra.mrb[16].mxu0 %vm589_vm0, %v8301_v44  ;;  %v3042_v33 = vmul.f32 0.5, %v8228_v45  ;;  %v3140_v26 = vmul.f32 %v3108_v47, %v8285_v43  ;;  %v2874_v57 = vmul.f32 %v8057_v0, %v8232_v48  ;;  %v8319_v41 = vadd.f32 %v8111_v23, %v2974_v53  ;;  %v8351_v47 = vld [vmem:[#allocation2 + $0xcf] sm:$0xff] }
 0x331   : > { %6123 = vtanh.f32 %v3203_v37  ;;  %v2837_v1 = vadd.f32 %v2805_v59, %v2732_v63  ;;  %v2595_v28 = vadd.f32 %v2563_v7, %v2490_v5  ;;  %v2632_v24 = vmul.f32 %v8025_v10, %v8249_v62 }
 0x332   : > { %v3172_v45 = vadd.f32 %v3140_v26, %v8285_v43  ;;  %v2943_v18 = vmul.f32 %v8073_v9, %v8306_v8  ;;  %v2319_v14 = vmul.f32 %v7979_v17, %v8183_v20  ;;  %v2389_v4 = vmul.f32 %v7991_v36, %v8241_v58 }
 0x333   : > { %v3077_v16 = vmul.f32 0.044715, %v8319_v41  ;;  %v2906_v15 = vadd.f32 %v2874_v57, %v2837_v1  ;;  %v2664_v22 = vadd.f32 %v2632_v24, %v2595_v28  ;;  %v2701_v27 = vmul.f32 %v8040_v2, %v8316_v49 }
 0x334   : > { %v3043_v13 = vmul.f32 0.5, %v8254_v60  ;;  %v3204_v35 = vmul.f32 0.7978846, %v3172_v45  ;;  %v2421_v29 = vadd.f32 %v2389_v4, %v2319_v14  ;;  %v2459_v61 = vmul.f32 %v8001_v12, %v8323_v34 }
 0x335   : > { %v3109_v20 = vmul.f32 %v3077_v16, %v8319_v41  ;;  %v2975_v30 = vadd.f32 %v2943_v18, %v2906_v15  ;;  %v2733_v52 = vadd.f32 %v2701_v27, %v2664_v22  ;;  %v2806_v38 = vmul.f32 %v8051_v55, %v8191_v3  ;;  %v8371_v22 = vld [vmem:[#allocation2 + $0xc9] sm:$0xff] }
 0x336   : > { %v6122_v6 = vpop.eup %6121  ;;  %6125 = vtanh.f32 %v3204_v35  ;;  %v2491_v25 = vadd.f32 %v2459_v61, %v2421_v29  ;;  %v2564_v60 = vmul.f32 %v8020_v50, %v8204_v31  ;;  %v2875_v37 = vmul.f32 %v8057_v0, %v8268_v21 }
 0x337   : > { %v3266_v54 = vadd.f32 1.0, %v6122_v6  ;;  %v3141_v19 = vmul.f32 %v3109_v20, %v8319_v41  ;;  %v3014_v51 = vadd.f32 %v8111_v23, %v2975_v30  ;;  %v2838_v42 = vadd.f32 %v2806_v38, %v2733_v52 }
 0x338   : > { %v2944_v3 = vmul.f32 %v8073_v9, %v8339_v39  ;;  %v2596_v53 = vadd.f32 %v2564_v60, %v2491_v25  ;;  %v2633_v63 = vmul.f32 %v8025_v10, %v8279_v40  ;;  %v2702_v26 = vmul.f32 %v8040_v2, %v8343_v56  ;;  %v8392_v25 = vld [vmem:[#allocation2 + $0xe7] sm:$0xff] }
 0x339   : > { %v8353_v59 = vmul.f32 %v3266_v54, %v3042_v33  ;;  %v3173_v31 = vadd.f32 %v3141_v19, %v8319_v41  ;;  %v3078_v5 = vmul.f32 0.044715, %v3014_v51  ;;  %v2907_v7 = vadd.f32 %v2875_v37, %v2838_v42  ;;  %v8390_v54 = vld [vmem:[#allocation2 + $0xd0] sm:$0xff] }
 0x33a   : > { %v2665_v33 = vadd.f32 %v2633_v63, %v2596_v53  ;;  %v2320_v1 = vmul.f32 %v7979_v17, %v8211_v46  ;;  %v2390_v28 = vmul.f32 %v7991_v36, %v8289_v11  ;;  %v2460_v24 = vmul.f32 %v8001_v12, %v8351_v47 }
 0x33b   : > { %v6124_v57 = vpop.eup %6123  ;;  %5544 = vmatprep.mubr.msk.f32.mxu0 %vm589_vm0, %v8353_v59  ;;  %v3205_v18 = vmul.f32 0.7978846, %v3173_v31  ;;  %v3110_v14 = vmul.f32 %v3078_v5, %v3014_v51  ;;  %v2976_v4 = vadd.f32 %v2944_v3, %v2907_v7  ;;  %v3044_v16 = vmul.f32 0.5, %v8285_v43 }
 0x33c   : > { %v3267_v45 = vadd.f32 1.0, %v6124_v57  ;;  %v2734_v15 = vadd.f32 %v2702_v26, %v2665_v33  ;;  %v2807_v27 = vmul.f32 %v8051_v55, %v8232_v48  ;;  %v2422_v35 = vadd.f32 %v2390_v28, %v2320_v1  ;;  %v8408_v33 = vld [vmem:[#allocation2 + $0xd1] sm:$0xff] }
 0x33d   : > { %6127 = vtanh.f32 %v3205_v18  ;;  %v3142_v29 = vmul.f32 %v3110_v14, %v3014_v51  ;;  %v8378_v61 = vadd.f32 %v8111_v23, %v2976_v4  ;;  %v2876_v20 = vmul.f32 %v8057_v0, %v8306_v8 }
 0x33e   : > { %v8375_v46 = vmul.f32 %v3267_v45, %v3043_v13  ;;  %v2839_v6 = vadd.f32 %v2807_v27, %v2734_v15  ;;  %v2492_v30 = vadd.f32 %v2460_v24, %v2422_v35  ;;  %v2565_v43 = vmul.f32 %v8020_v50, %v8249_v62 }
 0x33f   : > { %v3045_v48 = vmul.f32 0.5, %v8319_v41  ;;  %v3174_v13 = vadd.f32 %v3142_v29, %v3014_v51  ;;  %v3079_v52 = vmul.f32 0.044715, %v8378_v61  ;;  %v2945_v38 = vmul.f32 %v8073_v9, %v8371_v22  ;;  %v8427_v29 = vld [vmem:[#allocation2 + $0xe8] sm:$0xff] }
 0x340   : > { %5545 = vmatmul.mubr.msk.f32.gmra.mrb[18].mxu0 %vm589_vm0, %v8375_v46  ;;  %v6126_v60 = vpop.eup %6125  ;;  %v2908_v19 = vadd.f32 %v2876_v20, %v2839_v6  ;;  %v2597_v42 = vadd.f32 %v2565_v43, %v2492_v30  ;;  %v2634_v62 = vmul.f32 %v8025_v10, %v8316_v49  ;;  %v2321_v37 = vmul.f32 %v7979_v17, %v8241_v58 }
 0x341   : > { %v3268_v41 = vadd.f32 1.0, %v6126_v60  ;;  %v3206_v3 = vmul.f32 0.7978846, %v3174_v13  ;;  %v3111_v53 = vmul.f32 %v3079_v52, %v8378_v61  ;;  %v2391_v63 = vmul.f32 %v7991_v36, %v8323_v34 }
 0x342   : > { %v2977_v31 = vadd.f32 %v2945_v38, %v2908_v19  ;;  %v2666_v5 = vadd.f32 %v2634_v62, %v2597_v42  ;;  %v2703_v7 = vmul.f32 %v8040_v2, %v8390_v54  ;;  %v2461_v26 = vmul.f32 %v8001_v12, %v8392_v25 }
 0x343   : > { %v8405_v57 = vmul.f32 %v3268_v41, %v3044_v16  ;;  %6129 = vtanh.f32 %v3206_v3  ;;  %v3143_v58 = vmul.f32 %v3111_v53, %v8378_v61  ;;  %v2423_v1 = vadd.f32 %v2391_v63, %v2321_v37  ;;  %v8440_v37 = vld [vmem:[#allocation2 + $0xe9] sm:$0xff] }
 0x344   : > { %v3046_v28 = vmul.f32 0.5, %v3014_v51  ;;  %v8411_v24 = vadd.f32 %v8111_v23, %v2977_v31  ;;  %v2735_v45 = vadd.f32 %v2703_v7, %v2666_v5  ;;  %v2808_v18 = vmul.f32 %v8051_v55, %v8268_v21  ;;  %v8422_v51 = vld [vmem:[#allocation2 + $0xef] sm:$0xff] }
 0x345   : > { %5547 = vmatprep.mubr.msk.f32.mxu0 %vm589_vm0, %v8405_v57  ;;  %v3175_v14 = vadd.f32 %v3143_v58, %v8378_v61  ;;  %v2877_v4 = vmul.f32 %v8057_v0, %v8339_v39  ;;  %v2493_v16 = vadd.f32 %v2461_v26, %v2423_v1  ;;  %v2566_v15 = vmul.f32 %v8020_v50, %v8279_v40  ;;  %v8449_v26 = vld [vmem:[#allocation2 + $0xf0] sm:$0xff] }
 0x346   : > { %v3080_v27 = vmul.f32 0.044715, %v8411_v24  ;;  %v2840_v35 = vadd.f32 %v2808_v18, %v2735_v45  ;;  %v2946_v21 = vmul.f32 %v8073_v9, %v8408_v33  ;;  %v2635_v6 = vmul.f32 %v8025_v10, %v8343_v56  ;;  %v8463_v18 = vld [vmem:[#allocation2 + $0x107] sm:$0xff] }
 0x347   : > { %v6128_v20 = vpop.eup %6127  ;;  %v3207_v30 = vmul.f32 0.7978846, %v3175_v14  ;;  %v2598_v43 = vadd.f32 %v2566_v15, %v2493_v16  ;;  %v2322_v13 = vmul.f32 %v7979_v17, %v8289_v11  ;;  %v2392_v40 = vmul.f32 %v7991_v36, %v8351_v47 }
 0x348   : > { %v3269_v52 = vadd.f32 1.0, %v6128_v20  ;;  %v3112_v38 = vmul.f32 %v3080_v27, %v8411_v24  ;;  %v2909_v60 = vadd.f32 %v2877_v4, %v2840_v35  ;;  %v2462_v19 = vmul.f32 %v8001_v12, %v8422_v51 }
 0x349   : > { %6131 = vtanh.f32 %v3207_v30  ;;  %v2667_v42 = vadd.f32 %v2635_v6, %v2598_v43  ;;  %v2704_v62 = vmul.f32 %v8040_v2, %v8427_v29  ;;  %v2424_v41 = vadd.f32 %v2392_v40, %v2322_v13  ;;  %v8472_v43 = vld [vmem:[#allocation2 + $0xf1] sm:$0xff] }
 0x34a   : > { %v8442_v3 = vmul.f32 %v3269_v52, %v3045_v48  ;;  %v3144_v11 = vmul.f32 %v3112_v38, %v8411_v24  ;;  %v2978_v53 = vadd.f32 %v2946_v21, %v2909_v60  ;;  %v2809_v63 = vmul.f32 %v8051_v55, %v8306_v8 }
 0x34b   : > { %v2736_v31 = vadd.f32 %v2704_v62, %v2667_v42  ;;  %v2878_v5 = vmul.f32 %v8057_v0, %v8371_v22  ;;  %v2494_v7 = vadd.f32 %v2462_v19, %v2424_v41  ;;  %v2567_v58 = vmul.f32 %v8020_v50, %v8316_v49 }
 0x34c   : > { %5548 = vmatmul.mubr.msk.f32.gmra.mrb[20].mxu0 %vm589_vm0, %v8442_v3  ;;  %v3176_v48 = vadd.f32 %v3144_v11, %v8411_v24  ;;  %v8457_v1 = vadd.f32 %v8111_v23, %v2978_v53  ;;  %v2947_v8 = vmul.f32 %v8073_v9, %v8440_v37  ;;  %v2636_v45 = vmul.f32 %v8025_v10, %v8390_v54 }
 0x34d   : > { %v6130_v14 = vpop.eup %6129  ;;  %v2841_v4 = vadd.f32 %v2809_v63, %v2736_v31  ;;  %v2599_v16 = vadd.f32 %v2567_v58, %v2494_v7  ;;  %v2323_v49 = vmul.f32 %v7979_v17, %v8323_v34  ;;  %v2393_v15 = vmul.f32 %v7991_v36, %v8392_v25  ;;  %v8496_v58 = vld [vmem:[#allocation2 + $0x10f] sm:$0xff] }
 0x34e   : > { %v3270_v27 = vadd.f32 1.0, %v6130_v14  ;;  %v3208_v35 = vmul.f32 0.7978846, %v3176_v48  ;;  %v3081_v21 = vmul.f32 0.044715, %v8457_v1  ;;  %v2705_v6 = vmul.f32 %v8040_v2, %v8449_v26 }
 0x34f   : > { %v2910_v20 = vadd.f32 %v2878_v5, %v2841_v4  ;;  %v2668_v30 = vadd.f32 %v2636_v45, %v2599_v16  ;;  %v2425_v13 = vadd.f32 %v2393_v15, %v2323_v49  ;;  %v2463_v40 = vmul.f32 %v8001_v12, %v8463_v18 }
 0x350   : > { %v8476_v52 = vmul.f32 %v3270_v27, %v3046_v28  ;;  %6133 = vtanh.f32 %v3208_v35  ;;  %v3113_v34 = vmul.f32 %v3081_v21, %v8457_v1  ;;  %v2810_v38 = vmul.f32 %v8051_v55, %v8339_v39  ;;  %v8491_v39 = vld [vmem:[#allocation2 + $0x108] sm:$0xff] }
 0x351   : > { %v2979_v60 = vadd.f32 %v2947_v8, %v2910_v20  ;;  %v2737_v19 = vadd.f32 %v2705_v6, %v2668_v30  ;;  %v2495_v42 = vadd.f32 %v2463_v40, %v2425_v13  ;;  %v2568_v62 = vmul.f32 %v8020_v50, %v8343_v56 }
 0x352   : > { %5550 = vmatprep.mubr.msk.f32.mxu0 %vm589_vm0, %v8476_v52  ;;  %v3047_v41 = vmul.f32 0.5, %v8378_v61  ;;  %v3145_v28 = vmul.f32 %v3113_v34, %v8457_v1  ;;  %v2879_v11 = vmul.f32 %v8057_v0, %v8408_v33  ;;  %v2948_v53 = vmul.f32 %v8073_v9, %v8472_v43 }
 0x353   : > { %v6132_v63 = vpop.eup %6131  ;;  %v3018_v31 = vadd.f32 %v8111_v23, %v2979_v60  ;;  %v2842_v5 = vadd.f32 %v2810_v38, %v2737_v19  ;;  %v2600_v56 = vadd.f32 %v2568_v62, %v2495_v42  ;;  %v2637_v7 = vmul.f32 %v8025_v10, %v8427_v29  ;;  %v8525_v19 = vld [vmem:[#allocation2 + $0x127] sm:$0xff] }
 0x354   : > { %v3271_v61 = vadd.f32 1.0, %v6132_v63  ;;  %v3177_v48 = vadd.f32 %v3145_v28, %v8457_v1  ;;  %v2324_v8 = vmul.f32 %v7979_v17, %v8351_v47  ;;  %v2394_v45 = vmul.f32 %v7991_v36, %v8422_v51  ;;  %v8509_v17 = vld [vmem:[#allocation2 + $0x109] sm:$0xff] }
 0x355   : > { %v3082_v14 = vmul.f32 0.044715, %v3018_v31  ;;  %v2911_v4 = vadd.f32 %v2879_v11, %v2842_v5  ;;  %v2669_v16 = vadd.f32 %v2637_v7, %v2600_v56  ;;  %v2706_v49 = vmul.f32 %v8040_v2, %v8491_v39  ;;  %v8513_v47 = vld [vmem:[#allocation2 + $0x110] sm:$0xff]  ;;  %v8551_v7 = vld [vmem:[%s9585_s7 + $0x8] ss:$0 sm:$0xff] }
 0x356   : > { %v8505_v15 = vmul.f32 %v3271_v61, %v3047_v41  ;;  %v3209_v27 = vmul.f32 0.7978846, %v3177_v48  ;;  %v2426_v35 = vadd.f32 %v2394_v45, %v2324_v8  ;;  %v2464_v21 = vmul.f32 %v8001_v12, %v8496_v58 }
 0x357   : > { %v3114_v6 = vmul.f32 %v3082_v14, %v3018_v31  ;;  %v2980_v20 = vadd.f32 %v2948_v53, %v2911_v4  ;;  %v2738_v30 = vadd.f32 %v2706_v49, %v2669_v16  ;;  %v2811_v36 = vmul.f32 %v8051_v55, %v8371_v22  ;;  %v8537_v53 = vld [vmem:[%s9585_s7] ss:$0 sm:$0xff]  ;;  %v8559_v16 = vld [vmem:[#allocation2 + $0x111] sm:$0xff] }
 0x358   : > { %5551 = vmatmul.mubr.msk.f32.gmra.mrb[22].mxu0 %vm589_vm0, %v8505_v15  ;;  %v3048_v13 = vmul.f32 0.5, %v8411_v24  ;;  %6135 = vtanh.f32 %v3209_v27  ;;  %v2496_v40 = vadd.f32 %v2464_v21, %v2426_v35  ;;  %v2569_v12 = vmul.f32 %v8020_v50, %v8390_v54 }
 0x359   : > { %v3146_v34 = vmul.f32 %v3114_v6, %v3018_v31  ;;  %v8521_v38 = vadd.f32 %v8111_v23, %v2980_v20  ;;  %v2843_v60 = vadd.f32 %v2811_v36, %v2738_v30  ;;  %v2880_v22 = vmul.f32 %v8057_v0, %v8440_v37 }
 0x35a   : > { %v6134_v42 = vpop.eup %6133  ;;  %v2949_v62 = vmul.f32 %v8073_v9, %v8509_v17  ;;  %v2601_v24 = vadd.f32 %v2569_v12, %v2496_v40  ;;  %v2638_v41 = vmul.f32 %v8025_v10, %v8449_v26  ;;  %v2707_v50 = vmul.f32 %v8040_v2, %v8513_v47  ;;  %v8544_v10 = vld [vmem:[%s9585_s7 + $0x4] ss:$0 sm:$0xff] }
 0x35b   : > { %v3272_v54 = vadd.f32 1.0, %v6134_v42  ;;  %v3178_v28 = vadd.f32 %v3146_v34, %v3018_v31  ;;  %v3083_v11 = vmul.f32 0.044715, %v8521_v38  ;;  %v2325_v63 = vmul.f32 %v8537_v53, %v8392_v25  ;;  %v8595_v42 = vld [vmem:[%s9585_s7 + $0x5] ss:$0 sm:$0xff] }
 0x35c   : > { %v2912_v5 = vadd.f32 %v2880_v22, %v2843_v60  ;;  %v2670_v56 = vadd.f32 %v2638_v41, %v2601_v24  ;;  %v2395_v2 = vmul.f32 %v8544_v10, %v8463_v18  ;;  %v2465_v61 = vmul.f32 %v8551_v7, %v8525_v19 }
 0x35d   : > { %v8555_v48 = vmul.f32 %v3272_v54, %v3048_v13  ;;  %v3049_v25 = vmul.f32 0.5, %v8457_v1  ;;  %v3210_v8 = vmul.f32 0.7978846, %v3178_v28  ;;  %v3115_v45 = vmul.f32 %v3083_v11, %v8521_v38  ;;  %v8585_v13 = vld [vmem:[#allocation2 + $0x128] sm:$0xff] }
 0x35e   : > { %v2981_v14 = vadd.f32 %v2949_v62, %v2912_v5  ;;  %v2739_v4 = vadd.f32 %v2707_v50, %v2670_v56  ;;  %v2812_v49 = vmul.f32 %v8051_v55, %v8408_v33  ;;  %v2427_v27 = vadd.f32 %v2395_v2, %v2325_v63  ;;  %v8576_v55 = vld [vmem:[%s9585_s7 + $0x1] ss:$0 sm:$0xff]  ;;  %v8605_v63 = vld [vmem:[%s9585_s7 + $0x9] ss:$0 sm:$0xff] }
 0x35f   : > { %5553 = vmatprep.mubr.msk.f32.mxu0 %vm589_vm0, %v8555_v48  ;;  %v8565_v35 = vmul.f32 0.5, %v3018_v31  ;;  %6137 = vtanh.f32 %v3210_v8  ;;  %v3147_v21 = vmul.f32 %v3115_v45, %v8521_v38  ;;  %v2881_v1 = vmul.f32 %v8057_v0, %v8472_v43  ;;  %v8580_v31 = vld [vmem:[#allocation2 + $0x12f] sm:$0xff] }
 0x360   : > { %v8571_v6 = vadd.f32 %v8111_v23, %v2981_v14  ;;  %v2844_v20 = vadd.f32 %v2812_v49, %v2739_v4  ;;  %v2497_v30 = vadd.f32 %v2465_v61, %v2427_v27  ;;  %v2570_v33 = vmul.f32 %v8576_v55, %v8427_v29  ;;  %v8609_v56 = vld [vmem:[#allocation2 + $0x129] sm:$0xff]  ;;  %v8624_v27 = vld [vmem:[%s9585_s7 + $0x2] ss:$0 sm:$0xff] }
 0x361   : > { %v3179_v36 = vadd.f32 %v3147_v21, %v8521_v38  ;;  %v2950_v0 = vmul.f32 %v8073_v9, %v8559_v16  ;;  %v2326_v40 = vmul.f32 %v8537_v53, %v8422_v51  ;;  %v2396_v12 = vmul.f32 %v8544_v10, %v8496_v58  ;;  %v8613_v8 = vld [vmem:[#allocation2 + $0x130] sm:$0xff]  ;;  %v8628_v21 = vld [vmem:[#allocation2 + $0x147] sm:$0xff] }
 0x362   : > { %v6136_v34 = vpop.eup %6135  ;;  %v3084_v60 = vmul.f32 0.044715, %v8571_v6  ;;  %v2913_v22 = vadd.f32 %v2881_v1, %v2844_v20  ;;  %v2602_v29 = vadd.f32 %v2570_v33, %v2497_v30  ;;  %v2639_v62 = vmul.f32 %v8595_v42, %v8491_v39 }
 0x363   : > { %v3273_v24 = vadd.f32 1.0, %v6136_v34  ;;  %v3211_v41 = vmul.f32 0.7978846, %v3179_v36  ;;  %v2428_v50 = vadd.f32 %v2396_v12, %v2326_v40  ;;  %v2466_v51 = vmul.f32 %v8551_v7, %v8580_v31 }
 0x364   : > { %v3116_v54 = vmul.f32 %v3084_v60, %v8571_v6  ;;  %v2982_v28 = vadd.f32 %v2950_v0, %v2913_v22  ;;  %v2671_v11 = vadd.f32 %v2639_v62, %v2602_v29  ;;  %v2708_v5 = vmul.f32 %v8605_v63, %v8585_v13 }
 0x365   : > { %v8611_v2 = vmul.f32 %v3273_v24, %v3049_v25  ;;  %6139 = vtanh.f32 %v3211_v41  ;;  %v2498_v61 = vadd.f32 %v2466_v51, %v2428_v50  ;;  %v2571_v45 = vmul.f32 %v8576_v55, %v8449_v26  ;;  %v8635_v26 = vld [vmem:[%s9585_s7 + $0x6] ss:$0 sm:$0xff] }
 0x366   : > { %v3148_v14 = vmul.f32 %v3116_v54, %v8571_v6  ;;  %v8619_v4 = vadd.f32 %v8111_v23, %v2982_v28  ;;  %v2740_v49 = vadd.f32 %v2708_v5, %v2671_v11  ;;  %v2813_v25 = vmul.f32 %v8624_v27, %v8440_v37  ;;  %v8655_v54 = vld [vmem:[#allocation2 + $0x131] sm:$0xff] }
 0x367   : > { %5554 = vmatmul.mubr.msk.f32.gmra.mrb[24].mxu0 %vm589_vm0, %v8611_v2  ;;  %v2882_v1 = vmul.f32 %v8635_v26, %v8509_v17  ;;  %v2951_v20 = vmul.f32 %v8073_v9, %v8609_v56  ;;  %v2603_v30 = vadd.f32 %v2571_v45, %v2498_v61  ;;  %v2640_v37 = vmul.f32 %v8595_v42, %v8513_v47 }
 0x368   : > { %v3180_v33 = vadd.f32 %v3148_v14, %v8571_v6  ;;  %v3085_v36 = vmul.f32 0.044715, %v8619_v4  ;;  %v2845_v0 = vadd.f32 %v2813_v25, %v2740_v49  ;;  %v2709_v40 = vmul.f32 %v8605_v63, %v8613_v8 }
 0x369   : > { %v6138_v12 = vpop.eup %6137  ;;  %v2672_v34 = vadd.f32 %v2640_v37, %v2603_v30  ;;  %v2327_v60 = vmul.f32 %v8537_v53, %v8463_v18  ;;  %v2397_v9 = vmul.f32 %v8544_v10, %v8525_v19  ;;  %v2467_v22 = vmul.f32 %v8551_v7, %v8628_v21 }
 0x36a   : > { %v3274_v29 = vadd.f32 1.0, %v6138_v12  ;;  %v3212_v62 = vmul.f32 0.7978846, %v3180_v33  ;;  %v3117_v24 = vmul.f32 %v3085_v36, %v8619_v4  ;;  %v2914_v41 = vadd.f32 %v2882_v1, %v2845_v0  ;;  %v8678_v1 = vld [vmem:[%s9585_s7 + $0xa] ss:$0 sm:$0xff] }
 0x36b   : > { %v3051_v50 = vmul.f32 0.5, %v8521_v38  ;;  %v2741_v51 = vadd.f32 %v2709_v40, %v2672_v34  ;;  %v2814_v28 = vmul.f32 %v8624_v27, %v8472_v43  ;;  %v2429_v18 = vadd.f32 %v2397_v9, %v2327_v60  ;;  %v8665_v38 = vld [vmem:[#allocation2 + $0x148] sm:$0xff] }
 0x36c   : > { %v8660_v11 = vmul.f32 %v3274_v29, %v8565_v35  ;;  %6141 = vtanh.f32 %v3212_v62  ;;  %v3149_v5 = vmul.f32 %v3117_v24, %v8619_v4  ;;  %v2983_v61 = vadd.f32 %v2951_v20, %v2914_v41  ;;  %v8693_v29 = vld [vmem:[#allocation2 + $0x149] sm:$0xff] }
 0x36d   : > { %v2846_v45 = vadd.f32 %v2814_v28, %v2741_v51  ;;  %v2883_v14 = vmul.f32 %v8635_v26, %v8559_v16  ;;  %v2499_v49 = vadd.f32 %v2467_v22, %v2429_v18  ;;  %v2572_v25 = vmul.f32 %v8576_v55, %v8491_v39  ;;  %v8684_v39 = vld [vmem:[#allocation2 + $0x14f] sm:$0xff]  ;;  %v8705_v28 = vld [vmem:[%s9586_s8] ss:$0 sm:$0xff] }
 0x36e   : > { %5556 = vmatprep.mubr.msk.f32.mxu0 %vm589_vm0, %v8660_v11  ;;  %v3181_v43 = vadd.f32 %v3149_v5, %v8619_v4  ;;  %v8673_v35 = vadd.f32 %v8111_v23, %v2983_v61  ;;  %v2952_v20 = vmul.f32 %v8678_v1, %v8655_v54  ;;  %v2641_v30 = vmul.f32 %v8595_v42, %v8585_v13 }
 0x36f   : > { %v6140_v37 = vpop.eup %6139  ;;  %v2915_v33 = vadd.f32 %v2883_v14, %v2846_v45  ;;  %v2604_v36 = vadd.f32 %v2572_v25, %v2499_v49  ;;  %v2328_v23 = vmul.f32 %v8537_v53, %v8496_v58  ;;  %v2398_v0 = vmul.f32 %v8544_v10, %v8580_v31  ;;  %v8710_v45 = vld [vmem:[#allocation2 + $0x150] sm:$0xff] }
 0x370   : > { %v3275_v40 = vadd.f32 1.0, %v6140_v37  ;;  %v3213_v12 = vmul.f32 0.7978846, %v3181_v43  ;;  %v3086_v34 = vmul.f32 0.044715, %v8673_v35  ;;  %v2710_v60 = vmul.f32 %v8605_v63, %v8665_v38  ;;  %v8725_v37 = vld [vmem:[#allocation2 + $0x167] sm:$0xff] }
 0x371   : > { %v2984_v9 = vadd.f32 %v2952_v20, %v2915_v33  ;;  %v2673_v22 = vadd.f32 %v2641_v30, %v2604_v36  ;;  %v2430_v62 = vadd.f32 %v2398_v0, %v2328_v23  ;;  %v2468_v24 = vmul.f32 %v8551_v7, %v8684_v39 }
 0x372   : > { %v8697_v41 = vmul.f32 %v3275_v40, %v3051_v50  ;;  %6143 = vtanh.f32 %v3213_v12  ;;  %v3118_v58 = vmul.f32 %v3086_v34, %v8673_v35  ;;  %v2815_v51 = vmul.f32 %v8624_v27, %v8509_v17 }
 0x373   : > { %v8708_v18 = vadd.f32 %v8705_v28, %v2984_v9  ;;  %v2742_v5 = vadd.f32 %v2710_v60, %v2673_v22  ;;  %v2500_v61 = vadd.f32 %v2468_v24, %v2430_v62  ;;  %v2573_v50 = vmul.f32 %v8576_v55, %v8513_v47 }
 0x374   : > { %5557 = vmatmul.mubr.msk.f32.gmra.mrb[26].mxu0 %vm589_vm0, %v8697_v41  ;;  %v3052_v17 = vmul.f32 0.5, %v8571_v6  ;;  %v3150_v14 = vmul.f32 %v3118_v58, %v8673_v35  ;;  %v2884_v49 = vmul.f32 %v8635_v26, %v8609_v56  ;;  %v2953_v25 = vmul.f32 %v8678_v1, %v8693_v29 }
 0x375   : > { %v3087_v43 = vmul.f32 0.044715, %v8708_v18  ;;  %v2847_v20 = vadd.f32 %v2815_v51, %v2742_v5  ;;  %v2605_v30 = vadd.f32 %v2573_v50, %v2500_v61  ;;  %v2642_v47 = vmul.f32 %v8595_v42, %v8613_v8  ;;  %v8742_v61 = vld [vmem:[#allocation2 + $0x151] sm:$0xff]  ;;  %v8744_v50 = vld [vmem:[#allocation2 + $0x168] sm:$0xff] }
 0x376   : > { %v6142_v33 = vpop.eup %6141  ;;  %v3182_v6 = vadd.f32 %v3150_v14, %v8673_v35  ;;  %v2711_v36 = vmul.f32 %v8605_v63, %v8710_v45  ;;  %v2329_v23 = vmul.f32 %v8537_v53, %v8525_v19  ;;  %v2399_v0 = vmul.f32 %v8544_v10, %v8628_v21 }
 0x377   : > { %v3276_v40 = vadd.f32 1.0, %v6142_v33  ;;  %v3119_v12 = vmul.f32 %v3087_v43, %v8708_v18  ;;  %v2916_v34 = vadd.f32 %v2884_v49, %v2847_v20  ;;  %v2674_v60 = vadd.f32 %v2642_v47, %v2605_v30  ;;  %v8755_v30 = vld [vmem:[#allocation2 + $0x16f] sm:$0xff] }
 0x378   : > { %v3214_v9 = vmul.f32 0.7978846, %v3182_v6  ;;  %v2816_v22 = vmul.f32 %v8624_v27, %v8559_v16  ;;  %v2431_v62 = vadd.f32 %v2399_v0, %v2329_v23  ;;  %v2469_v24 = vmul.f32 %v8551_v7, %v8725_v37 }
 0x379   : > { %v8739_v58 = vmul.f32 %v3276_v40, %v3052_v17  ;;  %v3151_v19 = vmul.f32 %v3119_v12, %v8708_v18  ;;  %v2985_v51 = vadd.f32 %v2953_v25, %v2916_v34  ;;  %v2743_v5 = vadd.f32 %v2711_v36, %v2674_v60  ;;  %v8765_v60 = vld [vmem:[#allocation2 + $0x169] sm:$0xff] }
 0x37a   : > { %v3053_v14 = vmul.f32 0.5, %v8619_v4  ;;  %6145 = vtanh.f32 %v3214_v9  ;;  %v2501_v49 = vadd.f32 %v2469_v24, %v2431_v62  ;;  %v2574_v16 = vmul.f32 %v8576_v55, %v8585_v13 }
 0x37b   : > { %5559 = vmatprep.mubr.msk.f32.mxu0 %vm589_vm0, %v8739_v58  ;;  %v3183_v17 = vadd.f32 %v3151_v19, %v8708_v18  ;;  %v3024_v43 = vadd.f32 %v8705_v28, %v2985_v51  ;;  %v2848_v25 = vadd.f32 %v2816_v22, %v2743_v5  ;;  %v2885_v20 = vmul.f32 %v8635_v26, %v8655_v54 }
 0x37c   : > { %v6144_v47 = vpop.eup %6143  ;;  %v2954_v4 = vmul.f32 %v8678_v1, %v8742_v61  ;;  %v2606_v33 = vadd.f32 %v2574_v16, %v2501_v49  ;;  %v2643_v13 = vmul.f32 %v8595_v42, %v8665_v38  ;;  %v2712_v6 = vmul.f32 %v8605_v63, %v8744_v50  ;;  %v8776_v16 = vld [vmem:[#allocation2 + $0x187] sm:$0xff] }
 0x37d   : > { %v3277_v36 = vadd.f32 1.0, %v6144_v47  ;;  %v3215_v23 = vmul.f32 0.7978846, %v3183_v17  ;;  %v3088_v0 = vmul.f32 0.044715, %v3024_v43  ;;  %v2330_v40 = vmul.f32 %v8537_v53, %v8580_v31 }
 0x37e   : > { %v2917_v12 = vadd.f32 %v2885_v20, %v2848_v25  ;;  %v2675_v34 = vadd.f32 %v2643_v13, %v2606_v33  ;;  %v2400_v9 = vmul.f32 %v8544_v10, %v8684_v39  ;;  %v2470_v22 = vmul.f32 %v8551_v7, %v8755_v30  ;;  %v8790_v13 = vld [vmem:[#allocation2 + $0x170] sm:$0xff] }
 0x37f   : > { %v8771_v62 = vmul.f32 %v3277_v36, %v3053_v14  ;;  %v3054_v24 = vmul.f32 0.5, %v8673_v35  ;;  %6147 = vtanh.f32 %v3215_v23  ;;  %v3120_v19 = vmul.f32 %v3088_v0, %v3024_v43 }
 0x380   : > { %v2986_v51 = vadd.f32 %v2954_v4, %v2917_v12  ;;  %v2744_v5 = vadd.f32 %v2712_v6, %v2675_v34  ;;  %v2817_v31 = vmul.f32 %v8624_v27, %v8609_v56  ;;  %v2432_v49 = vadd.f32 %v2400_v9, %v2330_v40 }
 0x381   : > { %5560 = vmatmul.mubr.msk.f32.gmra.mrb[28].mxu0 %vm589_vm0, %v8771_v62  ;;  %v3055_v17 = vmul.f32 0.5, %v8708_v18  ;;  %v3152_v25 = vmul.f32 %v3120_v19, %v3024_v43  ;;  %v2886_v14 = vmul.f32 %v8635_v26, %v8693_v29  ;;  %v2955_v35 = vmul.f32 %v8678_v1, %v8765_v60 }
 0x382   : > { %v8786_v20 = vadd.f32 %v8705_v28, %v2986_v51  ;;  %v2849_v47 = vadd.f32 %v2817_v31, %v2744_v5  ;;  %v2502_v56 = vadd.f32 %v2470_v22, %v2432_v49  ;;  %v2575_v4 = vmul.f32 %v8576_v55, %v8613_v8  ;;  %v8806_v49 = vld [vmem:[#allocation2 + $0x188] sm:$0xff] }
 0x383   : > { %v3184_v33 = vadd.f32 %v3152_v25, %v3024_v43  ;;  %v2331_v18 = vmul.f32 %v8537_v53, %v8628_v21  ;;  %v2401_v6 = vmul.f32 %v8544_v10, %v8725_v37  ;;  %v2471_v36 = vmul.f32 %v8551_v7, %v8776_v16 }
 0x384   : > { %v6146_v23 = vpop.eup %6145  ;;  %v3089_v0 = vmul.f32 0.044715, %v8786_v20  ;;  %v2918_v40 = vadd.f32 %v2886_v14, %v2849_v47  ;;  %v2607_v12 = vadd.f32 %v2575_v4, %v2502_v56  ;;  %v2644_v8 = vmul.f32 %v8595_v42, %v8710_v45 }
 0x385   : > { %v3278_v34 = vadd.f32 1.0, %v6146_v23  ;;  %v8801_v9 = vmul.f32 0.5, %v3024_v43  ;;  %v3216_v22 = vmul.f32 0.7978846, %v3184_v33  ;;  %v2433_v19 = vadd.f32 %v2401_v6, %v2331_v18  ;;  %v8818_v33 = vld [vmem:[#allocation2 + $0x18f] sm:$0xff] }
 0x386   : > { %v3121_v21 = vmul.f32 %v3089_v0, %v8786_v20  ;;  %v2987_v51 = vadd.f32 %v2955_v35, %v2918_v40  ;;  %v2676_v5 = vadd.f32 %v2644_v8, %v2607_v12  ;;  %v2713_v31 = vmul.f32 %v8605_v63, %v8790_v13 }
 0x387   : > { %v8808_v25 = vmul.f32 %v3278_v34, %v3054_v24  ;;  %6149 = vtanh.f32 %v3216_v22  ;;  %v2503_v14 = vadd.f32 %v2471_v36, %v2433_v19  ;;  %v2576_v47 = vmul.f32 %v8576_v55, %v8665_v38  ;;  %v8822_v24 = vld [vmem:[#allocation2 + $0x171] sm:$0xff]  ;;  %v8834_v22 = vld [vmem:[#allocation2 + $0x189] sm:$0xff] }
 0x388   : > { %v3153_v43 = vmul.f32 %v3121_v21, %v8786_v20  ;;  %v8814_v56 = vadd.f32 %v8705_v28, %v2987_v51  ;;  %v2745_v4 = vadd.f32 %v2713_v31, %v2676_v5  ;;  %v2818_v35 = vmul.f32 %v8624_v27, %v8655_v54 }
 0x389   : > { %9636 = vst [vmem:[#allocation16_spill] sm:$0xff] %v8808_v25  ;;  %v6148_v18 = vpop.eup %6147  ;;  %5562 = vmatprep.mubr.msk.f32.mxu0 %vm589_vm0, %v8808_v25  ;;  %v2887_v38 = vmul.f32 %v8635_v26, %v8742_v61  ;;  %v2608_v6 = vadd.f32 %v2576_v47, %v2503_v14  ;;  %v2645_v36 = vmul.f32 %v8595_v42, %v8744_v50  ;;  %v8876_v25 = vld [vmem:[#allocation2 + $0x191] sm:$0xff] }
 0x38a   : > { %v2714_v23 = vmul.f32 %v8605_v63, %v8806_v49  ;;  %v3279_v0 = vadd.f32 1.0, %v6148_v18  ;;  %v3185_v54 = vadd.f32 %v3153_v43, %v8786_v20  ;;  %v3090_v40 = vmul.f32 0.044715, %v8814_v56 }
 0x38b   : > { %v2332_v12 = vmul.f32 %v8537_v53, %v8684_v39  ;;  %v2850_v8 = vadd.f32 %v2818_v35, %v2745_v4  ;;  %v2677_v34 = vadd.f32 %v2645_v36, %v2608_v6  ;;  %v2402_v19 = vmul.f32 %v8544_v10, %v8755_v30  ;;  %v8854_v6 = vld [vmem:[#allocation2 + $0x1a7] sm:$0xff] }
 0x38c   : > { %v2472_v21 = vmul.f32 %v8551_v7, %v8818_v33  ;;  %v8840_v51 = vmul.f32 %v3279_v0, %v3055_v17  ;;  %v3217_v5 = vmul.f32 0.7978846, %v3185_v54  ;;  %v3122_v31 = vmul.f32 %v3090_v40, %v8814_v56  ;;  %v8859_v54 = vld [vmem:[#allocation2 + $0x190] sm:$0xff] }
 0x38d   : > { %v2956_v14 = vmul.f32 %v8678_v1, %v8822_v24  ;;  %v2919_v47 = vadd.f32 %v2887_v38, %v2850_v8  ;;  %v2746_v39 = vadd.f32 %v2714_v23, %v2677_v34  ;;  %v2819_v43 = vmul.f32 %v8624_v27, %v8693_v29 }
 0x38e   : > { %9637 = vst [vmem:[#allocation17_spill] sm:$0xff] %v8840_v51  ;;  %v2434_v4 = vadd.f32 %v2402_v19, %v2332_v12  ;;  %5563 = vmatmul.mubr.msk.f32.gmra.mrb[30].mxu0 %vm589_vm0, %v8840_v51  ;;  %6151 = vtanh.f32 %v3217_v5  ;;  %v3154_v35 = vmul.f32 %v3122_v31, %v8814_v56  ;;  %v2888_v17 = vmul.f32 %v8635_v26, %v8765_v60  ;;  %v8921_v51 = vld [vmem:[#allocation2 + $0x1b0] sm:$0xff] }
 0x38f   : > { %v2957_v18 = vmul.f32 %v8678_v1, %v8834_v22  ;;  %v2988_v38 = vadd.f32 %v2956_v14, %v2919_v47  ;;  %v2851_v36 = vadd.f32 %v2819_v43, %v2746_v39  ;;  %v2577_v29 = vmul.f32 %v8576_v55, %v8710_v45 }
 0x390   : > { %v2504_v23 = vadd.f32 %v2472_v21, %v2434_v4  ;;  %v3186_v0 = vadd.f32 %v3154_v35, %v8814_v56  ;;  %v2646_v40 = vmul.f32 %v8595_v42, %v8790_v13  ;;  %v2333_v12 = vmul.f32 %v8537_v53, %v8725_v37 }
 0x391   : > { %v2403_v8 = vmul.f32 %v8544_v10, %v8776_v16  ;;  %v6150_v34 = vpop.eup %6149  ;;  %v8868_v19 = vadd.f32 %v8705_v28, %v2988_v38  ;;  %v2920_v21 = vadd.f32 %v2888_v17, %v2851_v36  ;;  %v2473_v45 = vmul.f32 %v8551_v7, %v8854_v6  ;;  %v8881_v36 = vld [vmem:[#allocation2 + $0x1a8] sm:$0xff] }
 0x392   : > { %v2609_v5 = vadd.f32 %v2577_v29, %v2504_v23  ;;  %v3280_v31 = vadd.f32 1.0, %v6150_v34  ;;  %v3057_v14 = vmul.f32 0.5, %v8786_v20  ;;  %v3218_v47 = vmul.f32 0.7978846, %v3186_v0 }
 0x393   : > { %v2435_v39 = vadd.f32 %v2403_v8, %v2333_v12  ;;  %v3091_v43 = vmul.f32 0.044715, %v8868_v19  ;;  %v2989_v37 = vadd.f32 %v2957_v18, %v2920_v21  ;;  %v2715_v35 = vmul.f32 %v8605_v63, %v8859_v54 }
 0x394   : > { %v2678_v4 = vadd.f32 %v2646_v40, %v2609_v5  ;;  %v8879_v17 = vmul.f32 %v3280_v31, %v8801_v9  ;;  %6153 = vtanh.f32 %v3218_v47  ;;  %v2578_v20 = vmul.f32 %v8576_v55, %v8744_v50  ;;  %v8891_v40 = vld [vmem:[#allocation2 + $0x1af] sm:$0xff] }
 0x395   : > { %v2505_v38 = vadd.f32 %v2473_v45, %v2435_v39  ;;  %v3123_v23 = vmul.f32 %v3091_v43, %v8868_v19  ;;  %v8887_v18 = vadd.f32 %v8705_v28, %v2989_v37  ;;  %v2820_v0 = vmul.f32 %v8624_v27, %v8742_v61 }
 0x396   : > { %9638 = vst [vmem:[#allocation15_spill] sm:$0xff] %v8879_v17  ;;  %v2747_v29 = vadd.f32 %v2715_v35, %v2678_v4  ;;  %5565 = vmatprep.mubr.msk.f32.mxu0 %vm589_vm0, %v8879_v17  ;;  %v2889_v9 = vmul.f32 %v8635_v26, %v8822_v24  ;;  %v2958_v50 = vmul.f32 %v8678_v1, %v8876_v25 }
 0x397   : > { %v2610_v12 = vadd.f32 %v2578_v20, %v2505_v38  ;;  %v2647_v8 = vmul.f32 %v8595_v42, %v8806_v49  ;;  %v3155_v34 = vmul.f32 %v3123_v23, %v8868_v19  ;;  %v3092_v21 = vmul.f32 0.044715, %v8887_v18 }
 0x398   : > { %v2852_v61 = vadd.f32 %v2820_v0, %v2747_v29  ;;  %v2716_v5 = vmul.f32 %v8605_v63, %v8881_v36  ;;  %v6152_v45 = vpop.eup %6151  ;;  %v2334_v47 = vmul.f32 %v8537_v53, %v8755_v30  ;;  %v2404_v39 = vmul.f32 %v8544_v10, %v8818_v33  ;;  %v8914_v29 = vld [vmem:[#allocation2 + $0x1a9] sm:$0xff] }
 0x399   : > { %v2679_v31 = vadd.f32 %v2647_v8, %v2610_v12  ;;  %v2474_v43 = vmul.f32 %v8551_v7, %v8891_v40  ;;  %v3281_v37 = vadd.f32 1.0, %v6152_v45  ;;  %v3187_v4 = vadd.f32 %v3155_v34, %v8868_v19 }
 0x39a   : > { %v3124_v35 = vmul.f32 %v3092_v21, %v8887_v18  ;;  %v2921_v38 = vadd.f32 %v2889_v9, %v2852_v61  ;;  %v3058_v20 = vmul.f32 0.5, %v8814_v56  ;;  %v2821_v30 = vmul.f32 %v8624_v27, %v8765_v60  ;;  %v8933_v61 = vld [vmem:[#allocation2 + $0x1c7] sm:$0xff] }
 0x39b   : > { %v2748_v23 = vadd.f32 %v2716_v5, %v2679_v31  ;;  %v2436_v0 = vadd.f32 %v2404_v39, %v2334_v47  ;;  %v8918_v12 = vmul.f32 %v3281_v37, %v3057_v14  ;;  %v3219_v8 = vmul.f32 0.7978846, %v3187_v4 }
 0x39c   : > { %v3156_v17 = vmul.f32 %v3124_v35, %v8887_v18  ;;  %v2990_v45 = vadd.f32 %v2958_v50, %v2921_v38  ;;  %v2890_v9 = vmul.f32 %v8635_v26, %v8834_v22  ;;  %v2579_v21 = vmul.f32 %v8576_v55, %v8790_v13 }
 0x39d   : > { %9639 = vst [vmem:[#allocation18_spill] sm:$0xff] %v8918_v12  ;;  %v2853_v34 = vadd.f32 %v2821_v30, %v2748_v23  ;;  %v2506_v56 = vadd.f32 %v2474_v43, %v2436_v0  ;;  %5566 = vmatmul.mubr.msk.f32.gmra.mrb[32].mxu0 %vm589_vm0, %v8918_v12  ;;  %6155 = vtanh.f32 %v3219_v8  ;;  %v2959_v50 = vmul.f32 %v8678_v1, %v8914_v29  ;;  %v8941_v23 = vld [vmem:[#allocation2 + $0x1b1] sm:$0xff] }
 0x39e   : > { %v3188_v60 = vadd.f32 %v3156_v17, %v8887_v18  ;;  %v3029_v14 = vadd.f32 %v8705_v28, %v2990_v45  ;;  %v6154_v5 = vpop.eup %6153  ;;  %v2648_v39 = vmul.f32 %v8595_v42, %v8859_v54  ;;  %v2717_v13 = vmul.f32 %v8605_v63, %v8921_v51  ;;  %v8983_v12 = vld [vmem:[#allocation2 + $0x1d0] sm:$0xff] }
 0x39f   : > { %v2922_v31 = vadd.f32 %v2890_v9, %v2853_v34  ;;  %v2611_v47 = vadd.f32 %v2579_v21, %v2506_v56  ;;  %v3282_v43 = vadd.f32 1.0, %v6154_v5  ;;  %v2335_v17 = vmul.f32 %v8537_v53, %v8776_v16  ;;  %v8962_v5 = vld [vmem:[#allocation2 + $0x1cf] sm:$0xff] }
 0x3a0   : > { %v3220_v37 = vmul.f32 0.7978846, %v3188_v60  ;;  %v3093_v4 = vmul.f32 0.044715, %v3029_v14  ;;  %v2405_v30 = vmul.f32 %v8544_v10, %v8854_v6  ;;  %v2475_v0 = vmul.f32 %v8551_v7, %v8933_v61 }
 0x3a1   : > { %v2991_v35 = vadd.f32 %v2959_v50, %v2922_v31  ;;  %v2680_v38 = vadd.f32 %v2648_v39, %v2611_v47  ;;  %v8947_v8 = vmul.f32 %v3282_v43, %v3058_v20  ;;  %v3059_v45 = vmul.f32 0.5, %v8868_v19 }
 0x3a2   : > { %6157 = vtanh.f32 %v3220_v37  ;;  %v3125_v34 = vmul.f32 %v3093_v4, %v3029_v14  ;;  %v2822_v56 = vmul.f32 %v8624_v27, %v8822_v24  ;;  %v2437_v21 = vadd.f32 %v2405_v30, %v2335_v17  ;;  %v8965_v24 = vld [vmem:[#allocation2 + $0x1c8] sm:$0xff] }
 0x3a3   : > { %9640 = vst [vmem:[#allocation19_spill] sm:$0xff] %v8947_v8  ;;  %v8951_v9 = vadd.f32 %v8705_v28, %v2991_v35  ;;  %v2749_v16 = vadd.f32 %v2717_v13, %v2680_v38  ;;  %5568 = vmatprep.mubr.msk.f32.mxu0 %vm589_vm0, %v8947_v8  ;;  %v3060_v60 = vmul.f32 0.5, %v8887_v18  ;;  %v2891_v20 = vmul.f32 %v8635_v26, %v8876_v25 }
 0x3a4   : > { %v3157_v50 = vmul.f32 %v3125_v34, %v3029_v14  ;;  %v2960_v19 = vmul.f32 %v8678_v1, %v8941_v23  ;;  %v2507_v39 = vadd.f32 %v2475_v0, %v2437_v21  ;;  %v2580_v13 = vmul.f32 %v8576_v55, %v8806_v49 }
 0x3a5   : > { %v3094_v31 = vmul.f32 0.044715, %v8951_v9  ;;  %v2854_v47 = vadd.f32 %v2822_v56, %v2749_v16  ;;  %v2649_v18 = vmul.f32 %v8595_v42, %v8881_v36  ;;  %v2336_v37 = vmul.f32 %v8537_v53, %v8818_v33 }
 0x3a6   : > { %v3189_v43 = vadd.f32 %v3157_v50, %v3029_v14  ;;  %v2406_v4 = vmul.f32 %v8544_v10, %v8891_v40  ;;  %v2612_v38 = vadd.f32 %v2580_v13, %v2507_v39  ;;  %v2476_v30 = vmul.f32 %v8551_v7, %v8962_v5 }
 0x3a7   : > { %v3126_v17 = vmul.f32 %v3094_v31, %v8951_v9  ;;  %v2923_v35 = vadd.f32 %v2891_v20, %v2854_v47  ;;  %v6156_v0 = vpop.eup %6155  ;;  %v8978_v34 = vmul.f32 0.5, %v3029_v14  ;;  %v2718_v16 = vmul.f32 %v8605_v63, %v8965_v24 }
 0x3a8   : > { %v3221_v49 = vmul.f32 0.7978846, %v3189_v43  ;;  %v2438_v56 = vadd.f32 %v2406_v4, %v2336_v37  ;;  %v3283_v21 = vadd.f32 1.0, %v6156_v0  ;;  %v2681_v8 = vadd.f32 %v2649_v18, %v2612_v38  ;;  %v8993_v37 = vld [vmem:[#allocation2 + $0x1e7] sm:$0xff] }
 0x3a9   : > { %v3158_v33 = vmul.f32 %v3126_v17, %v8951_v9  ;;  %v2992_v50 = vadd.f32 %v2960_v19, %v2923_v35  ;;  %v2823_v20 = vmul.f32 %v8624_v27, %v8834_v22  ;;  %v2581_v14 = vmul.f32 %v8576_v55, %v8859_v54  ;;  %v8995_v18 = vld [vmem:[#allocation2 + $0x1c9] sm:$0xff] }
 0x3aa   : > { %6159 = vtanh.f32 %v3221_v49  ;;  %v2508_v31 = vadd.f32 %v2476_v30, %v2438_v56  ;;  %v8989_v47 = vmul.f32 %v3283_v21, %v3059_v45  ;;  %v2750_v43 = vadd.f32 %v2718_v16, %v2681_v8  ;;  %v9007_v49 = vld [vmem:[#allocation2 + $0x1d1] sm:$0xff] }
 0x3ab   : > { %v3190_v39 = vadd.f32 %v3158_v33, %v8951_v9  ;;  %v3031_v13 = vadd.f32 %v8705_v28, %v2992_v50  ;;  %v2892_v4 = vmul.f32 %v8635_v26, %v8914_v29  ;;  %v2650_v17 = vmul.f32 %v8595_v42, %v8921_v51 }
 0x3ac   : > { %v6158_v19 = vpop.eup %6157  ;;  %v2613_v22 = vadd.f32 %v2581_v14, %v2508_v31  ;;  %v2719_v54 = vmul.f32 %v8605_v63, %v8983_v12  ;;  %5569 = vmatmul.mubr.msk.f32.gmra.mrb[34].mxu0 %vm589_vm0, %v8989_v47  ;;  %v2337_v38 = vmul.f32 %v8537_v53, %v8854_v6  ;;  %v2855_v30 = vadd.f32 %v2823_v20, %v2750_v43 }
 0x3ad   : > { %v3284_v45 = vadd.f32 1.0, %v6158_v19  ;;  %v3222_v8 = vmul.f32 0.7978846, %v3190_v39  ;;  %v3095_v35 = vmul.f32 0.044715, %v3031_v13  ;;  %v2407_v16 = vmul.f32 %v8544_v10, %v8933_v61  ;;  %v9019_v39 = vld [vmem:[#allocation2 + $0x1ef] sm:$0xff] }
 0x3ae   : > { %v2682_v0 = vadd.f32 %v2650_v17, %v2613_v22  ;;  %v2477_v56 = vmul.f32 %v8551_v7, %v8993_v37  ;;  %v2961_v50 = vmul.f32 %v8678_v1, %v8995_v18  ;;  %v2924_v31 = vadd.f32 %v2892_v4, %v2855_v30 }
 0x3af   : > { %v9013_v21 = vmul.f32 %v3284_v45, %v3060_v60  ;;  %6161 = vtanh.f32 %v3222_v8  ;;  %v3127_v33 = vmul.f32 %v3095_v35, %v3031_v13  ;;  %v2824_v6 = vmul.f32 %v8624_v27, %v8876_v25  ;;  %v9030_v8 = vld [vmem:[#allocation2 + $0x1e8] sm:$0xff] }
 0x3b0   : > { %v2751_v14 = vadd.f32 %v2719_v54, %v2682_v0  ;;  %v2439_v20 = vadd.f32 %v2407_v16, %v2337_v38  ;;  %v3062_v43 = vmul.f32 0.5, %v8951_v9  ;;  %v2893_v19 = vmul.f32 %v8635_v26, %v8941_v23 }
 0x3b1   : > { %9641 = vst [vmem:[#allocation20_spill] sm:$0xff] %v9013_v21  ;;  %5571 = vmatprep.mubr.msk.f32.mxu0 %vm589_vm0, %v9013_v21  ;;  %v3159_v60 = vmul.f32 %v3127_v33, %v3031_v13  ;;  %v2962_v22 = vmul.f32 %v8678_v1, %v9007_v49  ;;  %v2993_v4 = vadd.f32 %v2961_v50, %v2924_v31  ;;  %v9041_v50 = vmul.f32 0.5, %v3031_v13  ;;  %v9045_v21 = vld [vmem:[#allocation2 + $0x1f0] sm:$0xff] }
 0x3b2   : > { %v2856_v17 = vadd.f32 %v2824_v6, %v2751_v14  ;;  %v2509_v54 = vadd.f32 %v2477_v56, %v2439_v20  ;;  %v2582_v25 = vmul.f32 %v8576_v55, %v8881_v36  ;;  %v2338_v35 = vmul.f32 %v8537_v53, %v8891_v40 }
 0x3b3   : > { %v3191_v45 = vadd.f32 %v3159_v60, %v3031_v13  ;;  %v2408_v9 = vmul.f32 %v8544_v10, %v8962_v5  ;;  %v2478_v38 = vmul.f32 %v8551_v7, %v9019_v39  ;;  %v3032_v0 = vadd.f32 %v8705_v28, %v2993_v4 }
 0x3b4   : > { %v6160_v30 = vpop.eup %6159  ;;  %v2925_v16 = vadd.f32 %v2893_v19, %v2856_v17  ;;  %v2614_v56 = vadd.f32 %v2582_v25, %v2509_v54  ;;  %v2651_v36 = vmul.f32 %v8595_v42, %v8965_v24  ;;  %v2720_v60 = vmul.f32 %v8605_v63, %v9030_v8 }
 0x3b5   : > { %v3285_v33 = vadd.f32 1.0, %v6160_v30  ;;  %v3223_v31 = vmul.f32 0.7978846, %v3191_v45  ;;  %v2440_v14 = vadd.f32 %v2408_v9, %v2338_v35  ;;  %v3096_v40 = vmul.f32 0.044715, %v3032_v0  ;;  %v9055_v45 = vld [vmem:[#allocation2 + $0x207] sm:$0xff] }
 0x3b6   : > { %v2994_v6 = vadd.f32 %v2962_v22, %v2925_v16  ;;  %v2683_v20 = vadd.f32 %v2651_v36, %v2614_v56  ;;  %v2583_v17 = vmul.f32 %v8576_v55, %v8921_v51  ;;  %v2825_v22 = vmul.f32 %v8624_v27, %v8914_v29 }
 0x3b7   : > { %v9048_v4 = vmul.f32 %v3285_v33, %v8978_v34  ;;  %6163 = vtanh.f32 %v3223_v31  ;;  %v2510_v19 = vadd.f32 %v2478_v38, %v2440_v14  ;;  %v3128_v13 = vmul.f32 %v3096_v40, %v3032_v0  ;;  %v9059_v34 = vld [vmem:[#allocation2 + $0x1e9] sm:$0xff] }
 0x3b8   : > { %v3033_v54 = vadd.f32 %v8705_v28, %v2994_v6  ;;  %v2752_v25 = vadd.f32 %v2720_v60, %v2683_v20  ;;  %v2894_v9 = vmul.f32 %v8635_v26, %v8995_v18  ;;  %v2652_v51 = vmul.f32 %v8595_v42, %v8983_v12 }
 0x3b9   : > { %v6162_v35 = vpop.eup %6161  ;;  %5572 = vmatmul.mubr.msk.f32.gmra.mrb[36].mxu0 %vm589_vm0, %v9048_v4  ;;  %v2615_v38 = vadd.f32 %v2583_v17, %v2510_v19  ;;  %v2721_v30 = vmul.f32 %v8605_v63, %v9045_v21  ;;  %v3160_v29 = vmul.f32 %v3128_v13, %v3032_v0  ;;  %v2339_v36 = vmul.f32 %v8537_v53, %v8933_v61 }
 0x3ba   : > { %v3286_v16 = vadd.f32 1.0, %v6162_v35  ;;  %v3097_v56 = vmul.f32 0.044715, %v3033_v54  ;;  %v2857_v33 = vadd.f32 %v2825_v22, %v2752_v25  ;;  %v2409_v14 = vmul.f32 %v8544_v10, %v8993_v37  ;;  %v9077_v35 = vld [vmem:[#allocation2 + $0x1f1] sm:$0xff] }
 0x3bb   : > { %v2684_v31 = vadd.f32 %v2652_v51, %v2615_v38  ;;  %v2479_v40 = vmul.f32 %v8551_v7, %v9055_v45  ;;  %v3192_v20 = vadd.f32 %v3160_v29, %v3032_v0  ;;  %v2963_v19 = vmul.f32 %v8678_v1, %v9059_v34 }
 0x3bc   : > { %v9073_v6 = vmul.f32 %v3286_v16, %v3062_v43  ;;  %v3129_v60 = vmul.f32 %v3097_v56, %v3033_v54  ;;  %v2926_v17 = vadd.f32 %v2894_v9, %v2857_v33  ;;  %v2826_v61 = vmul.f32 %v8624_v27, %v8941_v23  ;;  %v9089_v56 = vld [vmem:[#allocation2 + $0x20f] sm:$0xff] }
 0x3bd   : > { %v2753_v13 = vadd.f32 %v2721_v30, %v2684_v31  ;;  %v2441_v25 = vadd.f32 %v2409_v14, %v2339_v36  ;;  %v9083_v22 = vmul.f32 0.5, %v3032_v0  ;;  %v3224_v43 = vmul.f32 0.7978846, %v3192_v20  ;;  %v9093_v0 = vld [vmem:[#allocation2 + $0x208] sm:$0xff] }
 0x3be   : > { %5574 = vmatprep.mubr.msk.f32.mxu0 %vm589_vm0, %v9073_v6  ;;  %v3161_v38 = vmul.f32 %v3129_v60, %v3033_v54  ;;  %v2895_v51 = vmul.f32 %v8635_v26, %v9007_v49  ;;  %v2995_v16 = vadd.f32 %v2963_v19, %v2926_v17  ;;  %v2584_v30 = vmul.f32 %v8576_v55, %v8965_v24 }
 0x3bf   : > { %v2858_v29 = vadd.f32 %v2826_v61, %v2753_v13  ;;  %v2511_v9 = vadd.f32 %v2479_v40, %v2441_v25  ;;  %6165 = vtanh.f32 %v3224_v43  ;;  %v2964_v36 = vmul.f32 %v8678_v1, %v9077_v35 }
 0x3c0   : > { %v3193_v23 = vadd.f32 %v3161_v38, %v3033_v54  ;;  %v2653_v33 = vmul.f32 %v8595_v42, %v9030_v8  ;;  %v9098_v14 = vadd.f32 %v8705_v28, %v2995_v16  ;;  %v2410_v24 = vmul.f32 %v8544_v10, %v9019_v39 }
 0x3c1   : > { %v6164_v31 = vpop.eup %6163  ;;  %v2927_v40 = vadd.f32 %v2895_v51, %v2858_v29  ;;  %v2616_v20 = vadd.f32 %v2584_v30, %v2511_v9  ;;  %v2340_v17 = vmul.f32 %v8537_v53, %v8962_v5  ;;  %v2480_v13 = vmul.f32 %v8551_v7, %v9089_v56  ;;  %v9109_v51 = vld [vmem:[#allocation2 + $0x209] sm:$0xff] }
 0x3c2   : > { %v3287_v60 = vadd.f32 1.0, %v6164_v31  ;;  %v3225_v19 = vmul.f32 0.7978846, %v3193_v23  ;;  %v3098_v61 = vmul.f32 0.044715, %v9098_v14  ;;  %v2722_v38 = vmul.f32 %v8605_v63, %v9093_v0 }
 0x3c3   : > { %v2996_v25 = vadd.f32 %v2964_v36, %v2927_v40  ;;  %v2685_v43 = vadd.f32 %v2653_v33, %v2616_v20  ;;  %v9114_v29 = vmul.f32 0.5, %v3033_v54  ;;  %v2442_v9 = vadd.f32 %v2410_v24, %v2340_v17  ;;  %v2304_v33 = vld [vmem:[#allocation2 + $0x227] sm:$0xff]  ;;  %v9128_v40 = vld [vmem:[#allocation2 + $0x210] sm:$0xff] }
 0x3c4   : > { %v9112_v16 = vmul.f32 %v3287_v60, %v9041_v50  ;;  %6167 = vtanh.f32 %v3225_v19  ;;  %v3130_v5 = vmul.f32 %v3098_v61, %v9098_v14  ;;  %v2827_v36 = vmul.f32 %v8624_v27, %v8995_v18 }
 0x3c5   : > { %v9118_v30 = vadd.f32 %v8705_v28, %v2996_v25  ;;  %v2754_v23 = vadd.f32 %v2722_v38, %v2685_v43  ;;  %v2896_v50 = vmul.f32 %v8635_v26, %v9059_v34  ;;  %v2965_v54 = vmul.f32 %v8678_v1, %v9109_v51 }
 0x3c6   : > { %5575 = vmatmul.mubr.msk.f32.gmra.mrb[38].mxu0 %vm589_vm0, %v9112_v16  ;;  %v2512_v31 = vadd.f32 %v2480_v13, %v2442_v9  ;;  %v2585_v20 = vmul.f32 %v8576_v55, %v8983_v12  ;;  %v3162_v24 = vmul.f32 %v3130_v5, %v9098_v14  ;;  %v2654_v19 = vmul.f32 %v8595_v42, %v9045_v21  ;;  %v9145_v5 = vld [vmem:[#allocation2 + $0x211] sm:$0xff] }
 0x3c7   : > { %v3099_v18 = vmul.f32 0.044715, %v9118_v30  ;;  %v2859_v60 = vadd.f32 %v2827_v36, %v2754_v23  ;;  %v2341_v61 = vmul.f32 %v8537_v53, %v8993_v37  ;;  %v2411_v13 = vmul.f32 %v8544_v10, %v9055_v45 }
 0x3c8   : > { %v2617_v17 = vadd.f32 %v2585_v20, %v2512_v31  ;;  %v2481_v25 = vmul.f32 %v8551_v7, %v2304_v33  ;;  %v3194_v43 = vadd.f32 %v3162_v24, %v9098_v14  ;;  %v2723_v9 = vmul.f32 %v8605_v63, %v9128_v40 }
 0x3c9   : > { %v3131_v12 = vmul.f32 %v3099_v18, %v9118_v30  ;;  %v2928_v38 = vadd.f32 %v2896_v50, %v2859_v60  ;;  %v6166_v23 = vpop.eup %6165  ;;  %v2828_v53 = vmul.f32 %v8624_v27, %v9007_v49  ;;  %v2897_v10 = vmul.f32 %v8635_v26, %v9077_v35  ;;  %v2549_v50 = vld [vmem:[#allocation2 + $0x228] sm:$0xff] }
 0x3ca   : > { %v2686_v36 = vadd.f32 %v2654_v19, %v2617_v17  ;;  %v2443_v37 = vadd.f32 %v2411_v13, %v2341_v61  ;;  %v3288_v7 = vadd.f32 1.0, %v6166_v23  ;;  %v3226_v45 = vmul.f32 0.7978846, %v3194_v43  ;;  %v2305_v61 = vld [vmem:[#allocation2 + $0x22f] sm:$0xff] }
 0x3cb   : > { %v3163_v33 = vmul.f32 %v3131_v12, %v9118_v30  ;;  %v2997_v31 = vadd.f32 %v2965_v54, %v2928_v38  ;;  %v2966_v24 = vmul.f32 %v8678_v1, %v9145_v5  ;;  %v2586_v60 = vmul.f32 %v8576_v55, %v9030_v8  ;;  %v6354_v38 = vld [vmem:[%s9585_s7] ss:$0 sm:$0xff] }
 0x3cc   : > { %v2755_v20 = vadd.f32 %v2723_v9, %v2686_v36  ;;  %v2513_v18 = vadd.f32 %v2481_v25, %v2443_v37  ;;  %v9157_v49 = vmul.f32 %v3288_v7, %v9083_v22  ;;  %6169 = vtanh.f32 %v3226_v45 }
 0x3cd   : > { %v3195_v19 = vadd.f32 %v3163_v33, %v9118_v30  ;;  %v9161_v17 = vadd.f32 %v8705_v28, %v2997_v31  ;;  %v2655_v12 = vmul.f32 %v8595_v42, %v9093_v0  ;;  %v2724_v25 = vmul.f32 %v8605_v63, %v2549_v50  ;;  %v6355_v42 = vld [vmem:[%s9585_s7 + $0x4] ss:$0 sm:$0xff]  ;;  %v6356_v0 = vld [vmem:[%s9585_s7 + $0x8] ss:$0 sm:$0xff] }
 0x3ce   : > { %v6168_v54 = vpop.eup %6167  ;;  %v2860_v13 = vadd.f32 %v2828_v53, %v2755_v20  ;;  %v2618_v43 = vadd.f32 %v2586_v60, %v2513_v18  ;;  %5577 = vmatprep.mubr.msk.f32.mxu0 %vm589_vm0, %v9157_v49  ;;  %v2342_v9 = vmul.f32 %v6354_v38, %v9019_v39  ;;  %v2792_v53 = vld [vmem:[#allocation2 + $0x229] sm:$0xff]  ;;  %v2412_v63 = vmul.f32 %v6355_v42, %v9089_v56  ;;  %v4019_v18 = vld [vmem:[#allocation8 + $0x18] sm:$0xff] }
 0x3cf   : > { %v3289_v55 = vadd.f32 1.0, %v6168_v54  ;;  %v3227_v8 = vmul.f32 0.7978846, %v3195_v19  ;;  %v3100_v22 = vmul.f32 0.044715, %v9161_v17  ;;  %v2482_v37 = vmul.f32 %v6356_v0, %v2305_v61  ;;  %v4017_v20 = vld [vmem:[#allocation8 + $0x8] sm:$0xff] }
 0x3d0   : > { %v2929_v23 = vadd.f32 %v2897_v10, %v2860_v13  ;;  %v2687_v36 = vadd.f32 %v2655_v12, %v2618_v43  ;;  %v4016_v10 = vld [vmem:[#allocation8] sm:$0xff]  ;;  %v2829_v31 = vmul.f32 %v8624_v27, %v9059_v34  ;;  %v2444_v50 = vadd.f32 %v2412_v63, %v2342_v9  ;;  %v4018_v56 = vld [vmem:[#allocation8 + $0x10] sm:$0xff]  ;;  %v4021_v9 = vld [vmem:[#allocation8 + $0x28] sm:$0xff] }
 0x3d1   : > { %v9181_v7 = vmul.f32 %v3289_v55, %v9114_v29  ;;  %6171 = vtanh.f32 %v3227_v8  ;;  %v3132_v39 = vmul.f32 %v3100_v22, %v9161_v17  ;;  %v2898_v29 = vmul.f32 %v8635_v26, %v9109_v51  ;;  %v2550_v61 = vld [vmem:[#allocation2 + $0x230] sm:$0xff]  ;;  %v6357_v34 = vld [vmem:[%s9585_s7 + $0x1] ss:$0 sm:$0xff]  ;;  %v6358_v26 = vld [vmem:[%s9585_s7 + $0x5] ss:$0 sm:$0xff] }
 0x3d2   : > { %v2998_v45 = vadd.f32 %v2966_v24, %v2929_v23  ;;  %v2756_v33 = vadd.f32 %v2724_v25, %v2687_v36  ;;  %v2967_v19 = vmul.f32 %v8678_v1, %v2792_v53  ;;  %v2514_v27 = vadd.f32 %v2482_v37, %v2444_v50  ;;  %v6359_v22 = vld [vmem:[%s9585_s7 + $0x9] ss:$0 sm:$0xff]  ;;  %v4023_v50 = vld [vmem:[#allocation8 + $0x38] sm:$0xff] }
 0x3d3   : > { %5578 = vmatmul.mubr.msk.f32.gmra.mrb[40].mxu0 %vm589_vm0, %v9181_v7  ;;  %v3164_v60 = vmul.f32 %v3132_v39, %v9161_v17  ;;  %v2587_v13 = vmul.f32 %v6357_v34, %v9045_v21  ;;  %v2656_v1 = vmul.f32 %v6358_v26, %v9128_v40  ;;  %v5797_v51 = vpack.c.bf16 %v4017_v20, %v4016_v10  ;;  %v4020_v21 = vld [vmem:[#allocation8 + $0x20] sm:$0xff] }
 0x3d4   : > { %v9193_v24 = vadd.f32 %v8705_v28, %v2998_v45  ;;  %v2861_v54 = vadd.f32 %v2829_v31, %v2756_v33  ;;  %v5801_v12 = vpack.c.bf16 %v4019_v18, %v4018_v56  ;;  %v2725_v38 = vmul.f32 %v6359_v22, %v2550_v61  ;;  %v2793_v31 = vld [vmem:[#allocation2 + $0x231] sm:$0xff]  ;;  %v6360_v56 = vld [vmem:[%s9585_s7 + $0x2] ss:$0 sm:$0xff] }
 0x3d5   : > { %v3196_v43 = vadd.f32 %v3164_v60, %v9161_v17  ;;  %v2619_v8 = vadd.f32 %v2587_v13, %v2514_v27  ;;  %v3066_v36 = vmul.f32 0.5, %v9098_v14  ;;  %5798 = vmatprep.subr.bf16.mxu1 %v5797_v51  ;;  %v5805_v37 = vpack.c.bf16 %v4021_v9, %v4020_v21  ;;  %v4022_v14 = vld [vmem:[#allocation8 + $0x30] sm:$0xff] }
 0x3d6   : > { %v3101_v25 = vmul.f32 0.044715, %v9193_v24  ;;  %v2930_v55 = vadd.f32 %v2898_v29, %v2861_v54  ;;  %v6170_v23 = vpop.eup %6169  ;;  %5800 = vmatpush3.bf16.msra.mxu1 %v5797_v51  ;;  %v2830_v18 = vmul.f32 %v6360_v56, %v9077_v35  ;;  %v3067_v60 = vmul.f32 0.5, %v9118_v30  ;;  %v6361_v54 = vld [vmem:[%s9585_s7 + $0x6] ss:$0 sm:$0xff] }
 0x3d7   : > { %v3228_v53 = vmul.f32 0.7978846, %v3196_v43  ;;  %v3290_v42 = vadd.f32 1.0, %v6170_v23  ;;  %v2688_v0 = vadd.f32 %v2656_v1, %v2619_v8  ;;  %5802 = vmatprep.subr.bf16.mxu1 %v5801_v12  ;;  %v2899_v27 = vmul.f32 %v6361_v54, %v9145_v5  ;;  %v6362_v35 = vld [vmem:[%s9585_s7 + $0xa] ss:$0 sm:$0xff] }
 0x3d8   : > { %v3133_v40 = vmul.f32 %v3101_v25, %v9193_v24  ;;  %v2999_v63 = vadd.f32 %v2967_v19, %v2930_v55  ;;  %v2968_v34 = vmul.f32 %v6362_v35, %v2793_v31  ;;  %v5809_v13 = vpack.c.bf16 %v4023_v50, %v4022_v14  ;;  %v6363_v55 = vld [vmem:[%s9586_s8] ss:$0 sm:$0xff] }
 0x3d9   : > { %6173 = vtanh.f32 %v3228_v53  ;;  %v9210_v39 = vmul.f32 %v3290_v42, %v3066_v36  ;;  %v2757_v33 = vadd.f32 %v2725_v38, %v2688_v0  ;;  %v3068_v22 = vmul.f32 0.5, %v9161_v17 }
 0x3da   : > { %v3165_v10 = vmul.f32 %v3133_v40, %v9193_v24  ;;  %v3038_v45 = vadd.f32 %v8705_v28, %v2999_v63  ;;  %5804 = vmatpush3.bf16.msra.mxu1 %v5801_v12  ;;  %v3069_v40 = vmul.f32 0.5, %v9193_v24 }
 0x3db   : > { %v6172_v20 = vpop.eup %6171  ;;  %5580 = vmatprep.mubr.msk.f32.mxu0 %vm589_vm0, %v9210_v39  ;;  %v2862_v61 = vadd.f32 %v2830_v18, %v2757_v33  ;;  %5806 = vmatprep.subr.bf16.mxu1 %v5805_v37 }
 0x3dc   : > { %v3291_v29 = vadd.f32 1.0, %v6172_v20  ;;  %v3197_v19 = vadd.f32 %v3165_v10, %v9193_v24  ;;  %v3102_v28 = vmul.f32 0.044715, %v3038_v45  ;;  %v3070_v33 = vmul.f32 0.5, %v3038_v45 }
 0x3dd   : > { %v2931_v1 = vadd.f32 %v2899_v27, %v2862_v61 }
 0x3de   : > { %v9229_v30 = vmul.f32 %v3291_v29, %v3067_v60  ;;  %v3229_v43 = vmul.f32 0.7978846, %v3197_v19  ;;  %v3134_v26 = vmul.f32 %v3102_v28, %v3038_v45  ;;  %5808 = vmatpush3.bf16.msra.mxu1 %v5805_v37  ;;  %v9257_v60 = vld [vmem:[%s9642_s30] ss:$0 sm:$0xff]  ;;  %s4934_s30 = sshll.u32 %s9463_s15, 4  ;;  %s9531_s30 = int_to_ptr.vmem [resolvable:$true] %s4934_s30 }
 0x3df   : > { %v3000_v12 = vadd.f32 %v2968_v34, %v2931_v1  ;;  %5810 = vmatprep.subr.bf16.mxu1 %v5809_v13  ;;  %p6457_p7 = scmp.lt.s32.totalorder %s9531_s30, %s6455_s28 }
 0x3e0   : > { %5581 = vmatmul.mubr.msk.f32.gmra.mrb[42].mxu0 %vm589_vm0, %v9229_v30  ;;  %6175 = vtanh.f32 %v3229_v43  ;;  %v3166_v51 = vmul.f32 %v3134_v26, %v3038_v45 }
 0x3e1   : > { %v3039_v8 = vadd.f32 %v6363_v55, %v3000_v12 }
 0x3e2   : > { %v3198_v5 = vadd.f32 %v3166_v51, %v3038_v45  ;;  %5812 = vmatpush3.bf16.msra.mxu1 %v5809_v13 }
 0x3e3   : > { %v6174_v25 = vpop.eup %6173  ;;  %v3103_v9 = vmul.f32 0.044715, %v3039_v8  ;;  %v3071_v20 = vmul.f32 0.5, %v3039_v8 }
 0x3e4   : > { %v3292_v38 = vadd.f32 1.0, %v6174_v25  ;;  %v3230_v21 = vmul.f32 0.7978846, %v3198_v5 }
 0x3e5   : > { %v3135_v36 = vmul.f32 %v3103_v9, %v3039_v8 }
 0x3e6   : > { %v9237_v23 = vmul.f32 %v3292_v38, %v3068_v22  ;;  %6177 = vtanh.f32 %v3230_v21 }
 0x3e7   : > { %v3167_v53 = vmul.f32 %v3135_v36, %v3039_v8 }
 0x3e8   : > { %5583 = vmatprep.mubr.msk.f32.mxu0 %vm589_vm0, %v9237_v23 }
 0x3e9   : > { %v3199_v0 = vadd.f32 %v3167_v53, %v3039_v8 }
 0x3ea   : > { %v6176_v42 = vpop.eup %6175 }
 0x3eb   : > { %v3293_v63 = vadd.f32 1.0, %v6176_v42  ;;  %v3231_v17 = vmul.f32 0.7978846, %v3199_v0 }
 0x3ed   : > { %v9242_v37 = vmul.f32 %v3293_v63, %v3069_v40  ;;  %6179 = vtanh.f32 %v3231_v17 }
 0x3ef   : > { %5584 = vmatmul.mubr.msk.f32.gmra.mrb[44].mxu0 %vm589_vm0, %v9242_v37 }
 0x3f0   : > { %v6178_v10 = vpop.eup %6177 }
 0x3f1   : > { %v3294_v31 = vadd.f32 1.0, %v6178_v10 }
 0x3f3   : > { %v9246_v14 = vmul.f32 %v3294_v31, %v3070_v33 }
 0x3f5   : > { %5586 = vmatprep.mubr.msk.f32.mxu0 %vm589_vm0, %v9246_v14 }
 0x3f7   : > { %v6180_v50 = vpop.eup %6179 }
 0x3f8   : > { %v3295_v24 = vadd.f32 1.0, %v6180_v50 }
 0x3fa   : > { %v9250_v56 = vmul.f32 %v3295_v24, %v3071_v20 }
 0x3fc   : > { %5587 = vmatmul.mubr.msk.f32.gmra.mrb[46].mxu0 %vm589_vm0, %v9250_v56 }
 0x403   : > { %v5543_v18 = vpop.f32.mrb[16].mxu0 }
 0x404   : > { %v3658_v45 = vadd.f32 %v5543_v18, %v8301_v44  ;;  %v3498_v29 = vpop.f32.mrb[17].mxu0 }
 0x405   : > { %v3657_v19 = vadd.f32 %v3498_v29, %v8239_v32 }
 0x406   : > { %v3697_v28 = vadd.f32 %v9257_v60, %v3658_v45 }
 0x407   : > { %v3696_v61 = vadd.f32 %v9257_v60, %v3657_v19 }
 0x408   : > { %v3761_v54 = vmul.f32 0.044715, %v3697_v28  ;;  %v3729_v33 = vmul.f32 0.5, %v3697_v28 }
 0x409   : > { %v3760_v27 = vmul.f32 0.044715, %v3696_v61  ;;  %v3728_v17 = vmul.f32 0.5, %v3696_v61 }
 0x40a   : > { %v3793_v35 = vmul.f32 %v3761_v54, %v3697_v28 }
 0x40b   : > { %v3792_v34 = vmul.f32 %v3760_v27, %v3696_v61 }
 0x40c   : > { %v3825_v13 = vmul.f32 %v3793_v35, %v3697_v28 }
 0x40d   : > { %v3824_v43 = vmul.f32 %v3792_v34, %v3696_v61 }
 0x40e   : > { %v3857_v26 = vadd.f32 %v3825_v13, %v3697_v28 }
 0x40f   : > { %v3856_v1 = vadd.f32 %v3824_v43, %v3696_v61 }
 0x410   : > { %v3889_v51 = vmul.f32 0.7978846, %v3857_v26 }
 0x411   : > { %v3888_v12 = vmul.f32 0.7978846, %v3856_v1 }
 0x412   : > { %6181 = vtanh.f32 %v3889_v51 }
 0x413   : > { %v5546_v5 = vpop.f32.mrb[18].mxu0  ;;  %6183 = vtanh.f32 %v3888_v12 }
 0x414   : > { %v3660_v44 = vadd.f32 %v5546_v5, %v8375_v46  ;;  %v3508_v25 = vpop.f32.mrb[19].mxu0 }
 0x415   : > { %v3659_v32 = vadd.f32 %v3508_v25, %v8353_v59 }
 0x416   : > { %v3699_v55 = vadd.f32 %v9257_v60, %v3660_v44 }
 0x417   : > { %v3698_v8 = vadd.f32 %v9257_v60, %v3659_v32 }
 0x418   : > { %v3763_v22 = vmul.f32 0.044715, %v3699_v55 }
 0x419   : > { %v3762_v38 = vmul.f32 0.044715, %v3698_v8  ;;  %v3730_v32 = vmul.f32 0.5, %v3698_v8 }
 0x41a   : > { %v3795_v21 = vmul.f32 %v3763_v22, %v3699_v55 }
 0x41b   : > { %v3794_v9 = vmul.f32 %v3762_v38, %v3698_v8 }
 0x41c   : > { %v3827_v36 = vmul.f32 %v3795_v21, %v3699_v55  ;;  %v6182_v53 = vpop.eup %6181 }
 0x41d   : > { %v3826_v42 = vmul.f32 %v3794_v9, %v3698_v8  ;;  %v6184_v40 = vpop.eup %6183  ;;  %v3953_v63 = vadd.f32 1.0, %v6182_v53  ;;  %v3731_v9 = vmul.f32 0.5, %v3699_v55 }
 0x41e   : > { %v3859_v0 = vadd.f32 %v3827_v36, %v3699_v55  ;;  %v3952_v46 = vadd.f32 1.0, %v6184_v40 }
 0x41f   : > { %v3858_v10 = vadd.f32 %v3826_v42, %v3698_v8  ;;  %v5549_v31 = vpop.f32.mrb[20].mxu0  ;;  %v3985_v45 = vmul.f32 %v3953_v63, %v3729_v33 }
 0x420   : > { %v3891_v59 = vmul.f32 0.7978846, %v3859_v0  ;;  %v3662_v50 = vadd.f32 %v5549_v31, %v8442_v3  ;;  %v3518_v20 = vpop.f32.mrb[21].mxu0  ;;  %v3984_v24 = vmul.f32 %v3952_v46, %v3728_v17 }
 0x421   : > { %v3890_v18 = vmul.f32 0.7978846, %v3858_v10  ;;  %v3661_v29 = vadd.f32 %v3518_v20, %v8405_v57 }
 0x422   : > { %6185 = vtanh.f32 %v3891_v59  ;;  %v3701_v19 = vadd.f32 %v9257_v60, %v3662_v50  ;;  %5605 = vmatprep.mubr.msk.f32.mxu1 %vm589_vm0, %v3984_v24 }
 0x423   : > { %6187 = vtanh.f32 %v3890_v18  ;;  %v3700_v61 = vadd.f32 %v9257_v60, %v3661_v29  ;;  %5606 = vmatmul.mubr.msk.f32.vlgmr.msra.gmra.mrb[48].mxu1 %vm589_vm0, %v3985_v45 }
 0x424   : > { %v3765_v28 = vmul.f32 0.044715, %v3701_v19  ;;  %v3733_v29 = vmul.f32 0.5, %v3701_v19 }
 0x425   : > { %v3764_v54 = vmul.f32 0.044715, %v3700_v61  ;;  %v3732_v20 = vmul.f32 0.5, %v3700_v61 }
 0x426   : > { %v3797_v27 = vmul.f32 %v3765_v28, %v3701_v19 }
 0x427   : > { %v3796_v3 = vmul.f32 %v3764_v54, %v3700_v61 }
 0x428   : > { %v3829_v35 = vmul.f32 %v3797_v27, %v3701_v19 }
 0x429   : > { %v3828_v34 = vmul.f32 %v3796_v3, %v3700_v61 }
 0x42a   : > { %v3861_v13 = vadd.f32 %v3829_v35, %v3701_v19 }
 0x42b   : > { %v5552_v26 = vpop.f32.mrb[22].mxu0  ;;  %v3860_v57 = vadd.f32 %v3828_v34, %v3700_v61 }
 0x42c   : > { %v6186_v43 = vpop.eup %6185  ;;  %v3664_v51 = vadd.f32 %v5552_v26, %v8505_v15  ;;  %v3528_v12 = vpop.f32.mrb[23].mxu0  ;;  %v3893_v44 = vmul.f32 0.7978846, %v3861_v13 }
 0x42d   : > { %v6188_v1 = vpop.eup %6187  ;;  %v3955_v5 = vadd.f32 1.0, %v6186_v43  ;;  %v3663_v25 = vadd.f32 %v3528_v12, %v8476_v52  ;;  %v3892_v38 = vmul.f32 0.7978846, %v3860_v57 }
 0x42e   : > { %v3954_v22 = vadd.f32 1.0, %v6188_v1  ;;  %v3703_v21 = vadd.f32 %v9257_v60, %v3664_v51  ;;  %6189 = vtanh.f32 %v3893_v44 }
 0x42f   : > { %v3702_v36 = vadd.f32 %v9257_v60, %v3663_v25  ;;  %6191 = vtanh.f32 %v3892_v38  ;;  %v3987_v40 = vmul.f32 %v3955_v5, %v3731_v9 }
 0x430   : > { %v3986_v53 = vmul.f32 %v3954_v22, %v3730_v32  ;;  %v3767_v42 = vmul.f32 0.044715, %v3703_v21  ;;  %v3735_v25 = vmul.f32 0.5, %v3703_v21 }
 0x431   : > { %v3766_v63 = vmul.f32 0.044715, %v3702_v36  ;;  %v3734_v51 = vmul.f32 0.5, %v3702_v36 }
 0x432   : > { %5608 = vmatprep.mubr.msk.f32.mxu1 %vm589_vm0, %v3986_v53  ;;  %v3799_v15 = vmul.f32 %v3767_v42, %v3703_v21 }
 0x433   : > { %5609 = vmatmul.mubr.msk.f32.gmra.mrb[50].mxu1 %vm589_vm0, %v3987_v40  ;;  %v3798_v52 = vmul.f32 %v3766_v63, %v3702_v36 }
 0x434   : > { %v3831_v8 = vmul.f32 %v3799_v15, %v3703_v21 }
 0x435   : > { %v3830_v0 = vmul.f32 %v3798_v52, %v3702_v36 }
 0x436   : > { %v3863_v17 = vadd.f32 %v3831_v8, %v3703_v21 }
 0x437   : > { %v3862_v46 = vadd.f32 %v3830_v0, %v3702_v36 }
 0x438   : > { %v6190_v10 = vpop.eup %6189  ;;  %v3895_v55 = vmul.f32 0.7978846, %v3863_v17 }
 0x439   : > { %v6192_v33 = vpop.eup %6191  ;;  %v3957_v31 = vadd.f32 1.0, %v6190_v10  ;;  %v3894_v59 = vmul.f32 0.7978846, %v3862_v46 }
 0x43a   : > { %v5555_v50 = vpop.f32.mrb[24].mxu0  ;;  %v3956_v24 = vadd.f32 1.0, %v6192_v33  ;;  %6193 = vtanh.f32 %v3895_v55 }
 0x43b   : > { %v3666_v18 = vadd.f32 %v5555_v50, %v8611_v2  ;;  %v3538_v45 = vpop.f32.mrb[25].mxu0  ;;  %6195 = vtanh.f32 %v3894_v59  ;;  %v3989_v3 = vmul.f32 %v3957_v31, %v3733_v29 }
 0x43c   : > { %v3665_v28 = vadd.f32 %v3538_v45, %v8555_v48  ;;  %v3988_v54 = vmul.f32 %v3956_v24, %v3732_v20 }
 0x43d   : > { %v3705_v27 = vadd.f32 %v9257_v60, %v3666_v18 }
 0x43e   : > { %v3704_v35 = vadd.f32 %v9257_v60, %v3665_v28  ;;  %5611 = vmatprep.mubr.msk.f32.mxu1 %vm589_vm0, %v3988_v54 }
 0x43f   : > { %v3769_v34 = vmul.f32 0.044715, %v3705_v27  ;;  %5612 = vmatmul.mubr.msk.f32.gmra.mrb[52].mxu1 %vm589_vm0, %v3989_v3  ;;  %v3737_v29 = vmul.f32 0.5, %v3705_v27 }
 0x440   : > { %v3768_v61 = vmul.f32 0.044715, %v3704_v35  ;;  %v3736_v20 = vmul.f32 0.5, %v3704_v35 }
 0x441   : > { %v3801_v13 = vmul.f32 %v3769_v34, %v3705_v27 }
 0x442   : > { %v3800_v43 = vmul.f32 %v3768_v61, %v3704_v35 }
 0x443   : > { %v3833_v2 = vmul.f32 %v3801_v13, %v3705_v27 }
 0x444   : > { %v6194_v26 = vpop.eup %6193  ;;  %v3832_v19 = vmul.f32 %v3800_v43, %v3704_v35 }
 0x445   : > { %v6196_v57 = vpop.eup %6195  ;;  %v3959_v1 = vadd.f32 1.0, %v6194_v26  ;;  %v3865_v48 = vadd.f32 %v3833_v2, %v3705_v27 }
 0x446   : > { %v3958_v12 = vadd.f32 1.0, %v6196_v57  ;;  %v3864_v5 = vadd.f32 %v3832_v19, %v3704_v35 }
 0x447   : > { %v5558_v44 = vpop.f32.mrb[26].mxu0  ;;  %v3897_v32 = vmul.f32 0.7978846, %v3865_v48  ;;  %v3991_v40 = vmul.f32 %v3959_v1, %v3735_v25 }
 0x448   : > { %v3668_v22 = vadd.f32 %v5558_v44, %v8697_v41  ;;  %v3548_v38 = vpop.f32.mrb[27].mxu0  ;;  %v3990_v9 = vmul.f32 %v3958_v12, %v3734_v51  ;;  %v3896_v53 = vmul.f32 0.7978846, %v3864_v5  ;;  %v9643_v51 = vld [vmem:[#allocation17_spill] sm:$0xff] }
 0x449   : > { %v3667_v42 = vadd.f32 %v3548_v38, %v8660_v11  ;;  %6197 = vtanh.f32 %v3897_v32 }
 0x44a   : > { %v3707_v63 = vadd.f32 %v9257_v60, %v3668_v22  ;;  %5614 = vmatprep.mubr.msk.f32.mxu1 %vm589_vm0, %v3990_v9  ;;  %6199 = vtanh.f32 %v3896_v53  ;;  %v9644_v22 = vld [vmem:[#allocation16_spill] sm:$0xff] }
 0x44b   : > { %v3706_v36 = vadd.f32 %v9257_v60, %v3667_v42  ;;  %5615 = vmatmul.mubr.msk.f32.gmra.mrb[54].mxu1 %vm589_vm0, %v3991_v40 }
 0x44c   : > { %v3771_v21 = vmul.f32 0.044715, %v3707_v63  ;;  %v3739_v9 = vmul.f32 0.5, %v3707_v63 }
 0x44d   : > { %v3770_v15 = vmul.f32 0.044715, %v3706_v36  ;;  %v3738_v44 = vmul.f32 0.5, %v3706_v36 }
 0x44e   : > { %v3803_v52 = vmul.f32 %v3771_v21, %v3707_v63 }
 0x44f   : > { %v3802_v41 = vmul.f32 %v3770_v15, %v3706_v36 }
 0x450   : > { %v3835_v8 = vmul.f32 %v3803_v52, %v3707_v63 }
 0x451   : > { %v3834_v0 = vmul.f32 %v3802_v41, %v3706_v36 }
 0x452   : > { %v3867_v17 = vadd.f32 %v3835_v8, %v3707_v63 }
 0x453   : > { %v6198_v46 = vpop.eup %6197  ;;  %v3866_v11 = vadd.f32 %v3834_v0, %v3706_v36 }
 0x454   : > { %v6200_v10 = vpop.eup %6199  ;;  %v5561_v55 = vpop.f32.mrb[28].mxu0  ;;  %v3961_v33 = vadd.f32 1.0, %v6198_v46  ;;  %v3899_v31 = vmul.f32 0.7978846, %v3867_v17 }
 0x455   : > { %v3670_v59 = vadd.f32 %v5561_v55, %v8771_v62  ;;  %v3558_v50 = vpop.f32.mrb[29].mxu0  ;;  %v3960_v24 = vadd.f32 1.0, %v6200_v10  ;;  %v3898_v18 = vmul.f32 0.7978846, %v3866_v11 }
 0x456   : > { %v3669_v45 = vadd.f32 %v3558_v50, %v8739_v58  ;;  %6201 = vtanh.f32 %v3899_v31  ;;  %v3993_v34 = vmul.f32 %v3961_v33, %v3737_v29  ;;  %v9646_v29 = vld [vmem:[#allocation18_spill] sm:$0xff] }
 0x457   : > { %v3709_v28 = vadd.f32 %v9257_v60, %v3670_v59  ;;  %v3992_v54 = vmul.f32 %v3960_v24, %v3736_v20  ;;  %6203 = vtanh.f32 %v3898_v18  ;;  %v4640_v24 = vld [vmem:[%s9645_s14] sm:$0xff]  ;;  %v4641_v18 = vld [vmem:[%s9645_s14 + $0x8] sm:$0xff] }
 0x458   : > { %v3708_v3 = vadd.f32 %v9257_v60, %v3669_v45  ;;  %v4642_v45 = vld [vmem:[%s9645_s14 + $0x10] sm:$0xff] }
 0x459   : > { %v3773_v61 = vmul.f32 0.044715, %v3709_v28  ;;  %5617 = vmatprep.mubr.msk.f32.mxu1 %vm589_vm0, %v3992_v54  ;;  %v3741_v20 = vmul.f32 0.5, %v3709_v28 }
 0x45a   : > { %v3772_v13 = vmul.f32 0.044715, %v3708_v3  ;;  %5618 = vmatmul.mubr.msk.f32.gmra.mrb[56].mxu1 %vm589_vm0, %v3993_v34  ;;  %v3740_v33 = vmul.f32 0.5, %v3708_v3 }
 0x45b   : > { %v3805_v62 = vmul.f32 %v3773_v61, %v3709_v28  ;;  %v5813_v61 = vpack.c.bf16 %v4641_v18, %v4640_v24 }
 0x45c   : > { %v3804_v35 = vmul.f32 %v3772_v13, %v3708_v3  ;;  %v9647_v13 = vld [vmem:[#allocation15_spill] sm:$0xff] }
 0x45d   : > { %v3837_v43 = vmul.f32 %v3805_v62, %v3709_v28  ;;  %5814 = vmatprep.subr.bf16.mxu0 %v5813_v61 }
 0x45e   : > { %v3836_v2 = vmul.f32 %v3804_v35, %v3708_v3  ;;  %5816 = vmatpush3.bf16.msra.mxu0 %v5813_v61 }
 0x45f   : > { %v3869_v58 = vadd.f32 %v3837_v43, %v3709_v28  ;;  %v4643_v28 = vld [vmem:[%s9645_s14 + $0x18] sm:$0xff] }
 0x460   : > { %v6202_v27 = vpop.eup %6201  ;;  %v3868_v26 = vadd.f32 %v3836_v2, %v3708_v3  ;;  %v5817_v43 = vpack.c.bf16 %v4643_v28, %v4642_v45  ;;  %v4644_v2 = vld [vmem:[%s9645_s14 + $0x20] sm:$0xff] }
 0x461   : > { %v6204_v19 = vpop.eup %6203  ;;  %v5564_v57 = vpop.f32.mrb[30].mxu0  ;;  %v3963_v1 = vadd.f32 1.0, %v6202_v27  ;;  %v3901_v48 = vmul.f32 0.7978846, %v3869_v58  ;;  %v4645_v58 = vld [vmem:[%s9645_s14 + $0x28] sm:$0xff] }
 0x462   : > { %v3672_v12 = vadd.f32 %v5564_v57, %v9643_v51  ;;  %v3568_v5 = vpop.f32.mrb[31].mxu0  ;;  %v3962_v25 = vadd.f32 1.0, %v6204_v19  ;;  %v3900_v32 = vmul.f32 0.7978846, %v3868_v26  ;;  %5818 = vmatprep.subr.bf16.mxu0 %v5817_v43  ;;  %v5821_v57 = vpack.c.bf16 %v4645_v58, %v4644_v2  ;;  %v4647_v51 = vld [vmem:[%s9645_s14 + $0x38] sm:$0xff] }
 0x463   : > { %v3671_v38 = vadd.f32 %v3568_v5, %v9644_v22  ;;  %6205 = vtanh.f32 %v3901_v48  ;;  %v3995_v21 = vmul.f32 %v3963_v1, %v3739_v9  ;;  %v4646_v48 = vld [vmem:[%s9645_s14 + $0x30] sm:$0xff]  ;;  %5820 = vmatpush3.bf16.msra.mxu0 %v5817_v43  ;;  %v4649_v9 = vld [vmem:[%s9645_s14 + $0x48] sm:$0xff]  ;;  %v4651_v43 = vld [vmem:[%s9645_s14 + $0x58] sm:$0xff] }
 0x464   : > { %v9300_v53 = vadd.f32 %v9257_v60, %v3672_v12  ;;  %v3994_v42 = vmul.f32 %v3962_v25, %v3738_v44  ;;  %6207 = vtanh.f32 %v3900_v32  ;;  %5822 = vmatprep.subr.bf16.mxu0 %v5821_v57  ;;  %v5825_v25 = vpack.c.bf16 %v4647_v51, %v4646_v48  ;;  %v9649_v48 = vld [vmem:[#allocation20_spill] sm:$0xff] }
 0x465   : > { %v3710_v40 = vadd.f32 %v9257_v60, %v3671_v38  ;;  %v4648_v38 = vld [vmem:[%s9645_s14 + $0x40] sm:$0xff] }
 0x466   : > { %v3775_v15 = vmul.f32 0.044715, %v9300_v53  ;;  %5620 = vmatprep.mubr.msk.f32.mxu1 %vm589_vm0, %v3994_v42 }
 0x467   : > { %v3774_v52 = vmul.f32 0.044715, %v3710_v40  ;;  %5621 = vmatmul.mubr.msk.f32.gmra.mrb[58].mxu1 %vm589_vm0, %v3995_v21  ;;  %5824 = vmatpush3.bf16.msra.mxu0 %v5821_v57 }
 0x468   : > { %v3807_v36 = vmul.f32 %v3775_v15, %v9300_v53  ;;  %5826 = vmatprep.subr.bf16.mxu0 %v5825_v25 }
 0x469   : > { %v3806_v41 = vmul.f32 %v3774_v52, %v3710_v40  ;;  %v3742_v52 = vmul.f32 0.5, %v3710_v40 }
 0x46a   : > { %v3839_v63 = vmul.f32 %v3807_v36, %v9300_v53 }
 0x46b   : > { %v3838_v8 = vmul.f32 %v3806_v41, %v3710_v40  ;;  %5828 = vmatpush3.bf16.msra.mxu0 %v5825_v25 }
 0x46c   : > { %v3871_v0 = vadd.f32 %v3839_v63, %v9300_v53  ;;  %v3743_v63 = vmul.f32 0.5, %v9300_v53 }
 0x46d   : > { %v6206_v17 = vpop.eup %6205  ;;  %v3870_v46 = vadd.f32 %v3838_v8, %v3710_v40  ;;  %v9648_v40 = vld [vmem:[#allocation19_spill] sm:$0xff] }
 0x46e   : > { %v6208_v11 = vpop.eup %6207  ;;  %v3965_v10 = vadd.f32 1.0, %v6206_v17  ;;  %v3903_v55 = vmul.f32 0.7978846, %v3871_v0  ;;  %v5829_v0 = vpack.c.bf16 %v4649_v9, %v4648_v38 }
 0x46f   : > { %v3964_v31 = vadd.f32 1.0, %v6208_v11  ;;  %v3902_v59 = vmul.f32 0.7978846, %v3870_v46 }
 0x470   : > { %v5567_v50 = vpop.f32.mrb[32].mxu0  ;;  %6209 = vtanh.f32 %v3903_v55  ;;  %v3997_v35 = vmul.f32 %v3965_v10, %v3741_v20  ;;  %5830 = vmatprep.subr.bf16.mxu0 %v5829_v0 }
 0x471   : > { %v3674_v54 = vadd.f32 %v5567_v50, %v9646_v29  ;;  %v3578_v3 = vpop.f32.mrb[33].mxu0  ;;  %v3996_v34 = vmul.f32 %v3964_v31, %v3740_v33  ;;  %6211 = vtanh.f32 %v3902_v59  ;;  %5832 = vmatpush3.bf16.msra.mxu0 %v5829_v0 }
 0x472   : > { %v3673_v62 = vadd.f32 %v3578_v3, %v9647_v13 }
 0x473   : > { %v9330_v27 = vadd.f32 %v9257_v60, %v3674_v54  ;;  %5623 = vmatprep.mubr.msk.f32.mxu1 %vm589_vm0, %v3996_v34 }
 0x474   : > { %v3712_v26 = vadd.f32 %v9257_v60, %v3673_v62  ;;  %5624 = vmatmul.mubr.msk.f32.gmra.mrb[60].mxu1 %vm589_vm0, %v3997_v35  ;;  %v4650_v35 = vld [vmem:[%s9645_s14 + $0x50] sm:$0xff] }
 0x475   : > { %v3777_v19 = vmul.f32 0.044715, %v9330_v27 }
 0x476   : > { %v3776_v1 = vmul.f32 0.044715, %v3712_v26  ;;  %v3744_v28 = vmul.f32 0.5, %v3712_v26 }
 0x477   : > { %v3809_v12 = vmul.f32 %v3777_v19, %v9330_v27  ;;  %v3745_v19 = vmul.f32 0.5, %v9330_v27 }
 0x478   : > { %v3808_v5 = vmul.f32 %v3776_v1, %v3712_v26  ;;  %v5833_v1 = vpack.c.bf16 %v4651_v43, %v4650_v35 }
 0x479   : > { %v3841_v44 = vmul.f32 %v3809_v12, %v9330_v27 }
 0x47a   : > { %v6210_v32 = vpop.eup %6209  ;;  %v3840_v22 = vmul.f32 %v3808_v5, %v3712_v26  ;;  %5834 = vmatprep.subr.bf16.mxu0 %v5833_v1 }
 0x47b   : > { %v6212_v42 = vpop.eup %6211  ;;  %v3967_v21 = vadd.f32 1.0, %v6210_v32  ;;  %v3873_v15 = vadd.f32 %v3841_v44, %v9330_v27  ;;  %5836 = vmatpush3.bf16.msra.mxu0 %v5833_v1 }
 0x47c   : > { %v3966_v36 = vadd.f32 1.0, %v6212_v42  ;;  %v3872_v41 = vadd.f32 %v3840_v22, %v3712_v26 }
 0x47d   : > { %v3905_v8 = vmul.f32 0.7978846, %v3873_v15  ;;  %v3999_v10 = vmul.f32 %v3967_v21, %v3743_v63 }
 0x47e   : > { %v3998_v17 = vmul.f32 %v3966_v36, %v3742_v52  ;;  %v3904_v46 = vmul.f32 0.7978846, %v3872_v41 }
 0x47f   : > { %v5570_v11 = vpop.f32.mrb[34].mxu0  ;;  %6213 = vtanh.f32 %v3905_v8 }
 0x480   : > { %v3676_v55 = vadd.f32 %v5570_v11, %v8989_v47  ;;  %v3588_v33 = vpop.f32.mrb[35].mxu0  ;;  %5626 = vmatprep.mubr.msk.f32.mxu1 %vm589_vm0, %v3998_v17  ;;  %6215 = vtanh.f32 %v3904_v46 }
 0x481   : > { %v3675_v31 = vadd.f32 %v3588_v33, %v9648_v40  ;;  %5627 = vmatmul.mubr.msk.f32.gmra.mrb[62].mxu1 %vm589_vm0, %v3999_v10 }
 0x482   : > { %v3715_v53 = vadd.f32 %v9257_v60, %v3676_v55 }
 0x483   : > { %v3714_v59 = vadd.f32 %v9257_v60, %v3675_v31 }
 0x484   : > { %v3779_v50 = vmul.f32 0.044715, %v3715_v53  ;;  %v3747_v33 = vmul.f32 0.5, %v3715_v53 }
 0x485   : > { %v3778_v20 = vmul.f32 0.044715, %v3714_v59  ;;  %v3746_v11 = vmul.f32 0.5, %v3714_v59 }
 0x486   : > { %v3811_v24 = vmul.f32 %v3779_v50, %v3715_v53 }
 0x487   : > { %v3810_v18 = vmul.f32 %v3778_v20, %v3714_v59 }
 0x488   : > { %v3843_v47 = vmul.f32 %v3811_v24, %v3715_v53 }
 0x489   : > { %v6214_v45 = vpop.eup %6213  ;;  %v3842_v29 = vmul.f32 %v3810_v18, %v3714_v59 }
 0x48a   : > { %v6216_v54 = vpop.eup %6215  ;;  %v3969_v3 = vadd.f32 1.0, %v6214_v45  ;;  %v3875_v34 = vadd.f32 %v3843_v47, %v3715_v53  ;;  %v4652_v53 = vld [vmem:[%s9645_s14 + $0x60] sm:$0xff] }
 0x48b   : > { %v3968_v13 = vadd.f32 1.0, %v6216_v54  ;;  %v3874_v62 = vadd.f32 %v3842_v29, %v3714_v59  ;;  %v4653_v54 = vld [vmem:[%s9645_s14 + $0x68] sm:$0xff] }
 0x48c   : > { %v5573_v61 = vpop.f32.mrb[36].mxu0  ;;  %v3907_v57 = vmul.f32 0.7978846, %v3875_v34  ;;  %v4001_v44 = vmul.f32 %v3969_v3, %v3745_v19 }
 0x48d   : > { %v3678_v2 = vadd.f32 %v5573_v61, %v9048_v4  ;;  %v3598_v58 = vpop.f32.mrb[37].mxu0  ;;  %v4000_v26 = vmul.f32 %v3968_v13, %v3744_v28  ;;  %v3906_v12 = vmul.f32 0.7978846, %v3874_v62  ;;  %v5837_v13 = vpack.c.bf16 %v4653_v54, %v4652_v53 }
 0x48e   : > { %v3677_v51 = vadd.f32 %v3598_v58, %v9649_v48  ;;  %6217 = vtanh.f32 %v3907_v57 }
 0x48f   : > { %v3717_v5 = vadd.f32 %v9257_v60, %v3678_v2  ;;  %5629 = vmatprep.mubr.msk.f32.mxu1 %vm589_vm0, %v4000_v26  ;;  %6219 = vtanh.f32 %v3906_v12  ;;  %5838 = vmatprep.subr.bf16.mxu0 %v5837_v13 }
 0x490   : > { %v3716_v25 = vadd.f32 %v9257_v60, %v3677_v51  ;;  %5630 = vmatmul.mubr.msk.f32.gmra.mrb[64].mxu1 %vm589_vm0, %v4001_v44  ;;  %5840 = vmatpush3.bf16.msra.mxu0 %v5837_v13 }
 0x491   : > { %v3781_v4 = vmul.f32 0.044715, %v3717_v5  ;;  %v3749_v57 = vmul.f32 0.5, %v3717_v5 }
 0x492   : > { %v3780_v27 = vmul.f32 0.044715, %v3716_v25  ;;  %v3748_v43 = vmul.f32 0.5, %v3716_v25 }
 0x493   : > { %v3813_v32 = vmul.f32 %v3781_v4, %v3717_v5 }
 0x494   : > { %v3812_v22 = vmul.f32 %v3780_v27, %v3716_v25 }
 0x495   : > { %v3845_v38 = vmul.f32 %v3813_v32, %v3717_v5 }
 0x496   : > { %v3844_v9 = vmul.f32 %v3812_v22, %v3716_v25 }
 0x497   : > { %v3877_v42 = vadd.f32 %v3845_v38, %v3717_v5 }
 0x498   : > { %v3876_v21 = vadd.f32 %v3844_v9, %v3716_v25  ;;  %v6218_v15 = vpop.eup %6217 }
 0x499   : > { %v5576_v52 = vpop.f32.mrb[38].mxu0  ;;  %v3909_v36 = vmul.f32 0.7978846, %v3877_v42  ;;  %v6220_v41 = vpop.eup %6219  ;;  %v3971_v0 = vadd.f32 1.0, %v6218_v15 }
 0x49a   : > { %v3680_v63 = vadd.f32 %v5576_v52, %v9112_v16  ;;  %v3608_v8 = vpop.f32.mrb[39].mxu0  ;;  %v3908_v17 = vmul.f32 0.7978846, %v3876_v21  ;;  %v3970_v10 = vadd.f32 1.0, %v6220_v41 }
 0x49b   : > { %v3679_v46 = vadd.f32 %v3608_v8, %v9073_v6  ;;  %6221 = vtanh.f32 %v3909_v36  ;;  %v4003_v20 = vmul.f32 %v3971_v0, %v3747_v33 }
 0x49c   : > { %v3719_v55 = vadd.f32 %v9257_v60, %v3680_v63  ;;  %6223 = vtanh.f32 %v3908_v17  ;;  %v4002_v31 = vmul.f32 %v3970_v10, %v3746_v11 }
 0x49d   : > { %v3718_v40 = vadd.f32 %v9257_v60, %v3679_v46 }
 0x49e   : > { %v3783_v50 = vmul.f32 0.044715, %v3719_v55  ;;  %5632 = vmatprep.mubr.msk.f32.mxu1 %vm589_vm0, %v4002_v31  ;;  %v3751_v8 = vmul.f32 0.5, %v3719_v55 }
 0x49f   : > { %v3782_v24 = vmul.f32 0.044715, %v3718_v40  ;;  %5633 = vmatmul.mubr.msk.f32.gmra.mrb[66].mxu1 %vm589_vm0, %v4003_v20  ;;  %v3750_v52 = vmul.f32 0.5, %v3718_v40 }
 0x4a0   : > { %v3815_v16 = vmul.f32 %v3783_v50, %v3719_v55 }
 0x4a1   : > { %v3814_v18 = vmul.f32 %v3782_v24, %v3718_v40 }
 0x4a2   : > { %v3847_v6 = vmul.f32 %v3815_v16, %v3719_v55 }
 0x4a3   : > { %v3846_v59 = vmul.f32 %v3814_v18, %v3718_v40 }
 0x4a4   : > { %v3879_v47 = vadd.f32 %v3847_v6, %v3719_v55 }
 0x4a5   : > { %v6222_v45 = vpop.eup %6221  ;;  %v3878_v29 = vadd.f32 %v3846_v59, %v3718_v40 }
 0x4a6   : > { %v6224_v3 = vpop.eup %6223  ;;  %v5579_v34 = vpop.f32.mrb[40].mxu0  ;;  %v3973_v61 = vadd.f32 1.0, %v6222_v45  ;;  %v3911_v28 = vmul.f32 0.7978846, %v3879_v47  ;;  %v4654_v45 = vld [vmem:[%s9645_s14 + $0x70] sm:$0xff] }
 0x4a7   : > { %v3682_v62 = vadd.f32 %v5579_v34, %v9181_v7  ;;  %v3618_v35 = vpop.f32.mrb[41].mxu0  ;;  %v3972_v2 = vadd.f32 1.0, %v6224_v3  ;;  %v3910_v58 = vmul.f32 0.7978846, %v3878_v29  ;;  %v4655_v29 = vld [vmem:[%s9645_s14 + $0x78] sm:$0xff] }
 0x4a8   : > { %v3681_v19 = vadd.f32 %v3618_v35, %v9157_v49  ;;  %6225 = vtanh.f32 %v3911_v28  ;;  %v4005_v26 = vmul.f32 %v3973_v61, %v3749_v57  ;;  %v5841_v3 = vpack.c.bf16 %v4655_v29, %v4654_v45 }
 0x4a9   : > { %v3721_v1 = vadd.f32 %v9257_v60, %v3682_v62  ;;  %v4004_v48 = vmul.f32 %v3972_v2, %v3748_v43  ;;  %6227 = vtanh.f32 %v3910_v58 }
 0x4aa   : > { %v3720_v51 = vadd.f32 %v9257_v60, %v3681_v19  ;;  %5842 = vmatprep.subr.bf16.mxu0 %v5841_v3 }
 0x4ab   : > { %v3785_v12 = vmul.f32 0.044715, %v3721_v1  ;;  %5635 = vmatprep.mubr.msk.f32.mxu1 %vm589_vm0, %v4004_v48  ;;  %v3753_v54 = vmul.f32 0.5, %v3721_v1  ;;  %5844 = vmatpush3.bf16.msra.mxu0 %v5841_v3 }
 0x4ac   : > { %v3784_v7 = vmul.f32 0.044715, %v3720_v51  ;;  %5636 = vmatmul.mubr.msk.f32.gmra.mrb[68].mxu1 %vm589_vm0, %v4005_v26  ;;  %v3752_v6 = vmul.f32 0.5, %v3720_v51 }
 0x4ad   : > { %v3817_v44 = vmul.f32 %v3785_v12, %v3721_v1 }
 0x4ae   : > { %v3816_v25 = vmul.f32 %v3784_v7, %v3720_v51 }
 0x4af   : > { %v3849_v49 = vmul.f32 %v3817_v44, %v3721_v1 }
 0x4b0   : > { %v3848_v5 = vmul.f32 %v3816_v25, %v3720_v51 }
 0x4b1   : > { %v3881_v4 = vadd.f32 %v3849_v49, %v3721_v1 }
 0x4b2   : > { %v6226_v27 = vpop.eup %6225  ;;  %v3880_v32 = vadd.f32 %v3848_v5, %v3720_v51 }
 0x4b3   : > { %v6228_v22 = vpop.eup %6227  ;;  %v5582_v38 = vpop.f32.mrb[42].mxu0  ;;  %v3975_v9 = vadd.f32 1.0, %v6226_v27  ;;  %v3913_v42 = vmul.f32 0.7978846, %v3881_v4 }
 0x4b4   : > { %v3684_v21 = vadd.f32 %v5582_v38, %v9229_v30  ;;  %v3628_v15 = vpop.f32.mrb[43].mxu0  ;;  %v3974_v36 = vadd.f32 1.0, %v6228_v22  ;;  %v3912_v41 = vmul.f32 0.7978846, %v3880_v32 }
 0x4b5   : > { %v3683_v63 = vadd.f32 %v3628_v15, %v9210_v39  ;;  %6229 = vtanh.f32 %v3913_v42  ;;  %v4007_v11 = vmul.f32 %v3975_v9, %v3751_v8 }
 0x4b6   : > { %v3723_v0 = vadd.f32 %v9257_v60, %v3684_v21  ;;  %v4006_v17 = vmul.f32 %v3974_v36, %v3750_v52  ;;  %6231 = vtanh.f32 %v3912_v41 }
 0x4b7   : > { %v3722_v46 = vadd.f32 %v9257_v60, %v3683_v63 }
 0x4b8   : > { %v3787_v10 = vmul.f32 0.044715, %v3723_v0  ;;  %5638 = vmatprep.mubr.msk.f32.mxu1 %vm589_vm0, %v4006_v17  ;;  %v3755_v25 = vmul.f32 0.5, %v3723_v0 }
 0x4b9   : > { %v3786_v33 = vmul.f32 0.044715, %v3722_v46  ;;  %5639 = vmatmul.mubr.msk.f32.gmra.mrb[70].mxu1 %vm589_vm0, %v4007_v11  ;;  %v3754_v12 = vmul.f32 0.5, %v3722_v46 }
 0x4ba   : > { %v3819_v30 = vmul.f32 %v3787_v10, %v3723_v0 }
 0x4bb   : > { %v3818_v40 = vmul.f32 %v3786_v33, %v3722_v46 }
 0x4bc   : > { %v3851_v31 = vmul.f32 %v3819_v30, %v3723_v0 }
 0x4bd   : > { %v3850_v50 = vmul.f32 %v3818_v40, %v3722_v46 }
 0x4be   : > { %v3883_v39 = vadd.f32 %v3851_v31, %v3723_v0 }
 0x4bf   : > { %v6230_v55 = vpop.eup %6229  ;;  %v3882_v20 = vadd.f32 %v3850_v50, %v3722_v46 }
 0x4c0   : > { %v6232_v24 = vpop.eup %6231  ;;  %v3977_v16 = vadd.f32 1.0, %v6230_v55  ;;  %v3915_v18 = vmul.f32 0.7978846, %v3883_v39 }
 0x4c1   : > { %v3976_v59 = vadd.f32 1.0, %v6232_v24  ;;  %v3914_v47 = vmul.f32 0.7978846, %v3882_v20 }
 0x4c2   : > { %v5585_v53 = vpop.f32.mrb[44].mxu0  ;;  %6233 = vtanh.f32 %v3915_v18  ;;  %v4009_v62 = vmul.f32 %v3977_v16, %v3753_v54 }
 0x4c3   : > { %v3686_v34 = vadd.f32 %v5585_v53, %v9242_v37  ;;  %v3638_v61 = vpop.f32.mrb[45].mxu0  ;;  %v4008_v28 = vmul.f32 %v3976_v59, %v3752_v6  ;;  %6235 = vtanh.f32 %v3914_v47  ;;  %v9420_v59 = vld [vmem:[%s9650_s18] ss:$0 sm:$0xff]  ;;  %s6450_s18 = scalar_lea.vmem %s9531_s30, 4096 }
 0x4c4   : > { %v3685_v13 = vadd.f32 %v3638_v61, %v9237_v23  ;;  %p6451_p11 = scmp.ne.s32.totalorder %s9531_s30, %s6450_s18 }
 0x4c5   : > { %v3725_v35 = vadd.f32 %v9257_v60, %v3686_v34  ;;  %5641 = vmatprep.mubr.msk.f32.mxu1 %vm589_vm0, %v4008_v28 }
 0x4c6   : > { %v3724_v43 = vadd.f32 %v9257_v60, %v3685_v13  ;;  %5642 = vmatmul.mubr.msk.f32.gmra.mrb[72].mxu1 %vm589_vm0, %v4009_v62  ;;  %p6452_p2 = pnand %p6451_p11, %p9653_p0 }
 0x4c7   : > { %v3789_v2 = vmul.f32 0.044715, %v3725_v35 }
 0x4c8   : > { %v3788_v58 = vmul.f32 0.044715, %v3724_v43  ;;  %v3756_v11 = vmul.f32 0.5, %v3724_v43  ;;  %p6453_p3 = pneg %p6452_p2 }
 0x4c9   : > { %v3821_v19 = vmul.f32 %v3789_v2, %v3725_v35 }
 0x4ca   : > { %v3820_v37 = vmul.f32 %v3788_v58, %v3724_v43 }
 0x4cb   : > { %v3853_v57 = vmul.f32 %v3821_v19, %v3725_v35 }
 0x4cc   : > { %v6234_v1 = vpop.eup %6233  ;;  %v3852_v48 = vmul.f32 %v3820_v37, %v3724_v43 }
 0x4cd   : > { %v6236_v51 = vpop.eup %6235  ;;  %v3979_v23 = vadd.f32 1.0, %v6234_v1  ;;  %v3885_v26 = vadd.f32 %v3853_v57, %v3725_v35 }
 0x4ce   : > { %v3978_v7 = vadd.f32 1.0, %v6236_v51  ;;  %v3884_v44 = vadd.f32 %v3852_v48, %v3724_v43 }
 0x4cf   : > { %v3917_v49 = vmul.f32 0.7978846, %v3885_v26  ;;  %v5588_v27 = vpop.f32.mrb[46].mxu0  ;;  %v4011_v32 = vmul.f32 %v3979_v23, %v3755_v25 }
 0x4d0   : > { %v4010_v5 = vmul.f32 %v3978_v7, %v3754_v12  ;;  %v3916_v4 = vmul.f32 0.7978846, %v3884_v44  ;;  %v3688_v22 = vadd.f32 %v5588_v27, %v9250_v56  ;;  %v3648_v38 = vpop.f32.mrb[47].mxu0 }
 0x4d1   : > { %6237 = vtanh.f32 %v3917_v49  ;;  %v3687_v9 = vadd.f32 %v3648_v38, %v9246_v14  ;;  %v3757_v14 = vmul.f32 0.5, %v3725_v35 }
 0x4d2   : > { %5644 = vmatprep.mubr.msk.f32.mxu1 %vm589_vm0, %v4010_v5  ;;  %6239 = vtanh.f32 %v3916_v4  ;;  %v3727_v42 = vadd.f32 %v9257_v60, %v3688_v22 }
 0x4d3   : > { %5645 = vmatmul.mubr.msk.f32.gmra.mrb[74].mxu1 %vm589_vm0, %v4011_v32  ;;  %v3726_v21 = vadd.f32 %v9257_v60, %v3687_v9 }
 0x4d4   : > { %v3791_v15 = vmul.f32 0.044715, %v3727_v42  ;;  %v3759_v16 = vmul.f32 0.5, %v3727_v42 }
 0x4d5   : > { %v3790_v52 = vmul.f32 0.044715, %v3726_v21  ;;  %v3758_v20 = vmul.f32 0.5, %v3726_v21 }
 0x4d6   : > { %v3823_v36 = vmul.f32 %v3791_v15, %v3727_v42 }
 0x4d7   : > { %v3822_v41 = vmul.f32 %v3790_v52, %v3726_v21 }
 0x4d8   : > { %v3855_v63 = vmul.f32 %v3823_v36, %v3727_v42 }
 0x4d9   : > { %v3854_v0 = vmul.f32 %v3822_v41, %v3726_v21 }
 0x4da   : > { %v3887_v46 = vadd.f32 %v3855_v63, %v3727_v42 }
 0x4db   : > { %v6238_v8 = vpop.eup %6237  ;;  %v3886_v33 = vadd.f32 %v3854_v0, %v3726_v21 }
 0x4dc   : > { %v6240_v56 = vpop.eup %6239  ;;  %v3981_v17 = vadd.f32 1.0, %v6238_v8  ;;  %v3919_v30 = vmul.f32 0.7978846, %v3887_v46 }
 0x4dd   : > { %v3980_v10 = vadd.f32 1.0, %v6240_v56  ;;  %v3918_v31 = vmul.f32 0.7978846, %v3886_v33 }
 0x4de   : > { %v4013_v50 = vmul.f32 %v3981_v17, %v3757_v14  ;;  %6241 = vtanh.f32 %v3919_v30 }
 0x4df   : > { %v4012_v40 = vmul.f32 %v3980_v10, %v3756_v11  ;;  %6243 = vtanh.f32 %v3918_v31 }
 0x4e1   : > { %5647 = vmatprep.mubr.msk.f32.mxu1 %vm589_vm0, %v4012_v40 }
 0x4e2   : > { %5648 = vmatmul.mubr.msk.f32.gmra.mrb[76].mxu1 %vm589_vm0, %v4013_v50 }
 0x4e8   : > { %v6242_v60 = vpop.eup %6241 }
 0x4e9   : > { %v6244_v39 = vpop.eup %6243  ;;  %v3983_v55 = vadd.f32 1.0, %v6242_v60 }
 0x4ea   : > { %v3982_v24 = vadd.f32 1.0, %v6244_v39 }
 0x4eb   : > { %v4015_v6 = vmul.f32 %v3983_v55, %v3759_v16 }
 0x4ec   : > { %v4014_v18 = vmul.f32 %v3982_v24, %v3758_v20 }
 0x4ee   : > { %5650 = vmatprep.mubr.msk.f32.mxu1 %vm589_vm0, %v4014_v18 }
 0x4ef   : > { %5651 = vmatmul.mubr.msk.f32.gmra.mrb[78].mxu1 %vm589_vm0, %v4015_v6 }
 0x4f6   : > { %v5607_v47 = vpop.f32.mrb[48].mxu1 }
 0x4f7   : > { %v4199_v45 = vadd.f32 %v5607_v47, %v9420_v59  ;;  %v4193_v29 = vpop.f32.mrb[49].mxu1 }
 0x4f8   : > { %v4194_v53 = vadd.f32 %v9420_v59, %v4193_v29 }
 0x4f9   : > { %v4385_v54 = vmul.f32 0.044715, %v4199_v45  ;;  %v4353_v32 = vmul.f32 0.5, %v4199_v45 }
 0x4fa   : > { %v4384_v3 = vmul.f32 0.044715, %v4194_v53  ;;  %v4352_v5 = vmul.f32 0.5, %v4194_v53 }
 0x4fb   : > { %v4417_v34 = vmul.f32 %v4385_v54, %v4199_v45 }
 0x4fc   : > { %v4416_v61 = vmul.f32 %v4384_v3, %v4194_v53 }
 0x4fd   : > { %v4449_v28 = vmul.f32 %v4417_v34, %v4199_v45 }
 0x4fe   : > { %v4448_v13 = vmul.f32 %v4416_v61, %v4194_v53 }
 0x4ff   : > { %v4481_v62 = vadd.f32 %v4449_v28, %v4199_v45 }
 0x500   : > { %v4480_v35 = vadd.f32 %v4448_v13, %v4194_v53 }
 0x501   : > { %v4513_v43 = vmul.f32 0.7978846, %v4481_v62 }
 0x502   : > { %v4512_v2 = vmul.f32 0.7978846, %v4480_v35 }
 0x503   : > { %6245 = vtanh.f32 %v4513_v43 }
 0x504   : > { %6247 = vtanh.f32 %v4512_v2 }
 0x506   : > { %v5610_v58 = vpop.f32.mrb[50].mxu1 }
 0x507   : > { %v4209_v19 = vadd.f32 %v5610_v58, %v9420_v59  ;;  %v4203_v37 = vpop.f32.mrb[51].mxu1 }
 0x508   : > { %v4204_v57 = vadd.f32 %v9420_v59, %v4203_v37 }
 0x509   : > { %v4387_v1 = vmul.f32 0.044715, %v4209_v19  ;;  %v4355_v20 = vmul.f32 0.5, %v4209_v19 }
 0x50a   : > { %v4386_v48 = vmul.f32 0.044715, %v4204_v57  ;;  %v4354_v31 = vmul.f32 0.5, %v4204_v57 }
 0x50b   : > { %v4419_v51 = vmul.f32 %v4387_v1, %v4209_v19 }
 0x50c   : > { %v4418_v23 = vmul.f32 %v4386_v48, %v4204_v57 }
 0x50d   : > { %v4451_v26 = vmul.f32 %v4419_v51, %v4209_v19  ;;  %v6246_v12 = vpop.eup %6245 }
 0x50e   : > { %v4450_v7 = vmul.f32 %v4418_v23, %v4204_v57  ;;  %v6248_v44 = vpop.eup %6247  ;;  %v4577_v25 = vadd.f32 1.0, %v6246_v12 }
 0x50f   : > { %v4483_v49 = vadd.f32 %v4451_v26, %v4209_v19  ;;  %v4576_v4 = vadd.f32 1.0, %v6248_v44 }
 0x510   : > { %v4482_v27 = vadd.f32 %v4450_v7, %v4204_v57  ;;  %v4609_v21 = vmul.f32 %v4577_v25, %v4353_v32 }
 0x511   : > { %v4515_v22 = vmul.f32 0.7978846, %v4483_v49  ;;  %v4608_v38 = vmul.f32 %v4576_v4, %v4352_v5 }
 0x512   : > { %v4514_v9 = vmul.f32 0.7978846, %v4482_v27  ;;  %v5613_v42 = vpop.f32.mrb[52].mxu1 }
 0x513   : > { %6249 = vtanh.f32 %v4515_v22  ;;  %v4219_v15 = vadd.f32 %v5613_v42, %v9420_v59  ;;  %v4213_v52 = vpop.f32.mrb[53].mxu1  ;;  %5685 = vmatprep.mubr.f32.mxu0 %v4608_v38 }
 0x514   : > { %6251 = vtanh.f32 %v4514_v9  ;;  %v4214_v36 = vadd.f32 %v9420_v59, %v4213_v52  ;;  %5686 = vmatmul.mubr.f32.vlgmr.msra.gmra.mrb[48].mxu0 %v4609_v21 }
 0x515   : > { %v4389_v41 = vmul.f32 0.044715, %v4219_v15  ;;  %v4357_v58 = vmul.f32 0.5, %v4219_v15 }
 0x516   : > { %v4388_v63 = vmul.f32 0.044715, %v4214_v36  ;;  %v4356_v43 = vmul.f32 0.5, %v4214_v36 }
 0x517   : > { %v4421_v8 = vmul.f32 %v4389_v41, %v4219_v15 }
 0x518   : > { %v4420_v0 = vmul.f32 %v4388_v63, %v4214_v36 }
 0x519   : > { %v4453_v56 = vmul.f32 %v4421_v8, %v4219_v15 }
 0x51a   : > { %v4452_v17 = vmul.f32 %v4420_v0, %v4214_v36 }
 0x51b   : > { %v4485_v46 = vadd.f32 %v4453_v56, %v4219_v15 }
 0x51c   : > { %v4484_v10 = vadd.f32 %v4452_v17, %v4214_v36 }
 0x51d   : > { %v6250_v11 = vpop.eup %6249  ;;  %v4517_v30 = vmul.f32 0.7978846, %v4485_v46 }
 0x51e   : > { %v6252_v33 = vpop.eup %6251  ;;  %v4579_v14 = vadd.f32 1.0, %v6250_v11  ;;  %v5616_v40 = vpop.f32.mrb[54].mxu1  ;;  %v4516_v60 = vmul.f32 0.7978846, %v4484_v10 }
 0x51f   : > { %v4578_v50 = vadd.f32 1.0, %v6252_v33  ;;  %v4229_v39 = vadd.f32 %v5616_v40, %v9420_v59  ;;  %v4223_v55 = vpop.f32.mrb[55].mxu1  ;;  %6253 = vtanh.f32 %v4517_v30 }
 0x520   : > { %v4224_v24 = vadd.f32 %v9420_v59, %v4223_v55  ;;  %6255 = vtanh.f32 %v4516_v60  ;;  %v4611_v6 = vmul.f32 %v4579_v14, %v4355_v20 }
 0x521   : > { %v4610_v16 = vmul.f32 %v4578_v50, %v4354_v31  ;;  %v4391_v18 = vmul.f32 0.044715, %v4229_v39  ;;  %v4359_v9 = vmul.f32 0.5, %v4229_v39 }
 0x522   : > { %v4390_v47 = vmul.f32 0.044715, %v4224_v24  ;;  %v4358_v32 = vmul.f32 0.5, %v4224_v24 }
 0x523   : > { %5688 = vmatprep.mubr.f32.mxu0 %v4610_v16  ;;  %v4423_v45 = vmul.f32 %v4391_v18, %v4229_v39 }
 0x524   : > { %5689 = vmatmul.mubr.f32.gmra.mrb[50].mxu0 %v4611_v6  ;;  %v4422_v29 = vmul.f32 %v4390_v47, %v4224_v24 }
 0x525   : > { %v4455_v53 = vmul.f32 %v4423_v45, %v4229_v39 }
 0x526   : > { %v4454_v54 = vmul.f32 %v4422_v29, %v4224_v24 }
 0x527   : > { %v4487_v3 = vadd.f32 %v4455_v53, %v4229_v39 }
 0x528   : > { %v4486_v34 = vadd.f32 %v4454_v54, %v4224_v24 }
 0x529   : > { %v6254_v61 = vpop.eup %6253  ;;  %v4519_v28 = vmul.f32 0.7978846, %v4487_v3 }
 0x52a   : > { %v6256_v13 = vpop.eup %6255  ;;  %v4581_v62 = vadd.f32 1.0, %v6254_v61  ;;  %v4518_v35 = vmul.f32 0.7978846, %v4486_v34 }
 0x52b   : > { %v4580_v2 = vadd.f32 1.0, %v6256_v13  ;;  %6257 = vtanh.f32 %v4519_v28 }
 0x52c   : > { %6259 = vtanh.f32 %v4518_v35  ;;  %v4613_v48 = vmul.f32 %v4581_v62, %v4357_v58 }
 0x52d   : > { %v5619_v19 = vpop.f32.mrb[56].mxu1  ;;  %v4612_v37 = vmul.f32 %v4580_v2, %v4356_v43 }
 0x52e   : > { %v4239_v57 = vadd.f32 %v5619_v19, %v9420_v59  ;;  %v4233_v1 = vpop.f32.mrb[57].mxu1 }
 0x52f   : > { %v4234_v51 = vadd.f32 %v9420_v59, %v4233_v1  ;;  %5691 = vmatprep.mubr.f32.mxu0 %v4612_v37 }
 0x530   : > { %v4393_v23 = vmul.f32 0.044715, %v4239_v57  ;;  %5692 = vmatmul.mubr.f32.gmra.mrb[52].mxu0 %v4613_v48  ;;  %v4361_v24 = vmul.f32 0.5, %v4239_v57 }
 0x531   : > { %v4392_v26 = vmul.f32 0.044715, %v4234_v51  ;;  %v4360_v60 = vmul.f32 0.5, %v4234_v51 }
 0x532   : > { %v4425_v12 = vmul.f32 %v4393_v23, %v4239_v57 }
 0x533   : > { %v4424_v7 = vmul.f32 %v4392_v26, %v4234_v51 }
 0x534   : > { %v4457_v44 = vmul.f32 %v4425_v12, %v4239_v57 }
 0x535   : > { %v6258_v25 = vpop.eup %6257  ;;  %v4456_v49 = vmul.f32 %v4424_v7, %v4234_v51 }
 0x536   : > { %v6260_v5 = vpop.eup %6259  ;;  %v4583_v4 = vadd.f32 1.0, %v6258_v25  ;;  %v4489_v27 = vadd.f32 %v4457_v44, %v4239_v57 }
 0x537   : > { %v4582_v22 = vadd.f32 1.0, %v6260_v5  ;;  %v4488_v38 = vadd.f32 %v4456_v49, %v4234_v51 }
 0x538   : > { %v4521_v42 = vmul.f32 0.7978846, %v4489_v27  ;;  %v4615_v36 = vmul.f32 %v4583_v4, %v4359_v9 }
 0x539   : > { %v4614_v21 = vmul.f32 %v4582_v22, %v4358_v32  ;;  %v4520_v15 = vmul.f32 0.7978846, %v4488_v38 }
 0x53a   : > { %v5622_v52 = vpop.f32.mrb[58].mxu1  ;;  %6261 = vtanh.f32 %v4521_v42 }
 0x53b   : > { %v4249_v41 = vadd.f32 %v5622_v52, %v9420_v59  ;;  %v4243_v63 = vpop.f32.mrb[59].mxu1  ;;  %5694 = vmatprep.mubr.f32.mxu0 %v4614_v21  ;;  %6263 = vtanh.f32 %v4520_v15 }
 0x53c   : > { %v4244_v8 = vadd.f32 %v9420_v59, %v4243_v63  ;;  %5695 = vmatmul.mubr.f32.gmra.mrb[54].mxu0 %v4615_v36 }
 0x53d   : > { %v4395_v0 = vmul.f32 0.044715, %v4249_v41  ;;  %v4363_v1 = vmul.f32 0.5, %v4249_v41 }
 0x53e   : > { %v4394_v56 = vmul.f32 0.044715, %v4244_v8  ;;  %v4362_v58 = vmul.f32 0.5, %v4244_v8 }
 0x53f   : > { %v4427_v17 = vmul.f32 %v4395_v0, %v4249_v41 }
 0x540   : > { %v4426_v46 = vmul.f32 %v4394_v56, %v4244_v8 }
 0x541   : > { %v4459_v11 = vmul.f32 %v4427_v17, %v4249_v41 }
 0x542   : > { %v4458_v10 = vmul.f32 %v4426_v46, %v4244_v8 }
 0x543   : > { %v4491_v33 = vadd.f32 %v4459_v11, %v4249_v41 }
 0x544   : > { %v6262_v14 = vpop.eup %6261  ;;  %v4490_v30 = vadd.f32 %v4458_v10, %v4244_v8 }
 0x545   : > { %v6264_v40 = vpop.eup %6263  ;;  %v4585_v31 = vadd.f32 1.0, %v6262_v14  ;;  %v4523_v50 = vmul.f32 0.7978846, %v4491_v33 }
 0x546   : > { %v4584_v39 = vadd.f32 1.0, %v6264_v40  ;;  %v4522_v55 = vmul.f32 0.7978846, %v4490_v30 }
 0x547   : > { %v5625_v20 = vpop.f32.mrb[60].mxu1  ;;  %6265 = vtanh.f32 %v4523_v50  ;;  %v4617_v45 = vmul.f32 %v4585_v31, %v4361_v24 }
 0x548   : > { %v4259_v16 = vadd.f32 %v5625_v20, %v9420_v59  ;;  %v4253_v18 = vpop.f32.mrb[61].mxu1  ;;  %v4616_v6 = vmul.f32 %v4584_v39, %v4360_v60  ;;  %6267 = vtanh.f32 %v4522_v55 }
 0x549   : > { %v4254_v47 = vadd.f32 %v9420_v59, %v4253_v18 }
 0x54a   : > { %v4397_v29 = vmul.f32 0.044715, %v4259_v16  ;;  %5697 = vmatprep.mubr.f32.mxu0 %v4616_v6  ;;  %v4365_v36 = vmul.f32 0.5, %v4259_v16 }
 0x54b   : > { %v4396_v53 = vmul.f32 0.044715, %v4254_v47  ;;  %5698 = vmatmul.mubr.f32.gmra.mrb[56].mxu0 %v4617_v45  ;;  %v4364_v21 = vmul.f32 0.5, %v4254_v47 }
 0x54c   : > { %v4429_v54 = vmul.f32 %v4397_v29, %v4259_v16 }
 0x54d   : > { %v4428_v3 = vmul.f32 %v4396_v53, %v4254_v47 }
 0x54e   : > { %v4461_v34 = vmul.f32 %v4429_v54, %v4259_v16 }
 0x54f   : > { %v4460_v61 = vmul.f32 %v4428_v3, %v4254_v47 }
 0x550   : > { %v4493_v28 = vadd.f32 %v4461_v34, %v4259_v16 }
 0x551   : > { %v6266_v13 = vpop.eup %6265  ;;  %v4492_v62 = vadd.f32 %v4460_v61, %v4254_v47 }
 0x552   : > { %v6268_v35 = vpop.eup %6267  ;;  %v4587_v43 = vadd.f32 1.0, %v6266_v13  ;;  %v4525_v2 = vmul.f32 0.7978846, %v4493_v28 }
 0x553   : > { %v4586_v19 = vadd.f32 1.0, %v6268_v35  ;;  %v4524_v37 = vmul.f32 0.7978846, %v4492_v62 }
 0x554   : > { %v5628_v57 = vpop.f32.mrb[62].mxu1  ;;  %6269 = vtanh.f32 %v4525_v2  ;;  %v4619_v12 = vmul.f32 %v4587_v43, %v4363_v1 }
 0x555   : > { %v4269_v48 = vadd.f32 %v5628_v57, %v9420_v59  ;;  %v4263_v51 = vpop.f32.mrb[63].mxu1  ;;  %v4618_v23 = vmul.f32 %v4586_v19, %v4362_v58  ;;  %6271 = vtanh.f32 %v4524_v37 }
 0x556   : > { %v4264_v26 = vadd.f32 %v9420_v59, %v4263_v51 }
 0x557   : > { %v4399_v7 = vmul.f32 0.044715, %v4269_v48  ;;  %5700 = vmatprep.mubr.f32.mxu0 %v4618_v23  ;;  %v4367_v24 = vmul.f32 0.5, %v4269_v48 }
 0x558   : > { %v4398_v44 = vmul.f32 0.044715, %v4264_v26  ;;  %5701 = vmatmul.mubr.f32.gmra.mrb[58].mxu0 %v4619_v12  ;;  %v4366_v39 = vmul.f32 0.5, %v4264_v26 }
 0x559   : > { %v4431_v25 = vmul.f32 %v4399_v7, %v4269_v48 }
 0x55a   : > { %v4430_v49 = vmul.f32 %v4398_v44, %v4264_v26 }
 0x55b   : > { %v4463_v5 = vmul.f32 %v4431_v25, %v4269_v48 }
 0x55c   : > { %v4462_v4 = vmul.f32 %v4430_v49, %v4264_v26 }
 0x55d   : > { %v4495_v27 = vadd.f32 %v4463_v5, %v4269_v48 }
 0x55e   : > { %v6270_v32 = vpop.eup %6269  ;;  %v4494_v22 = vadd.f32 %v4462_v4, %v4264_v26 }
 0x55f   : > { %v6272_v38 = vpop.eup %6271  ;;  %v4589_v9 = vadd.f32 1.0, %v6270_v32  ;;  %v4527_v42 = vmul.f32 0.7978846, %v4495_v27 }
 0x560   : > { %v4588_v15 = vadd.f32 1.0, %v6272_v38  ;;  %v4526_v52 = vmul.f32 0.7978846, %v4494_v22 }
 0x561   : > { %6273 = vtanh.f32 %v4527_v42  ;;  %v4621_v8 = vmul.f32 %v4589_v9, %v4365_v36 }
 0x562   : > { %v4620_v41 = vmul.f32 %v4588_v15, %v4364_v21  ;;  %6275 = vtanh.f32 %v4526_v52 }
 0x563   : > { %v5631_v63 = vpop.f32.mrb[64].mxu1 }
 0x564   : > { %v4279_v0 = vadd.f32 %v5631_v63, %v9420_v59  ;;  %v4273_v56 = vpop.f32.mrb[65].mxu1  ;;  %5703 = vmatprep.mubr.f32.mxu0 %v4620_v41 }
 0x565   : > { %v4274_v17 = vadd.f32 %v9420_v59, %v4273_v56  ;;  %5704 = vmatmul.mubr.f32.gmra.mrb[60].mxu0 %v4621_v8 }
 0x566   : > { %v4401_v46 = vmul.f32 0.044715, %v4279_v0  ;;  %v4369_v1 = vmul.f32 0.5, %v4279_v0 }
 0x567   : > { %v4400_v11 = vmul.f32 0.044715, %v4274_v17  ;;  %v4368_v19 = vmul.f32 0.5, %v4274_v17 }
 0x568   : > { %v4433_v10 = vmul.f32 %v4401_v46, %v4279_v0 }
 0x569   : > { %v4432_v33 = vmul.f32 %v4400_v11, %v4274_v17 }
 0x56a   : > { %v4465_v14 = vmul.f32 %v4433_v10, %v4279_v0 }
 0x56b   : > { %v6274_v30 = vpop.eup %6273  ;;  %v4464_v40 = vmul.f32 %v4432_v33, %v4274_v17 }
 0x56c   : > { %v6276_v31 = vpop.eup %6275  ;;  %v4591_v50 = vadd.f32 1.0, %v6274_v30  ;;  %v4497_v60 = vadd.f32 %v4465_v14, %v4279_v0 }
 0x56d   : > { %v4590_v55 = vadd.f32 1.0, %v6276_v31  ;;  %v4496_v20 = vadd.f32 %v4464_v40, %v4274_v17 }
 0x56e   : > { %v4529_v16 = vmul.f32 0.7978846, %v4497_v60  ;;  %v4623_v47 = vmul.f32 %v4591_v50, %v4367_v24 }
 0x56f   : > { %v4622_v18 = vmul.f32 %v4590_v55, %v4366_v39  ;;  %v4528_v6 = vmul.f32 0.7978846, %v4496_v20 }
 0x570   : > { %6277 = vtanh.f32 %v4529_v16 }
 0x571   : > { %5706 = vmatprep.mubr.f32.mxu0 %v4622_v18  ;;  %6279 = vtanh.f32 %v4528_v6 }
 0x572   : > { %v5634_v45 = vpop.f32.mrb[66].mxu1  ;;  %5707 = vmatmul.mubr.f32.gmra.mrb[62].mxu0 %v4623_v47 }
 0x573   : > { %v4289_v29 = vadd.f32 %v5634_v45, %v9420_v59  ;;  %v4283_v53 = vpop.f32.mrb[67].mxu1 }
 0x574   : > { %v4284_v54 = vadd.f32 %v9420_v59, %v4283_v53 }
 0x575   : > { %v4403_v3 = vmul.f32 0.044715, %v4289_v29  ;;  %v4371_v17 = vmul.f32 0.5, %v4289_v29 }
 0x576   : > { %v4402_v34 = vmul.f32 0.044715, %v4284_v54  ;;  %v4370_v63 = vmul.f32 0.5, %v4284_v54 }
 0x577   : > { %v4435_v61 = vmul.f32 %v4403_v3, %v4289_v29 }
 0x578   : > { %v4434_v28 = vmul.f32 %v4402_v34, %v4284_v54 }
 0x579   : > { %v4467_v13 = vmul.f32 %v4435_v61, %v4289_v29 }
 0x57a   : > { %v6278_v62 = vpop.eup %6277  ;;  %v4466_v35 = vmul.f32 %v4434_v28, %v4284_v54 }
 0x57b   : > { %v6280_v43 = vpop.eup %6279  ;;  %v4593_v2 = vadd.f32 1.0, %v6278_v62  ;;  %v4499_v58 = vadd.f32 %v4467_v13, %v4289_v29 }
 0x57c   : > { %v4592_v37 = vadd.f32 1.0, %v6280_v43  ;;  %v4498_v57 = vadd.f32 %v4466_v35, %v4284_v54 }
 0x57d   : > { %v4531_v48 = vmul.f32 0.7978846, %v4499_v58  ;;  %v4625_v44 = vmul.f32 %v4593_v2, %v4369_v1 }
 0x57e   : > { %v4624_v23 = vmul.f32 %v4592_v37, %v4368_v19  ;;  %v4530_v26 = vmul.f32 0.7978846, %v4498_v57 }
 0x57f   : > { %v5637_v51 = vpop.f32.mrb[68].mxu1  ;;  %6281 = vtanh.f32 %v4531_v48 }
 0x580   : > { %v4299_v12 = vadd.f32 %v5637_v51, %v9420_v59  ;;  %v4293_v7 = vpop.f32.mrb[69].mxu1  ;;  %5709 = vmatprep.mubr.f32.mxu0 %v4624_v23  ;;  %6283 = vtanh.f32 %v4530_v26 }
 0x581   : > { %v4294_v25 = vadd.f32 %v9420_v59, %v4293_v7  ;;  %5710 = vmatmul.mubr.f32.gmra.mrb[64].mxu0 %v4625_v44 }
 0x582   : > { %v4405_v49 = vmul.f32 0.044715, %v4299_v12  ;;  %v4373_v29 = vmul.f32 0.5, %v4299_v12 }
 0x583   : > { %v4404_v5 = vmul.f32 0.044715, %v4294_v25  ;;  %v4372_v18 = vmul.f32 0.5, %v4294_v25 }
 0x584   : > { %v4437_v4 = vmul.f32 %v4405_v49, %v4299_v12 }
 0x585   : > { %v4436_v27 = vmul.f32 %v4404_v5, %v4294_v25 }
 0x586   : > { %v4469_v32 = vmul.f32 %v4437_v4, %v4299_v12 }
 0x587   : > { %v4468_v22 = vmul.f32 %v4436_v27, %v4294_v25 }
 0x588   : > { %v4501_v38 = vadd.f32 %v4469_v32, %v4299_v12 }
 0x589   : > { %v4500_v9 = vadd.f32 %v4468_v22, %v4294_v25  ;;  %v6282_v42 = vpop.eup %6281 }
 0x58a   : > { %v4533_v21 = vmul.f32 0.7978846, %v4501_v38  ;;  %v6284_v15 = vpop.eup %6283  ;;  %v4595_v52 = vadd.f32 1.0, %v6282_v42 }
 0x58b   : > { %v4532_v36 = vmul.f32 0.7978846, %v4500_v9  ;;  %v4594_v8 = vadd.f32 1.0, %v6284_v15 }
 0x58c   : > { %v5640_v41 = vpop.f32.mrb[70].mxu1  ;;  %6285 = vtanh.f32 %v4533_v21  ;;  %v4627_v33 = vmul.f32 %v4595_v52, %v4371_v17 }
 0x58d   : > { %v4309_v0 = vadd.f32 %v5640_v41, %v9420_v59  ;;  %v4303_v56 = vpop.f32.mrb[71].mxu1  ;;  %6287 = vtanh.f32 %v4532_v36  ;;  %v4626_v11 = vmul.f32 %v4594_v8, %v4370_v63 }
 0x58e   : > { %v4304_v46 = vadd.f32 %v9420_v59, %v4303_v56 }
 0x58f   : > { %v4407_v10 = vmul.f32 0.044715, %v4309_v0  ;;  %5712 = vmatprep.mubr.f32.mxu0 %v4626_v11  ;;  %v4375_v7 = vmul.f32 0.5, %v4309_v0 }
 0x590   : > { %v4406_v14 = vmul.f32 0.044715, %v4304_v46  ;;  %5713 = vmatmul.mubr.f32.gmra.mrb[66].mxu0 %v4627_v33  ;;  %v4374_v51 = vmul.f32 0.5, %v4304_v46 }
 0x591   : > { %v4439_v30 = vmul.f32 %v4407_v10, %v4309_v0 }
 0x592   : > { %v4438_v40 = vmul.f32 %v4406_v14, %v4304_v46 }
 0x593   : > { %v4471_v31 = vmul.f32 %v4439_v30, %v4309_v0 }
 0x594   : > { %v4470_v50 = vmul.f32 %v4438_v40, %v4304_v46 }
 0x595   : > { %v4503_v60 = vadd.f32 %v4471_v31, %v4309_v0 }
 0x596   : > { %v6286_v39 = vpop.eup %6285  ;;  %v4502_v55 = vadd.f32 %v4470_v50, %v4304_v46 }
 0x597   : > { %v6288_v20 = vpop.eup %6287  ;;  %v4597_v24 = vadd.f32 1.0, %v6286_v39  ;;  %v4535_v16 = vmul.f32 0.7978846, %v4503_v60 }
 0x598   : > { %v4596_v6 = vadd.f32 1.0, %v6288_v20  ;;  %v4534_v47 = vmul.f32 0.7978846, %v4502_v55 }
 0x599   : > { %v5643_v45 = vpop.f32.mrb[72].mxu1  ;;  %6289 = vtanh.f32 %v4535_v16  ;;  %v4629_v61 = vmul.f32 %v4597_v24, %v4373_v29 }
 0x59a   : > { %v4319_v53 = vadd.f32 %v5643_v45, %v9420_v59  ;;  %v4313_v54 = vpop.f32.mrb[73].mxu1  ;;  %v4628_v3 = vmul.f32 %v4596_v6, %v4372_v18  ;;  %6291 = vtanh.f32 %v4534_v47 }
 0x59b   : > { %v4314_v34 = vadd.f32 %v9420_v59, %v4313_v54 }
 0x59c   : > { %v4409_v28 = vmul.f32 0.044715, %v4319_v53  ;;  %5715 = vmatprep.mubr.f32.mxu0 %v4628_v3  ;;  %v4377_v17 = vmul.f32 0.5, %v4319_v53 }
 0x59d   : > { %v4408_v13 = vmul.f32 0.044715, %v4314_v34  ;;  %5716 = vmatmul.mubr.f32.gmra.mrb[68].mxu0 %v4629_v61  ;;  %v4376_v8 = vmul.f32 0.5, %v4314_v34 }
 0x59e   : > { %v4441_v62 = vmul.f32 %v4409_v28, %v4319_v53 }
 0x59f   : > { %v4440_v35 = vmul.f32 %v4408_v13, %v4314_v34 }
 0x5a0   : > { %v4473_v43 = vmul.f32 %v4441_v62, %v4319_v53 }
 0x5a1   : > { %v4472_v2 = vmul.f32 %v4440_v35, %v4314_v34 }
 0x5a2   : > { %v4505_v58 = vadd.f32 %v4473_v43, %v4319_v53 }
 0x5a3   : > { %v6290_v19 = vpop.eup %6289  ;;  %v4504_v37 = vadd.f32 %v4472_v2, %v4314_v34 }
 0x5a4   : > { %v6292_v57 = vpop.eup %6291  ;;  %v4599_v1 = vadd.f32 1.0, %v6290_v19  ;;  %v4537_v48 = vmul.f32 0.7978846, %v4505_v58 }
 0x5a5   : > { %v4598_v23 = vadd.f32 1.0, %v6292_v57  ;;  %v4536_v26 = vmul.f32 0.7978846, %v4504_v37 }
 0x5a6   : > { %v5646_v12 = vpop.f32.mrb[74].mxu1  ;;  %6293 = vtanh.f32 %v4537_v48  ;;  %v4631_v4 = vmul.f32 %v4599_v1, %v4375_v7 }
 0x5a7   : > { %v4329_v44 = vadd.f32 %v5646_v12, %v9420_v59  ;;  %v4323_v25 = vpop.f32.mrb[75].mxu1  ;;  %v4630_v49 = vmul.f32 %v4598_v23, %v4374_v51  ;;  %6295 = vtanh.f32 %v4536_v26 }
 0x5a8   : > { %v4324_v5 = vadd.f32 %v9420_v59, %v4323_v25 }
 0x5a9   : > { %v4411_v27 = vmul.f32 0.044715, %v4329_v44  ;;  %5718 = vmatprep.mubr.f32.mxu0 %v4630_v49  ;;  %v4379_v29 = vmul.f32 0.5, %v4329_v44 }
 0x5aa   : > { %v4410_v32 = vmul.f32 0.044715, %v4324_v5  ;;  %5719 = vmatmul.mubr.f32.gmra.mrb[70].mxu0 %v4631_v4  ;;  %v4378_v6 = vmul.f32 0.5, %v4324_v5 }
 0x5ab   : > { %v4443_v22 = vmul.f32 %v4411_v27, %v4329_v44 }
 0x5ac   : > { %v4442_v38 = vmul.f32 %v4410_v32, %v4324_v5 }
 0x5ad   : > { %v4475_v9 = vmul.f32 %v4443_v22, %v4329_v44 }
 0x5ae   : > { %v4474_v42 = vmul.f32 %v4442_v38, %v4324_v5 }
 0x5af   : > { %v4507_v21 = vadd.f32 %v4475_v9, %v4329_v44 }
 0x5b0   : > { %v6294_v15 = vpop.eup %6293  ;;  %v4506_v52 = vadd.f32 %v4474_v42, %v4324_v5 }
 0x5b1   : > { %v6296_v36 = vpop.eup %6295  ;;  %v4601_v41 = vadd.f32 1.0, %v6294_v15  ;;  %v4539_v63 = vmul.f32 0.7978846, %v4507_v21  ;;  %v9457_v21 = vld [vmem:[%s9651_s24] ss:$0 sm:$0xff]  ;;  %s6456_s24 = scalar_lea.vmem %s6455_s28, 8192 }
 0x5b2   : > { %v4600_v0 = vadd.f32 1.0, %v6296_v36  ;;  %v4538_v56 = vmul.f32 0.7978846, %v4506_v52  ;;  %p6458_p9 = scmp.lt.s32.totalorder %s6456_s24, %s6450_s18 }
 0x5b3   : > { %6297 = vtanh.f32 %v4539_v63  ;;  %v4633_v10 = vmul.f32 %v4601_v41, %v4377_v17 }
 0x5b4   : > { %v4632_v46 = vmul.f32 %v4600_v0, %v4376_v8  ;;  %6299 = vtanh.f32 %v4538_v56  ;;  %p6459_p12 = por %p6458_p9, %p6457_p7 }
 0x5b5   : > { %v5649_v11 = vpop.f32.mrb[76].mxu1 }
 0x5b6   : > { %v4339_v33 = vadd.f32 %v5649_v11, %v9420_v59  ;;  %v4333_v14 = vpop.f32.mrb[77].mxu1  ;;  %5721 = vmatprep.mubr.f32.mxu0 %v4632_v46  ;;  %p6460_p1 = pnand %p6459_p12, %p6453_p3 }
 0x5b7   : > { %v4334_v30 = vadd.f32 %v9420_v59, %v4333_v14  ;;  %5722 = vmatmul.mubr.f32.gmra.mrb[72].mxu0 %v4633_v10 }
 0x5b8   : > { %v4413_v40 = vmul.f32 0.044715, %v4339_v33  ;;  %v4381_v7 = vmul.f32 0.5, %v4339_v33 }
 0x5b9   : > { %v4412_v31 = vmul.f32 0.044715, %v4334_v30  ;;  %v4380_v23 = vmul.f32 0.5, %v4334_v30 }
 0x5ba   : > { %v4445_v50 = vmul.f32 %v4413_v40, %v4339_v33 }
 0x5bb   : > { %v4444_v60 = vmul.f32 %v4412_v31, %v4334_v30 }
 0x5bc   : > { %v4477_v39 = vmul.f32 %v4445_v50, %v4339_v33 }
 0x5bd   : > { %v6298_v55 = vpop.eup %6297  ;;  %v4476_v20 = vmul.f32 %v4444_v60, %v4334_v30 }
 0x5be   : > { %v6300_v24 = vpop.eup %6299  ;;  %v4603_v16 = vadd.f32 1.0, %v6298_v55  ;;  %v4509_v18 = vadd.f32 %v4477_v39, %v4339_v33 }
 0x5bf   : > { %v4602_v47 = vadd.f32 1.0, %v6300_v24  ;;  %v4508_v45 = vadd.f32 %v4476_v20, %v4334_v30 }
 0x5c0   : > { %v4541_v53 = vmul.f32 0.7978846, %v4509_v18  ;;  %v4635_v34 = vmul.f32 %v4603_v16, %v4379_v29 }
 0x5c1   : > { %v4634_v54 = vmul.f32 %v4602_v47, %v4378_v6  ;;  %v4540_v3 = vmul.f32 0.7978846, %v4508_v45 }
 0x5c2   : > { %6301 = vtanh.f32 %v4541_v53  ;;  %v5652_v61 = vpop.f32.mrb[78].mxu1 }
 0x5c3   : > { %5724 = vmatprep.mubr.f32.mxu0 %v4634_v54  ;;  %6303 = vtanh.f32 %v4540_v3  ;;  %v4349_v28 = vadd.f32 %v5652_v61, %v9420_v59  ;;  %v4343_v13 = vpop.f32.mrb[79].mxu1 }
 0x5c4   : > { %5725 = vmatmul.mubr.f32.gmra.mrb[74].mxu0 %v4635_v34  ;;  %v4344_v62 = vadd.f32 %v9420_v59, %v4343_v13 }
 0x5c5   : > { %v4415_v35 = vmul.f32 0.044715, %v4349_v28  ;;  %v4383_v38 = vmul.f32 0.5, %v4349_v28 }
 0x5c6   : > { %v4414_v43 = vmul.f32 0.044715, %v4344_v62  ;;  %v4382_v32 = vmul.f32 0.5, %v4344_v62 }
 0x5c7   : > { %v4447_v2 = vmul.f32 %v4415_v35, %v4349_v28 }
 0x5c8   : > { %v4446_v58 = vmul.f32 %v4414_v43, %v4344_v62 }
 0x5c9   : > { %v4479_v19 = vmul.f32 %v4447_v2, %v4349_v28 }
 0x5ca   : > { %v4478_v57 = vmul.f32 %v4446_v58, %v4344_v62 }
 0x5cb   : > { %v4511_v51 = vadd.f32 %v4479_v19, %v4349_v28 }
 0x5cc   : > { %v6302_v37 = vpop.eup %6301  ;;  %v4510_v12 = vadd.f32 %v4478_v57, %v4344_v62 }
 0x5cd   : > { %v6304_v1 = vpop.eup %6303  ;;  %v4605_v48 = vadd.f32 1.0, %v6302_v37  ;;  %v4543_v44 = vmul.f32 0.7978846, %v4511_v51 }
 0x5ce   : > { %v4604_v26 = vadd.f32 1.0, %v6304_v1  ;;  %v4542_v49 = vmul.f32 0.7978846, %v4510_v12 }
 0x5cf   : > { %v4637_v5 = vmul.f32 %v4605_v48, %v4381_v7  ;;  %6305 = vtanh.f32 %v4543_v44 }
 0x5d0   : > { %v4636_v25 = vmul.f32 %v4604_v26, %v4380_v23  ;;  %6307 = vtanh.f32 %v4542_v49 }
 0x5d2   : > { %5727 = vmatprep.mubr.f32.mxu0 %v4636_v25 }
 0x5d3   : > { %5728 = vmatmul.mubr.f32.gmra.mrb[76].mxu0 %v4637_v5 }
 0x5d9   : > { %v6306_v59 = vpop.eup %6305 }
 0x5da   : > { %v6308_v4 = vpop.eup %6307  ;;  %v4607_v27 = vadd.f32 1.0, %v6306_v59 }
 0x5db   : > { %v4606_v22 = vadd.f32 1.0, %v6308_v4 }
 0x5dc   : > { %v4639_v42 = vmul.f32 %v4607_v27, %v4383_v38 }
 0x5dd   : > { %v4638_v9 = vmul.f32 %v4606_v22, %v4382_v32 }
 0x5df   : > { %5730 = vmatprep.mubr.f32.mxu0 %v4638_v9 }
 0x5e0   : > { %5731 = vmatmul.mubr.f32.gmra.mrb[78].mxu0 %v4639_v42 }
 0x5e7   : > { %v5687_v15 = vpop.f32.mrb[48].mxu0 }
 0x5e8   : > { %v4735_v52 = vadd.f32 %v5687_v15, %v9457_v21  ;;  %v4729_v36 = vpop.f32.mrb[49].mxu0 }
 0x5e9   : > { %v4730_v41 = vadd.f32 %v9457_v21, %v4729_v36 }
 0x5ea   : > { %4889 = vst [vmem:[%s9463_s15 + $0x8] sm:$0xff] %v4735_v52 }
 0x5eb   : > { %4888 = vst [vmem:[%s9463_s15] sm:$0xff] %v4730_v41 }
 0x5f7   : > { %v5690_v63 = vpop.f32.mrb[50].mxu0 }
 0x5f8   : > { %v4745_v8 = vadd.f32 %v5690_v63, %v9457_v21  ;;  %v4739_v0 = vpop.f32.mrb[51].mxu0 }
 0x5f9   : > { %v4740_v56 = vadd.f32 %v9457_v21, %v4739_v0 }
 0x5fa   : > { %4891 = vst [vmem:[%s9463_s15 + $0x18] sm:$0xff] %v4745_v8 }
 0x5fb   : > { %4890 = vst [vmem:[%s9463_s15 + $0x10] sm:$0xff] %v4740_v56 }
 0x603   : > { %v5693_v17 = vpop.f32.mrb[52].mxu0 }
 0x604   : > { %v4755_v46 = vadd.f32 %v5693_v17, %v9457_v21  ;;  %v4749_v11 = vpop.f32.mrb[53].mxu0 }
 0x605   : > { %v4750_v10 = vadd.f32 %v9457_v21, %v4749_v11 }
 0x606   : > { %4893 = vst [vmem:[%s9463_s15 + $0x28] sm:$0xff] %v4755_v46 }
 0x607   : > { %4892 = vst [vmem:[%s9463_s15 + $0x20] sm:$0xff] %v4750_v10 }
 0x60f   : > { %v5696_v33 = vpop.f32.mrb[54].mxu0 }
 0x610   : > { %v4765_v14 = vadd.f32 %v5696_v33, %v9457_v21  ;;  %v4759_v30 = vpop.f32.mrb[55].mxu0 }
 0x611   : > { %v4760_v40 = vadd.f32 %v9457_v21, %v4759_v30 }
 0x612   : > { %4895 = vst [vmem:[%s9463_s15 + $0x38] sm:$0xff] %v4765_v14 }
 0x613   : > { %4894 = vst [vmem:[%s9463_s15 + $0x30] sm:$0xff] %v4760_v40 }
 0x61e   : > { %v5699_v31 = vpop.f32.mrb[56].mxu0 }
 0x61f   : > { %v4775_v50 = vadd.f32 %v5699_v31, %v9457_v21  ;;  %v4769_v60 = vpop.f32.mrb[57].mxu0 }
 0x620   : > { %v4770_v39 = vadd.f32 %v9457_v21, %v4769_v60 }
 0x621   : > { %4897 = vst [vmem:[%s9463_s15 + $0x48] sm:$0xff] %v4775_v50 }
 0x622   : > { %4896 = vst [vmem:[%s9463_s15 + $0x40] sm:$0xff] %v4770_v39 }
 0x62b   : > { %v5702_v55 = vpop.f32.mrb[58].mxu0 }
 0x62c   : > { %v4785_v20 = vadd.f32 %v5702_v55, %v9457_v21  ;;  %v4779_v24 = vpop.f32.mrb[59].mxu0 }
 0x62d   : > { %v4780_v16 = vadd.f32 %v9457_v21, %v4779_v24 }
 0x62e   : > { %4899 = vst [vmem:[%s9463_s15 + $0x58] sm:$0xff] %v4785_v20 }
 0x62f   : > { %4898 = vst [vmem:[%s9463_s15 + $0x50] sm:$0xff] %v4780_v16 }
 0x638   : > { %v5705_v18 = vpop.f32.mrb[60].mxu0 }
 0x639   : > { %v4795_v6 = vadd.f32 %v5705_v18, %v9457_v21  ;;  %v4789_v47 = vpop.f32.mrb[61].mxu0 }
 0x63a   : > { %v4790_v45 = vadd.f32 %v9457_v21, %v4789_v47 }
 0x63b   : > { %4901 = vst [vmem:[%s9463_s15 + $0x68] sm:$0xff] %v4795_v6 }
 0x63c   : > { %4900 = vst [vmem:[%s9463_s15 + $0x60] sm:$0xff] %v4790_v45 }
 0x645   : > { %v5708_v29 = vpop.f32.mrb[62].mxu0 }
 0x646   : > { %v4805_v53 = vadd.f32 %v5708_v29, %v9457_v21  ;;  %v4799_v54 = vpop.f32.mrb[63].mxu0 }
 0x647   : > { %v4800_v3 = vadd.f32 %v9457_v21, %v4799_v54 }
 0x648   : > { %4903 = vst [vmem:[%s9463_s15 + $0x78] sm:$0xff] %v4805_v53 }
 0x649   : > { %4902 = vst [vmem:[%s9463_s15 + $0x70] sm:$0xff] %v4800_v3 }
 0x654   : > { %v5711_v34 = vpop.f32.mrb[64].mxu0 }
 0x655   : > { %v4815_v61 = vadd.f32 %v5711_v34, %v9457_v21  ;;  %v4809_v28 = vpop.f32.mrb[65].mxu0 }
 0x656   : > { %v4810_v13 = vadd.f32 %v9457_v21, %v4809_v28 }
 0x657   : > { %4905 = vst [vmem:[%s9463_s15 + $0x88] sm:$0xff] %v4815_v61 }
 0x658   : > { %4904 = vst [vmem:[%s9463_s15 + $0x80] sm:$0xff] %v4810_v13 }
 0x663   : > { %v5714_v62 = vpop.f32.mrb[66].mxu0 }
 0x664   : > { %v4825_v35 = vadd.f32 %v5714_v62, %v9457_v21  ;;  %v4819_v43 = vpop.f32.mrb[67].mxu0 }
 0x665   : > { %v4820_v2 = vadd.f32 %v9457_v21, %v4819_v43 }
 0x666   : > { %4907 = vst [vmem:[%s9463_s15 + $0x98] sm:$0xff] %v4825_v35 }
 0x667   : > { %4906 = vst [vmem:[%s9463_s15 + $0x90] sm:$0xff] %v4820_v2 }
 0x670   : > { %v5717_v58 = vpop.f32.mrb[68].mxu0 }
 0x671   : > { %v4835_v19 = vadd.f32 %v5717_v58, %v9457_v21  ;;  %v4829_v37 = vpop.f32.mrb[69].mxu0 }
 0x672   : > { %v4830_v57 = vadd.f32 %v9457_v21, %v4829_v37 }
 0x673   : > { %4909 = vst [vmem:[%s9463_s15 + $0xa8] sm:$0xff] %v4835_v19 }
 0x674   : > { %4908 = vst [vmem:[%s9463_s15 + $0xa0] sm:$0xff] %v4830_v57 }
 0x67d   : > { %v5720_v1 = vpop.f32.mrb[70].mxu0 }
 0x67e   : > { %v4845_v48 = vadd.f32 %v5720_v1, %v9457_v21  ;;  %v4839_v51 = vpop.f32.mrb[71].mxu0 }
 0x67f   : > { %v4840_v23 = vadd.f32 %v9457_v21, %v4839_v51 }
 0x680   : > { %4911 = vst [vmem:[%s9463_s15 + $0xb8] sm:$0xff] %v4845_v48 }
 0x681   : > { %4910 = vst [vmem:[%s9463_s15 + $0xb0] sm:$0xff] %v4840_v23 }
 0x68a   : > { %v5723_v26 = vpop.f32.mrb[72].mxu0 }
 0x68b   : > { %v4855_v12 = vadd.f32 %v5723_v26, %v9457_v21  ;;  %v4849_v7 = vpop.f32.mrb[73].mxu0 }
 0x68c   : > { %v4850_v44 = vadd.f32 %v9457_v21, %v4849_v7 }
 0x68d   : > { %4913 = vst [vmem:[%s9463_s15 + $0xc8] sm:$0xff] %v4855_v12 }
 0x68e   : > { %4912 = vst [vmem:[%s9463_s15 + $0xc0] sm:$0xff] %v4850_v44 }
 0x697   : > { %v5726_v25 = vpop.f32.mrb[74].mxu0 }
 0x698   : > { %v4865_v49 = vadd.f32 %v5726_v25, %v9457_v21  ;;  %v4859_v5 = vpop.f32.mrb[75].mxu0 }
 0x699   : > { %v4860_v59 = vadd.f32 %v9457_v21, %v4859_v5 }
 0x69a   : > { %4915 = vst [vmem:[%s9463_s15 + $0xd8] sm:$0xff] %v4865_v49 }
 0x69b   : > { %4914 = vst [vmem:[%s9463_s15 + $0xd0] sm:$0xff] %v4860_v59 }
 0x6a6   : > { %v5729_v4 = vpop.f32.mrb[76].mxu0 }
 0x6a7   : > { %v4875_v27 = vadd.f32 %v5729_v4, %v9457_v21  ;;  %v4869_v32 = vpop.f32.mrb[77].mxu0 }
 0x6a8   : > { %v4870_v22 = vadd.f32 %v9457_v21, %v4869_v32 }
 0x6a9   : > { %4917 = vst [vmem:[%s9463_s15 + $0xe8] sm:$0xff] %v4875_v27 }
 0x6aa   : > { %4916 = vst [vmem:[%s9463_s15 + $0xe0] sm:$0xff] %v4870_v22 }
 0x6b3   : > { %v5732_v38 = vpop.f32.mrb[78].mxu0 }
 0x6b4   : > { %v4885_v9 = vadd.f32 %v5732_v38, %v9457_v21  ;;  %v4879_v42 = vpop.f32.mrb[79].mxu0 }
 0x6b5   : > { %v4880_v15 = vadd.f32 %v9457_v21, %v4879_v42 }
 0x6b6   : > { %4919 = vst [vmem:[%s9463_s15 + $0xf8] sm:$0xff] %v4885_v9 }
 0x6b7   : > { %4918 = vst [vmem:[%s9463_s15 + $0xf0] sm:$0xff] %v4880_v15 }
 0x6b8   : > { %6463 = shalt.err (!%p6460_p1)
}
 0x6b9   : > { %s6464_s15 = scalar_lea.hbm %s9529_s10, 4096  ;;  %s6468_s26 = scalar_lea.hbm %s9652_s29, 8192 }
 0x6ba   : > { %p6465_p13 = scmp.ne.s32.totalorder %s9529_s10, %s6464_s15  ;;  %p6469_p4 = scmp.lt.u32.totalorder %s9529_s10, %s9652_s29 }
 0x6bb   : > { %p6470_p5 = scmp.lt.u32.totalorder %s6468_s26, %s6464_s15  ;;  %p6472_p11 = scmp.lt.u32.totalorder %s6464_s15, %s9529_s10 }
 0x6bc   : > { %p6466_p6 = pnand %p6465_p13, %p9653_p0 }
 0x6bd   : > { %p6471_p8 = por %p6470_p5, %p6469_p4 }
 0x6be   : > { %p6467_p10 = pneg %p6466_p6 }
 0x6bf   : > { %p6473_p2 = por %p6472_p11, %p6471_p8 }
 0x6c1   : > { %p6474_p3 = pnand %p6473_p2, %p6467_p10 }
 0x6c3   : > { %6477 = shalt.err (!%p6474_p3)
}
 0x6c4   : > { %s6529_s18 = smov 128   ;;  %s6530_s24 = smov 8  }
 0x6c5   : > { %5863 = dma.vmem_to_hbm [thread:$0]  (%p9653_p0), %s9531_s30, 4096, %s9529_s10, %s4921_s22, %s6529_s18, %s6529_s18, %s6530_s24  }
 0x6c6 PF: > { %s9654_s23 = sld [smem:[#allocation13_spill]]  ;;  %s9655_s27 = sld [smem:[#allocation14_spill]] }
 0x6c7   : > { %p9657_p9 = scmp.ge.s32.totalorder %s6520_s21, 2 }
 0x6cc   : > { %s4949_s16 = sand.u32 1, %s9654_s23   ;;  %p9656_p7 = scmp.ne.s32.totalorder %s9655_s27, 0 }
 0x6cd   : > { %s4950_s15 = scalar_lea.sflag [#allocation5], %s4949_s16 }
 0x6ce   : > { %p5877_p12 = pnand %p9657_p9, %p9656_p7 }
 0x6d0   : > { %6503 = dma.done.wait (!%p5877_p12), %s4950_s15, 4096  }
 0x6d1   : > { %6505 = vsyncadd (!%p5877_p12), %s4950_s15, 4294963200  ;;  %p29_p1 = scmp.ge.s32.totalorder %s6727_s13, 4   ;;  %s9658_s18 = smov %s6512_s19 }
 0x6d2   : > { %s9659_s19 = smov %s6516_s20  ;;  %s9660_s20 = smov %s6743_s17 }
 0x6d3   : > { %s9661_s21 = smov %s6727_s13  ;;  %31 = sbr.rel (!%p29_p1) target bundleno = 12 (0xc), region = 136 }
 0x6da   :  { %4955 = vsyncpa [#allocation4], 1 }
 0x6db   :  { %4957 = vsyncpa [#allocation4 + $0x1], 1 }
 0x6dc   :  { %4958 = vsyncpa [#allocation7], 1 }
 0x6dd   :  { %4959 = vsyncpa [#allocation5], 1 }
 0x6de   :  { %4961 = vsyncpa [#allocation5 + $0x1], 1 }

</bundles_post_ra>
